<compile_context>
chip_gen: v7x
topology: tpu7x:2x2x1
jax: 0.10.0
libtpu: 0.0.40
codegen_flags: <defaults>
</compile_context>

<pallas_src>
import functools

import jax
import jax.numpy as jnp
from jax.experimental import pallas as pl
from jax.experimental.pallas import tpu as pltpu

EPS = 1e-5


def _round_up(n, m):
    return (n + m - 1) // m * m


def _pick_bblk(B, cap=8):
    """Largest divisor of B that is <= cap: images folded into the lane axis.

    Folding amortizes per-grid-step overhead (dominant at small shapes).  On
    v7x one may prefer keeping B // Bblk >= 2 so both TensorCores get work.
    """
    for cand in range(min(B, cap), 0, -1):
        if B % cand == 0:
            return cand
    return 1


# ---------------------------------------------------------------------------
# Fused Guide kernel (one grid step == Bblk batch elements)
# ---------------------------------------------------------------------------
def _guide_kernel(x_ref, g_ref, mask_ref, wc_ref, bc_ref, w12_ref, b12_ref,
                  r22_ref, b22_ref, w3_ref, aff_ref, o_ref,
                  pc_ref, p4_ref, *, Ci, Cw, H, W, G1, G2, Bblk):
    HW = H * W
    N = Bblk * HW
    Ccat = Ci + Cw
    masks = mask_ref[...]                                    # (9, N) f32 {0,1}

    def store_taps(src, c0, cin, dst_ref, G):
        """im2col: write 9 shifted+masked copies of `src` (cin, N) into rows
        [k*G + c0 : k*G + c0 + cin] of the bf16 patch buffer, one per tap k."""
        for k in range(9):
            oy, ox = k // 3 - 1, k % 3 - 1
            delta = oy * W + ox
            if delta == 0:                   # center tap: no roll, mask == 1
                tap = src
            else:
                tap = pltpu.roll(src, (-delta) % N, axis=1) * masks[k:k + 1, :]
            dst_ref[k * G + c0:k * G + c0 + cin, :] = tap.astype(dst_ref.dtype)

    # ---- zero ONLY the padding rows of the patch buffers, once per step ----
    # (keeps the zero-weight K rows finite; p4 is reused for conv12 and conv3
    #  patches with identical pad rows, so a single zeroing suffices.)
    if Ccat < G1:
        for k in range(9):
            pc_ref[k * G1 + Ccat:(k + 1) * G1, :] = jnp.zeros(
                (G1 - Ccat, N), pc_ref.dtype)
    if Ci < G2:
        for k in range(9):
            p4_ref[k * G2 + Ci:(k + 1) * G2, :] = jnp.zeros(
                (G2 - Ci, N), p4_ref.dtype)

    # ---- fold the Bblk images into the lane axis: (C, Bblk*HW) ----
    if Bblk == 1:
        x_wide = x_ref[0]
        g_wide = g_ref[0]
    else:
        x_wide = jnp.concatenate([x_ref[b] for b in range(Bblk)], axis=1)
        g_wide = jnp.concatenate([g_ref[b] for b in range(Bblk)], axis=1)

    # ---- shared im2col of cat = [x, g] (x rows 0..Ci-1, g rows Ci..Ccat-1) ----
    store_taps(x_wide, 0, Ci, pc_ref, G1)
    store_taps(g_wide, Ci, Cw, pc_ref, G1)

    # ---- conv11 & conv21 fused into one MXU matmul (both: bias + ReLU) ----
    w1121 = jnp.dot(wc_ref[...], pc_ref[...], preferred_element_type=jnp.float32)
    w1121 = jnp.maximum(w1121 + bc_ref[...], 0.0)            # (2*Ci, N)
    w11 = w1121[:Ci, :]
    w21 = w1121[Ci:, :]

    # ---- conv12: 3x3 + bias; output rows tap-major, padded to G2 per tap ----
    store_taps(w11, 0, Ci, p4_ref, G2)
    w12 = jnp.dot(w12_ref[...], p4_ref[...],
                  preferred_element_type=jnp.float32)        # (9*G2, N)

    aff = aff_ref[...]                                       # (Ci, 6) folded BN params

    # ---- Conv2dLocal (spatially varying per-channel 3x3) + BN + ReLU ----
    # tap slices of w12 start on 8-row sublane boundaries (k*G2); first tap
    # initializes the accumulator instead of adding into zeros.
    loc = None
    for k in range(9):
        xs = pc_ref[k * G1:k * G1 + Ci, :].astype(jnp.float32)   # shifted x taps
        wk = w12[k * G2:k * G2 + Ci, :] + b12_ref[k * G2:k * G2 + Ci, :]
        term = xs * wk
        loc = term if loc is None else loc + term
    loc = jnp.maximum(loc * aff[:, 0:1] + aff[:, 1:2], 0.0)   # (Ci, N)

    # ---- per image: AdaptiveAvgPool(w21) -> conv22(1x1) -> bmm(weight22, loc) ----
    r22 = r22_ref[...]                                        # (Ci*Ci, Ci)
    b22 = b22_ref[...]                                        # (Ci, Ci)
    outs = []
    for b in range(Bblk):
        lo, hi = b * HW, (b + 1) * HW
        pooled = jnp.mean(w21[:, lo:hi], axis=1, keepdims=True)    # (Ci, 1)
        # weight22[i, j] = b22[i, j] + sum_c pooled[c] * r22[c*Ci + i, j]
        # (Ci, Ci) is tiny (4x4) here, so the unrolled FMA is cheaper than a
        # matmul + relayout; repack as a single MXU contraction if Ci grows.
        w22 = b22
        for c in range(Ci):
            w22 = w22 + pooled[c:c + 1, 0:1] * r22[c * Ci:(c + 1) * Ci, :]
        outs.append(jnp.dot(w22, loc[:, lo:hi],
                            preferred_element_type=jnp.float32))
    out = outs[0] if Bblk == 1 else jnp.concatenate(outs, axis=1)  # (Ci, N)
    out = jnp.maximum(out * aff[:, 2:3] + aff[:, 3:4], 0.0)        # br: BN + ReLU

    # ---- conv3 (3x3, no bias) + BN + ReLU ----
    store_taps(out, 0, Ci, p4_ref, G2)
    out = jnp.dot(w3_ref[...], p4_ref[...], preferred_element_type=jnp.float32)
    out = jnp.maximum(out * aff[:, 4:5] + aff[:, 5:6], 0.0)

    for b in range(Bblk):
        o_ref[b] = out[:, b * HW:(b + 1) * HW].astype(o_ref.dtype)


# ---------------------------------------------------------------------------
# Wrapper-side (static) parameter packing
# ---------------------------------------------------------------------------
def _conv_w_mat(w_oihw, G):
    """(Co, Cin, 3, 3) -> (Co, 9*G) with K index = k*G + cin (k = dy*3+dx), zero-padded."""
    co, cin = w_oihw.shape[0], w_oihw.shape[1]
    w = jnp.transpose(w_oihw, (2, 3, 1, 0)).reshape(9, cin, co)
    w = jnp.pad(w, ((0, 0), (0, G - cin), (0, 0)))
    return jnp.transpose(w.reshape(9 * G, co), (1, 0))


def _bn_scale_shift(gamma, beta, mean, var, eps=EPS):
    scale = gamma / jnp.sqrt(var + eps)
    return scale, beta - mean * scale


def _tap_masks(H, W):
    pos = jnp.arange(H * W, dtype=jnp.int32)
    hh, ww = pos // W, pos % W
    rows = []
    for k in range(9):
        oy, ox = k // 3 - 1, k % 3 - 1
        ok = (hh + oy >= 0) & (hh + oy < H) & (ww + ox >= 0) & (ww + ox < W)
        rows.append(ok.astype(jnp.float32))
    return jnp.stack(rows, axis=0)                          # (9, H*W)


def init_guide_params(key, input_planes, weight_planes):
    Ci, Cw = input_planes, weight_planes
    keys = jax.random.split(key, 12)

    def nrm(k, shape, s=0.1):
        return s * jax.random.normal(k, shape, jnp.float32)

    p = {}
    p['w11'] = nrm(keys[0], (Ci, Ci + Cw, 3, 3));  p['b11'] = nrm(keys[1], (Ci,))
    p['w12'] = nrm(keys[2], (Ci * 9, Ci, 3, 3));   p['b12'] = nrm(keys[3], (Ci * 9,))
    p['w21'] = nrm(keys[4], (Ci, Ci + Cw, 3, 3));  p['b21'] = nrm(keys[5], (Ci,))
    p['w22'] = nrm(keys[6], (Ci * Ci, Ci, 1, 1));  p['b22'] = nrm(keys[7], (Ci * Ci,))
    p['w3'] = nrm(keys[8], (Ci, Ci, 3, 3))          # conv3 has no bias (uses BN)
    for name, k in (('bn_local', keys[9]), ('bn_br', keys[10]), ('bn3', keys[11])):
        k1, k2 = jax.random.split(k)
        p[name] = dict(gamma=1.0 + nrm(k1, (Ci,)), beta=nrm(k2, (Ci,)),
                       mean=jnp.zeros((Ci,), jnp.float32),
                       var=jnp.ones((Ci,), jnp.float32))
    return p


def guide_forward(x_nchw, g_nchw, p, *, max_batch_fold=8):
    B, Ci, H, W = x_nchw.shape
    Cw = g_nchw.shape[1]
    Ccat = Ci + Cw
    HW = H * W
    G1 = _round_up(Ccat, 8)        # tap-group row stride for cat patches
    G2 = _round_up(Ci, 8)          # tap-group row stride for Ci-channel patches
    Bblk = _pick_bblk(B, max_batch_fold)
    nsteps = B // Bblk
    N = Bblk * HW

    # channel-major flattening (pure reshapes; no transpose / concat in HBM)
    x_f = x_nchw.reshape(B, Ci, HW).astype(jnp.float32)
    g_f = g_nchw.reshape(B, Cw, HW).astype(jnp.float32)

    masks = jnp.tile(_tap_masks(H, W), (1, Bblk))            # (9, Bblk*HW)

    # conv11 + conv21 merged into one weight matrix (both branches: bias + ReLU)
    Wc = jnp.concatenate([_conv_w_mat(p['w11'], G1),
                          _conv_w_mat(p['w21'], G1)], axis=0).astype(jnp.bfloat16)
    bc = jnp.concatenate([p['b11'], p['b21']]).reshape(2 * Ci, 1).astype(jnp.float32)

    # conv12: output channels re-ordered from (c*9 + k) to tap-major (k, c) and
    # zero-padded to G2 rows per tap group -> sublane-aligned in-kernel slices.
    W12full = _conv_w_mat(p['w12'], G2)                      # (Ci*9, 9*G2); row o = c*9 + k
    W12full = jnp.transpose(W12full.reshape(Ci, 9, 9 * G2), (1, 0, 2))   # [k, c, :]
    W12m = jnp.pad(W12full, ((0, 0), (0, G2 - Ci), (0, 0))).reshape(9 * G2, 9 * G2)
    W12m = W12m.astype(jnp.bfloat16)
    b12 = jnp.transpose(p['b12'].reshape(Ci, 9), (1, 0))      # [k, c]
    b12 = jnp.pad(b12, ((0, 0), (0, G2 - Ci))).reshape(9 * G2, 1).astype(jnp.float32)

    # conv22 (1x1):  R22[c*Ci + i, j] = W22[i*Ci + j, c];  b22m[i, j] = b22[i*Ci + j]
    W22p = p['w22'].reshape(Ci * Ci, Ci)
    R22 = jnp.transpose(W22p.reshape(Ci, Ci, Ci), (2, 0, 1)).reshape(Ci * Ci, Ci)
    R22 = R22.astype(jnp.float32)
    b22m = p['b22'].reshape(Ci, Ci).astype(jnp.float32)

    W3m = _conv_w_mat(p['w3'], G2).astype(jnp.bfloat16)

    s_loc, t_loc = _bn_scale_shift(**p['bn_local'])
    s_br, t_br = _bn_scale_shift(**p['bn_br'])
    s3, t3 = _bn_scale_shift(**p['bn3'])
    aff = jnp.stack([s_loc, t_loc, s_br, t_br, s3, t3], axis=1).astype(jnp.float32)

    kernel = functools.partial(_guide_kernel, Ci=Ci, Cw=Cw, H=H, W=W,
                               G1=G1, G2=G2, Bblk=Bblk)
    bcast2 = lambda g: (0, 0)

    out = pl.pallas_call(
        kernel,
        out_shape=jax.ShapeDtypeStruct((B, Ci, HW), jnp.float32),
        grid_spec=pltpu.PrefetchScalarGridSpec(
            num_scalar_prefetch=0,
            grid=(nsteps,),
            in_specs=[
                pl.BlockSpec((Bblk, Ci, HW), lambda g: (g, 0, 0)),   # input x
                pl.BlockSpec((Bblk, Cw, HW), lambda g: (g, 0, 0)),   # guide weight
                pl.BlockSpec((9, N), bcast2),                        # border masks (tiled)
                pl.BlockSpec((2 * Ci, 9 * G1), bcast2),              # conv11|21 weights
                pl.BlockSpec((2 * Ci, 1), bcast2),                   # conv11|21 biases
                pl.BlockSpec((9 * G2, 9 * G2), bcast2),              # conv12 weights (padded)
                pl.BlockSpec((9 * G2, 1), bcast2),                   # conv12 bias   (padded)
                pl.BlockSpec((Ci * Ci, Ci), bcast2),                 # conv22 weights (rearranged)
                pl.BlockSpec((Ci, Ci), bcast2),                      # conv22 bias matrix
                pl.BlockSpec((Ci, 9 * G2), bcast2),                  # conv3 weights
                pl.BlockSpec((Ci, 6), bcast2),                       # folded BN scale/shift
            ],
            out_specs=pl.BlockSpec((Bblk, Ci, HW), lambda g: (g, 0, 0)),
            scratch_shapes=[
                pltpu.VMEM((9 * G1, N), jnp.bfloat16),               # im2col(cat)  (bf16)
                pltpu.VMEM((9 * G2, N), jnp.bfloat16),               # im2col(w11 / out)
            ],
        ),
        compiler_params=pltpu.CompilerParams(
            dimension_semantics=("parallel",),
            vmem_limit_bytes=32 * 1024 * 1024,
        ),
    )(x_f, g_f, masks, Wc, bc, W12m, b12, R22, b22m, W3m, aff)

    return out.reshape(B, Ci, H, W)                          # NCHW


if __name__ == "__main__":
    B, Ci, Cw, H, W = 2, 4, 4, 16, 16
    key = jax.random.PRNGKey(0)
    k_in, k_g, k_p = jax.random.split(key, 3)
    x = jax.random.normal(k_in, (B, Ci, H, W), jnp.float32)
    g = jax.random.normal(k_g, (B, Cw, H, W), jnp.float32)
    params = init_guide_params(k_p, Ci, Cw)

    out = guide_forward(x, g, params)
    out = jax.block_until_ready(out)

    assert out.shape == (B, Ci, H, W), out.shape
    assert bool(jnp.all(jnp.isfinite(out)))
    print("KERNEL_OK")
</pallas_src>

<mosaic_0001>
module attributes {stable_mosaic.version = 11 : i64} {
  func.func @_guide_kernel(%arg0: i32, %arg1: memref<2x4x256xf32, #tpu.memory_space<vmem>>, %arg2: memref<2x4x256xf32, #tpu.memory_space<vmem>>, %arg3: memref<9x512xf32, #tpu.memory_space<vmem>>, %arg4: memref<8x72xbf16, #tpu.memory_space<vmem>>, %arg5: memref<8x1xf32, #tpu.memory_space<vmem>>, %arg6: memref<72x72xbf16, #tpu.memory_space<vmem>>, %arg7: memref<72x1xf32, #tpu.memory_space<vmem>>, %arg8: memref<16x4xf32, #tpu.memory_space<vmem>>, %arg9: memref<4x4xf32, #tpu.memory_space<vmem>>, %arg10: memref<4x72xbf16, #tpu.memory_space<vmem>>, %arg11: memref<4x6xf32, #tpu.memory_space<vmem>>, %arg12: memref<2x4x256xf32, #tpu.memory_space<vmem>>, %arg13: memref<72x512xbf16, #tpu.memory_space<vmem>>, %arg14: memref<72x512xbf16, #tpu.memory_space<vmem>>) attributes {dimension_semantics = [#tpu.dimension_semantics<parallel>], iteration_bounds = array<i64: 1>, scalar_prefetch = 0 : i64, scratch_operands = 2 : i64, tpu.core_type = #tpu.core_type<tc>, window_params = [{transform_indices = @transform_0, window_bounds = array<i64: 2, 4, 256>}, {transform_indices = @transform_1, window_bounds = array<i64: 2, 4, 256>}, {pipeline_mode = #tpu.pipeline_mode<synchronous>, transform_indices = @transform_2, window_bounds = array<i64: 9, 512>}, {pipeline_mode = #tpu.pipeline_mode<synchronous>, transform_indices = @transform_3, window_bounds = array<i64: 8, 72>}, {pipeline_mode = #tpu.pipeline_mode<synchronous>, transform_indices = @transform_4, window_bounds = array<i64: 8, 1>}, {pipeline_mode = #tpu.pipeline_mode<synchronous>, transform_indices = @transform_5, window_bounds = array<i64: 72, 72>}, {pipeline_mode = #tpu.pipeline_mode<synchronous>, transform_indices = @transform_6, window_bounds = array<i64: 72, 1>}, {pipeline_mode = #tpu.pipeline_mode<synchronous>, transform_indices = @transform_7, window_bounds = array<i64: 16, 4>}, {pipeline_mode = #tpu.pipeline_mode<synchronous>, transform_indices = @transform_8, window_bounds = array<i64: 4, 4>}, {pipeline_mode = #tpu.pipeline_mode<synchronous>, transform_indices = @transform_9, window_bounds = array<i64: 4, 72>}, {pipeline_mode = #tpu.pipeline_mode<synchronous>, transform_indices = @transform_10, window_bounds = array<i64: 4, 6>}, {transform_indices = @transform_11, window_bounds = array<i64: 2, 4, 256>}]} {
    %c0 = arith.constant 0 : index
    %c0_0 = arith.constant 0 : index
    %0 = vector.load %arg3[%c0, %c0_0] : memref<9x512xf32, #tpu.memory_space<vmem>>, vector<9x512xf32>
    %cst = arith.constant 0.000000e+00 : bf16
    %1 = vector.broadcast %cst : bf16 to vector<4x512xbf16>
    %c4 = arith.constant 4 : index
    %c0_1 = arith.constant 0 : index
    %2 = vector.load %arg14[%c4, %c0_1] : memref<72x512xbf16, #tpu.memory_space<vmem>>, vector<4x512xbf16>
    tpu.vector_store %arg14[%c4, %c0_1], %1 {strides = array<i32>} : memref<72x512xbf16, #tpu.memory_space<vmem>>, vector<4x512xbf16>,
    %cst_2 = arith.constant 0.000000e+00 : bf16
    %3 = vector.broadcast %cst_2 : bf16 to vector<4x512xbf16>
    %c12 = arith.constant 12 : index
    %c0_3 = arith.constant 0 : index
    %4 = vector.load %arg14[%c12, %c0_3] : memref<72x512xbf16, #tpu.memory_space<vmem>>, vector<4x512xbf16>
    tpu.vector_store %arg14[%c12, %c0_3], %3 {strides = array<i32>} : memref<72x512xbf16, #tpu.memory_space<vmem>>, vector<4x512xbf16>,
    %cst_4 = arith.constant 0.000000e+00 : bf16
    %5 = vector.broadcast %cst_4 : bf16 to vector<4x512xbf16>
    %c20 = arith.constant 20 : index
    %c0_5 = arith.constant 0 : index
    %6 = vector.load %arg14[%c20, %c0_5] : memref<72x512xbf16, #tpu.memory_space<vmem>>, vector<4x512xbf16>
    tpu.vector_store %arg14[%c20, %c0_5], %5 {strides = array<i32>} : memref<72x512xbf16, #tpu.memory_space<vmem>>, vector<4x512xbf16>,
    %cst_6 = arith.constant 0.000000e+00 : bf16
    %7 = vector.broadcast %cst_6 : bf16 to vector<4x512xbf16>
    %c28 = arith.constant 28 : index
    %c0_7 = arith.constant 0 : index
    %8 = vector.load %arg14[%c28, %c0_7] : memref<72x512xbf16, #tpu.memory_space<vmem>>, vector<4x512xbf16>
    tpu.vector_store %arg14[%c28, %c0_7], %7 {strides = array<i32>} : memref<72x512xbf16, #tpu.memory_space<vmem>>, vector<4x512xbf16>,
    %cst_8 = arith.constant 0.000000e+00 : bf16
    %9 = vector.broadcast %cst_8 : bf16 to vector<4x512xbf16>
    %c36 = arith.constant 36 : index
    %c0_9 = arith.constant 0 : index
    %10 = vector.load %arg14[%c36, %c0_9] : memref<72x512xbf16, #tpu.memory_space<vmem>>, vector<4x512xbf16>
    tpu.vector_store %arg14[%c36, %c0_9], %9 {strides = array<i32>} : memref<72x512xbf16, #tpu.memory_space<vmem>>, vector<4x512xbf16>,
    %cst_10 = arith.constant 0.000000e+00 : bf16
    %11 = vector.broadcast %cst_10 : bf16 to vector<4x512xbf16>
    %c44 = arith.constant 44 : index
    %c0_11 = arith.constant 0 : index
    %12 = vector.load %arg14[%c44, %c0_11] : memref<72x512xbf16, #tpu.memory_space<vmem>>, vector<4x512xbf16>
    tpu.vector_store %arg14[%c44, %c0_11], %11 {strides = array<i32>} : memref<72x512xbf16, #tpu.memory_space<vmem>>, vector<4x512xbf16>,
    %cst_12 = arith.constant 0.000000e+00 : bf16
    %13 = vector.broadcast %cst_12 : bf16 to vector<4x512xbf16>
    %c52 = arith.constant 52 : index
    %c0_13 = arith.constant 0 : index
    %14 = vector.load %arg14[%c52, %c0_13] : memref<72x512xbf16, #tpu.memory_space<vmem>>, vector<4x512xbf16>
    tpu.vector_store %arg14[%c52, %c0_13], %13 {strides = array<i32>} : memref<72x512xbf16, #tpu.memory_space<vmem>>, vector<4x512xbf16>,
    %cst_14 = arith.constant 0.000000e+00 : bf16
    %15 = vector.broadcast %cst_14 : bf16 to vector<4x512xbf16>
    %c60 = arith.constant 60 : index
    %c0_15 = arith.constant 0 : index
    %16 = vector.load %arg14[%c60, %c0_15] : memref<72x512xbf16, #tpu.memory_space<vmem>>, vector<4x512xbf16>
    tpu.vector_store %arg14[%c60, %c0_15], %15 {strides = array<i32>} : memref<72x512xbf16, #tpu.memory_space<vmem>>, vector<4x512xbf16>,
    %cst_16 = arith.constant 0.000000e+00 : bf16
    %17 = vector.broadcast %cst_16 : bf16 to vector<4x512xbf16>
    %c68 = arith.constant 68 : index
    %c0_17 = arith.constant 0 : index
    %18 = vector.load %arg14[%c68, %c0_17] : memref<72x512xbf16, #tpu.memory_space<vmem>>, vector<4x512xbf16>
    tpu.vector_store %arg14[%c68, %c0_17], %17 {strides = array<i32>} : memref<72x512xbf16, #tpu.memory_space<vmem>>, vector<4x512xbf16>,
    %c0_18 = arith.constant 0 : index
    %c0_19 = arith.constant 0 : index
    %c0_20 = arith.constant 0 : index
    %19 = vector.load %arg1[%c0_18, %c0_19, %c0_20] : memref<2x4x256xf32, #tpu.memory_space<vmem>>, vector<1x4x256xf32>
    %20 = vector.shape_cast %19 : vector<1x4x256xf32> to vector<4x256xf32>
    %c1 = arith.constant 1 : index
    %c0_21 = arith.constant 0 : index
    %c0_22 = arith.constant 0 : index
    %21 = vector.load %arg1[%c1, %c0_21, %c0_22] : memref<2x4x256xf32, #tpu.memory_space<vmem>>, vector<1x4x256xf32>
    %22 = vector.shape_cast %21 : vector<1x4x256xf32> to vector<4x256xf32>
    %23 = tpu.concatenate %20, %22 in 1 : vector<4x256xf32>, vector<4x256xf32> -> vector<4x512xf32>
    %c0_23 = arith.constant 0 : index
    %c0_24 = arith.constant 0 : index
    %c0_25 = arith.constant 0 : index
    %24 = vector.load %arg2[%c0_23, %c0_24, %c0_25] : memref<2x4x256xf32, #tpu.memory_space<vmem>>, vector<1x4x256xf32>
    %25 = vector.shape_cast %24 : vector<1x4x256xf32> to vector<4x256xf32>
    %c1_26 = arith.constant 1 : index
    %c0_27 = arith.constant 0 : index
    %c0_28 = arith.constant 0 : index
    %26 = vector.load %arg2[%c1_26, %c0_27, %c0_28] : memref<2x4x256xf32, #tpu.memory_space<vmem>>, vector<1x4x256xf32>
    %27 = vector.shape_cast %26 : vector<1x4x256xf32> to vector<4x256xf32>
    %28 = tpu.concatenate %25, %27 in 1 : vector<4x256xf32>, vector<4x256xf32> -> vector<4x512xf32>
    %c17_i32 = arith.constant 17 : i32
    %29 = tpu.dynamic_rotate %23 by %c17_i32 dim 1 : vector<4x512xf32>, i32 -> vector<4x512xf32>
    %30 = vector.extract_strided_slice %0 {offsets = [0, 0], sizes = [1, 512], strides = [1, 1]} : vector<9x512xf32> to vector<1x512xf32>
    %31 = vector.broadcast %30 : vector<1x512xf32> to vector<4x512xf32>
    %32 = arith.mulf %29, %31 : vector<4x512xf32>
    %33 = arith.truncf %32 : vector<4x512xf32> to vector<4x512xbf16>
    %c0_29 = arith.constant 0 : index
    %c0_30 = arith.constant 0 : index
    %34 = vector.load %arg13[%c0_29, %c0_30] : memref<72x512xbf16, #tpu.memory_space<vmem>>, vector<4x512xbf16>
    tpu.vector_store %arg13[%c0_29, %c0_30], %33 {strides = array<i32>} : memref<72x512xbf16, #tpu.memory_space<vmem>>, vector<4x512xbf16>,
    %c16_i32 = arith.constant 16 : i32
    %35 = tpu.dynamic_rotate %23 by %c16_i32 dim 1 : vector<4x512xf32>, i32 -> vector<4x512xf32>
    %36 = vector.extract_strided_slice %0 {offsets = [1, 0], sizes = [1, 512], strides = [1, 1]} : vector<9x512xf32> to vector<1x512xf32>
    %37 = vector.broadcast %36 : vector<1x512xf32> to vector<4x512xf32>
    %38 = arith.mulf %35, %37 : vector<4x512xf32>
    %39 = arith.truncf %38 : vector<4x512xf32> to vector<4x512xbf16>
    %c8 = arith.constant 8 : index
    %c0_31 = arith.constant 0 : index
    %40 = vector.load %arg13[%c8, %c0_31] : memref<72x512xbf16, #tpu.memory_space<vmem>>, vector<4x512xbf16>
    tpu.vector_store %arg13[%c8, %c0_31], %39 {strides = array<i32>} : memref<72x512xbf16, #tpu.memory_space<vmem>>, vector<4x512xbf16>,
    %c15_i32 = arith.constant 15 : i32
    %41 = tpu.dynamic_rotate %23 by %c15_i32 dim 1 : vector<4x512xf32>, i32 -> vector<4x512xf32>
    %42 = vector.extract_strided_slice %0 {offsets = [2, 0], sizes = [1, 512], strides = [1, 1]} : vector<9x512xf32> to vector<1x512xf32>
    %43 = vector.broadcast %42 : vector<1x512xf32> to vector<4x512xf32>
    %44 = arith.mulf %41, %43 : vector<4x512xf32>
    %45 = arith.truncf %44 : vector<4x512xf32> to vector<4x512xbf16>
    %c16 = arith.constant 16 : index
    %c0_32 = arith.constant 0 : index
    %46 = vector.load %arg13[%c16, %c0_32] : memref<72x512xbf16, #tpu.memory_space<vmem>>, vector<4x512xbf16>
    tpu.vector_store %arg13[%c16, %c0_32], %45 {strides = array<i32>} : memref<72x512xbf16, #tpu.memory_space<vmem>>, vector<4x512xbf16>,
    %c1_i32 = arith.constant 1 : i32
    %47 = tpu.dynamic_rotate %23 by %c1_i32 dim 1 : vector<4x512xf32>, i32 -> vector<4x512xf32>
    %48 = vector.extract_strided_slice %0 {offsets = [3, 0], sizes = [1, 512], strides = [1, 1]} : vector<9x512xf32> to vector<1x512xf32>
    %49 = vector.broadcast %48 : vector<1x512xf32> to vector<4x512xf32>
    %50 = arith.mulf %47, %49 : vector<4x512xf32>
    %51 = arith.truncf %50 : vector<4x512xf32> to vector<4x512xbf16>
    %c24 = arith.constant 24 : index
    %c0_33 = arith.constant 0 : index
    %52 = vector.load %arg13[%c24, %c0_33] : memref<72x512xbf16, #tpu.memory_space<vmem>>, vector<4x512xbf16>
    tpu.vector_store %arg13[%c24, %c0_33], %51 {strides = array<i32>} : memref<72x512xbf16, #tpu.memory_space<vmem>>, vector<4x512xbf16>,
    %53 = arith.truncf %23 : vector<4x512xf32> to vector<4x512xbf16>
    %c32 = arith.constant 32 : index
    %c0_34 = arith.constant 0 : index
    %54 = vector.load %arg13[%c32, %c0_34] : memref<72x512xbf16, #tpu.memory_space<vmem>>, vector<4x512xbf16>
    tpu.vector_store %arg13[%c32, %c0_34], %53 {strides = array<i32>} : memref<72x512xbf16, #tpu.memory_space<vmem>>, vector<4x512xbf16>,
    %c511_i32 = arith.constant 511 : i32
    %55 = tpu.dynamic_rotate %23 by %c511_i32 dim 1 : vector<4x512xf32>, i32 -> vector<4x512xf32>
    %56 = vector.extract_strided_slice %0 {offsets = [5, 0], sizes = [1, 512], strides = [1, 1]} : vector<9x512xf32> to vector<1x512xf32>
    %57 = vector.broadcast %56 : vector<1x512xf32> to vector<4x512xf32>
    %58 = arith.mulf %55, %57 : vector<4x512xf32>
    %59 = arith.truncf %58 : vector<4x512xf32> to vector<4x512xbf16>
    %c40 = arith.constant 40 : index
    %c0_35 = arith.constant 0 : index
    %60 = vector.load %arg13[%c40, %c0_35] : memref<72x512xbf16, #tpu.memory_space<vmem>>, vector<4x512xbf16>
    tpu.vector_store %arg13[%c40, %c0_35], %59 {strides = array<i32>} : memref<72x512xbf16, #tpu.memory_space<vmem>>, vector<4x512xbf16>,
    %c497_i32 = arith.constant 497 : i32
    %61 = tpu.dynamic_rotate %23 by %c497_i32 dim 1 : vector<4x512xf32>, i32 -> vector<4x512xf32>
    %62 = vector.extract_strided_slice %0 {offsets = [6, 0], sizes = [1, 512], strides = [1, 1]} : vector<9x512xf32> to vector<1x512xf32>
    %63 = vector.broadcast %62 : vector<1x512xf32> to vector<4x512xf32>
    %64 = arith.mulf %61, %63 : vector<4x512xf32>
    %65 = arith.truncf %64 : vector<4x512xf32> to vector<4x512xbf16>
    %c48 = arith.constant 48 : index
    %c0_36 = arith.constant 0 : index
    %66 = vector.load %arg13[%c48, %c0_36] : memref<72x512xbf16, #tpu.memory_space<vmem>>, vector<4x512xbf16>
    tpu.vector_store %arg13[%c48, %c0_36], %65 {strides = array<i32>} : memref<72x512xbf16, #tpu.memory_space<vmem>>, vector<4x512xbf16>,
    %c496_i32 = arith.constant 496 : i32
    %67 = tpu.dynamic_rotate %23 by %c496_i32 dim 1 : vector<4x512xf32>, i32 -> vector<4x512xf32>
    %68 = vector.extract_strided_slice %0 {offsets = [7, 0], sizes = [1, 512], strides = [1, 1]} : vector<9x512xf32> to vector<1x512xf32>
    %69 = vector.broadcast %68 : vector<1x512xf32> to vector<4x512xf32>
    %70 = arith.mulf %67, %69 : vector<4x512xf32>
    %71 = arith.truncf %70 : vector<4x512xf32> to vector<4x512xbf16>
    %c56 = arith.constant 56 : index
    %c0_37 = arith.constant 0 : index
    %72 = vector.load %arg13[%c56, %c0_37] : memref<72x512xbf16, #tpu.memory_space<vmem>>, vector<4x512xbf16>
    tpu.vector_store %arg13[%c56, %c0_37], %71 {strides = array<i32>} : memref<72x512xbf16, #tpu.memory_space<vmem>>, vector<4x512xbf16>,
    %c495_i32 = arith.constant 495 : i32
    %73 = tpu.dynamic_rotate %23 by %c495_i32 dim 1 : vector<4x512xf32>, i32 -> vector<4x512xf32>
    %74 = vector.extract_strided_slice %0 {offsets = [8, 0], sizes = [1, 512], strides = [1, 1]} : vector<9x512xf32> to vector<1x512xf32>
    %75 = vector.broadcast %74 : vector<1x512xf32> to vector<4x512xf32>
    %76 = arith.mulf %73, %75 : vector<4x512xf32>
    %77 = arith.truncf %76 : vector<4x512xf32> to vector<4x512xbf16>
    %c64 = arith.constant 64 : index
    %c0_38 = arith.constant 0 : index
    %78 = vector.load %arg13[%c64, %c0_38] : memref<72x512xbf16, #tpu.memory_space<vmem>>, vector<4x512xbf16>
    tpu.vector_store %arg13[%c64, %c0_38], %77 {strides = array<i32>} : memref<72x512xbf16, #tpu.memory_space<vmem>>, vector<4x512xbf16>,
    %c17_i32_39 = arith.constant 17 : i32
    %79 = tpu.dynamic_rotate %28 by %c17_i32_39 dim 1 : vector<4x512xf32>, i32 -> vector<4x512xf32>
    %80 = vector.extract_strided_slice %0 {offsets = [0, 0], sizes = [1, 512], strides = [1, 1]} : vector<9x512xf32> to vector<1x512xf32>
    %81 = vector.broadcast %80 : vector<1x512xf32> to vector<4x512xf32>
    %82 = arith.mulf %79, %81 : vector<4x512xf32>
    %83 = arith.truncf %82 : vector<4x512xf32> to vector<4x512xbf16>
    %c4_40 = arith.constant 4 : index
    %c0_41 = arith.constant 0 : index
    %84 = vector.load %arg13[%c4_40, %c0_41] : memref<72x512xbf16, #tpu.memory_space<vmem>>, vector<4x512xbf16>
    tpu.vector_store %arg13[%c4_40, %c0_41], %83 {strides = array<i32>} : memref<72x512xbf16, #tpu.memory_space<vmem>>, vector<4x512xbf16>,
    %c16_i32_42 = arith.constant 16 : i32
    %85 = tpu.dynamic_rotate %28 by %c16_i32_42 dim 1 : vector<4x512xf32>, i32 -> vector<4x512xf32>
    %86 = vector.extract_strided_slice %0 {offsets = [1, 0], sizes = [1, 512], strides = [1, 1]} : vector<9x512xf32> to vector<1x512xf32>
    %87 = vector.broadcast %86 : vector<1x512xf32> to vector<4x512xf32>
    %88 = arith.mulf %85, %87 : vector<4x512xf32>
    %89 = arith.truncf %88 : vector<4x512xf32> to vector<4x512xbf16>
    %c12_43 = arith.constant 12 : index
    %c0_44 = arith.constant 0 : index
    %90 = vector.load %arg13[%c12_43, %c0_44] : memref<72x512xbf16, #tpu.memory_space<vmem>>, vector<4x512xbf16>
    tpu.vector_store %arg13[%c12_43, %c0_44], %89 {strides = array<i32>} : memref<72x512xbf16, #tpu.memory_space<vmem>>, vector<4x512xbf16>,
    %c15_i32_45 = arith.constant 15 : i32
    %91 = tpu.dynamic_rotate %28 by %c15_i32_45 dim 1 : vector<4x512xf32>, i32 -> vector<4x512xf32>
    %92 = vector.extract_strided_slice %0 {offsets = [2, 0], sizes = [1, 512], strides = [1, 1]} : vector<9x512xf32> to vector<1x512xf32>
    %93 = vector.broadcast %92 : vector<1x512xf32> to vector<4x512xf32>
    %94 = arith.mulf %91, %93 : vector<4x512xf32>
    %95 = arith.truncf %94 : vector<4x512xf32> to vector<4x512xbf16>
    %c20_46 = arith.constant 20 : index
    %c0_47 = arith.constant 0 : index
    %96 = vector.load %arg13[%c20_46, %c0_47] : memref<72x512xbf16, #tpu.memory_space<vmem>>, vector<4x512xbf16>
    tpu.vector_store %arg13[%c20_46, %c0_47], %95 {strides = array<i32>} : memref<72x512xbf16, #tpu.memory_space<vmem>>, vector<4x512xbf16>,
    %c1_i32_48 = arith.constant 1 : i32
    %97 = tpu.dynamic_rotate %28 by %c1_i32_48 dim 1 : vector<4x512xf32>, i32 -> vector<4x512xf32>
    %98 = vector.extract_strided_slice %0 {offsets = [3, 0], sizes = [1, 512], strides = [1, 1]} : vector<9x512xf32> to vector<1x512xf32>
    %99 = vector.broadcast %98 : vector<1x512xf32> to vector<4x512xf32>
    %100 = arith.mulf %97, %99 : vector<4x512xf32>
    %101 = arith.truncf %100 : vector<4x512xf32> to vector<4x512xbf16>
    %c28_49 = arith.constant 28 : index
    %c0_50 = arith.constant 0 : index
    %102 = vector.load %arg13[%c28_49, %c0_50] : memref<72x512xbf16, #tpu.memory_space<vmem>>, vector<4x512xbf16>
    tpu.vector_store %arg13[%c28_49, %c0_50], %101 {strides = array<i32>} : memref<72x512xbf16, #tpu.memory_space<vmem>>, vector<4x512xbf16>,
    %103 = arith.truncf %28 : vector<4x512xf32> to vector<4x512xbf16>
    %c36_51 = arith.constant 36 : index
    %c0_52 = arith.constant 0 : index
    %104 = vector.load %arg13[%c36_51, %c0_52] : memref<72x512xbf16, #tpu.memory_space<vmem>>, vector<4x512xbf16>
    tpu.vector_store %arg13[%c36_51, %c0_52], %103 {strides = array<i32>} : memref<72x512xbf16, #tpu.memory_space<vmem>>, vector<4x512xbf16>,
    %c511_i32_53 = arith.constant 511 : i32
    %105 = tpu.dynamic_rotate %28 by %c511_i32_53 dim 1 : vector<4x512xf32>, i32 -> vector<4x512xf32>
    %106 = vector.extract_strided_slice %0 {offsets = [5, 0], sizes = [1, 512], strides = [1, 1]} : vector<9x512xf32> to vector<1x512xf32>
    %107 = vector.broadcast %106 : vector<1x512xf32> to vector<4x512xf32>
    %108 = arith.mulf %105, %107 : vector<4x512xf32>
    %109 = arith.truncf %108 : vector<4x512xf32> to vector<4x512xbf16>
    %c44_54 = arith.constant 44 : index
    %c0_55 = arith.constant 0 : index
    %110 = vector.load %arg13[%c44_54, %c0_55] : memref<72x512xbf16, #tpu.memory_space<vmem>>, vector<4x512xbf16>
    tpu.vector_store %arg13[%c44_54, %c0_55], %109 {strides = array<i32>} : memref<72x512xbf16, #tpu.memory_space<vmem>>, vector<4x512xbf16>,
    %c497_i32_56 = arith.constant 497 : i32
    %111 = tpu.dynamic_rotate %28 by %c497_i32_56 dim 1 : vector<4x512xf32>, i32 -> vector<4x512xf32>
    %112 = vector.extract_strided_slice %0 {offsets = [6, 0], sizes = [1, 512], strides = [1, 1]} : vector<9x512xf32> to vector<1x512xf32>
    %113 = vector.broadcast %112 : vector<1x512xf32> to vector<4x512xf32>
    %114 = arith.mulf %111, %113 : vector<4x512xf32>
    %115 = arith.truncf %114 : vector<4x512xf32> to vector<4x512xbf16>
    %c52_57 = arith.constant 52 : index
    %c0_58 = arith.constant 0 : index
    %116 = vector.load %arg13[%c52_57, %c0_58] : memref<72x512xbf16, #tpu.memory_space<vmem>>, vector<4x512xbf16>
    tpu.vector_store %arg13[%c52_57, %c0_58], %115 {strides = array<i32>} : memref<72x512xbf16, #tpu.memory_space<vmem>>, vector<4x512xbf16>,
    %c496_i32_59 = arith.constant 496 : i32
    %117 = tpu.dynamic_rotate %28 by %c496_i32_59 dim 1 : vector<4x512xf32>, i32 -> vector<4x512xf32>
    %118 = vector.extract_strided_slice %0 {offsets = [7, 0], sizes = [1, 512], strides = [1, 1]} : vector<9x512xf32> to vector<1x512xf32>
    %119 = vector.broadcast %118 : vector<1x512xf32> to vector<4x512xf32>
    %120 = arith.mulf %117, %119 : vector<4x512xf32>
    %121 = arith.truncf %120 : vector<4x512xf32> to vector<4x512xbf16>
    %c60_60 = arith.constant 60 : index
    %c0_61 = arith.constant 0 : index
    %122 = vector.load %arg13[%c60_60, %c0_61] : memref<72x512xbf16, #tpu.memory_space<vmem>>, vector<4x512xbf16>
    tpu.vector_store %arg13[%c60_60, %c0_61], %121 {strides = array<i32>} : memref<72x512xbf16, #tpu.memory_space<vmem>>, vector<4x512xbf16>,
    %c495_i32_62 = arith.constant 495 : i32
    %123 = tpu.dynamic_rotate %28 by %c495_i32_62 dim 1 : vector<4x512xf32>, i32 -> vector<4x512xf32>
    %124 = vector.extract_strided_slice %0 {offsets = [8, 0], sizes = [1, 512], strides = [1, 1]} : vector<9x512xf32> to vector<1x512xf32>
    %125 = vector.broadcast %124 : vector<1x512xf32> to vector<4x512xf32>
    %126 = arith.mulf %123, %125 : vector<4x512xf32>
    %127 = arith.truncf %126 : vector<4x512xf32> to vector<4x512xbf16>
    %c68_63 = arith.constant 68 : index
    %c0_64 = arith.constant 0 : index
    %128 = vector.load %arg13[%c68_63, %c0_64] : memref<72x512xbf16, #tpu.memory_space<vmem>>, vector<4x512xbf16>
    tpu.vector_store %arg13[%c68_63, %c0_64], %127 {strides = array<i32>} : memref<72x512xbf16, #tpu.memory_space<vmem>>, vector<4x512xbf16>,
    %c0_65 = arith.constant 0 : index
    %c0_66 = arith.constant 0 : index
    %129 = vector.load %arg4[%c0_65, %c0_66] : memref<8x72xbf16, #tpu.memory_space<vmem>>, vector<8x72xbf16>
    %c0_67 = arith.constant 0 : index
    %c0_68 = arith.constant 0 : index
    %130 = vector.load %arg13[%c0_67, %c0_68] : memref<72x512xbf16, #tpu.memory_space<vmem>>, vector<72x512xbf16>
    %cst_69 = arith.constant dense<0.000000e+00> : vector<8x512xf32>
    %131 = tpu.matmul %129, %130, %cst_69 {dimension_numbers = #tpu.dot_dimension_numbers<[1], [0], [0], [1], [0, 0, 1, 1], [], []>} : vector<8x72xbf16>, vector<72x512xbf16>, vector<8x512xf32> -> vector<8x512xf32>
    %c0_70 = arith.constant 0 : index
    %c0_71 = arith.constant 0 : index
    %132 = vector.load %arg5[%c0_70, %c0_71] : memref<8x1xf32, #tpu.memory_space<vmem>>, vector<8x1xf32>
    %133 = vector.broadcast %132 : vector<8x1xf32> to vector<8x512xf32>
    %134 = arith.addf %131, %133 : vector<8x512xf32>
    %cst_72 = arith.constant 0.000000e+00 : f32
    %135 = vector.broadcast %cst_72 : f32 to vector<8x512xf32>
    %136 = arith.maximumf %134, %135 : vector<8x512xf32>
    %137 = vector.extract_strided_slice %136 {offsets = [0, 0], sizes = [4, 512], strides = [1, 1]} : vector<8x512xf32> to vector<4x512xf32>
    %138 = vector.extract_strided_slice %136 {offsets = [4, 0], sizes = [4, 512], strides = [1, 1]} : vector<8x512xf32> to vector<4x512xf32>
    %c17_i32_73 = arith.constant 17 : i32
    %139 = tpu.dynamic_rotate %137 by %c17_i32_73 dim 1 : vector<4x512xf32>, i32 -> vector<4x512xf32>
    %140 = vector.extract_strided_slice %0 {offsets = [0, 0], sizes = [1, 512], strides = [1, 1]} : vector<9x512xf32> to vector<1x512xf32>
    %141 = vector.broadcast %140 : vector<1x512xf32> to vector<4x512xf32>
    %142 = arith.mulf %139, %141 : vector<4x512xf32>
    %143 = arith.truncf %142 : vector<4x512xf32> to vector<4x512xbf16>
    %c0_74 = arith.constant 0 : index
    %c0_75 = arith.constant 0 : index
    %144 = vector.load %arg14[%c0_74, %c0_75] : memref<72x512xbf16, #tpu.memory_space<vmem>>, vector<4x512xbf16>
    tpu.vector_store %arg14[%c0_74, %c0_75], %143 {strides = array<i32>} : memref<72x512xbf16, #tpu.memory_space<vmem>>, vector<4x512xbf16>,
    %c16_i32_76 = arith.constant 16 : i32
    %145 = tpu.dynamic_rotate %137 by %c16_i32_76 dim 1 : vector<4x512xf32>, i32 -> vector<4x512xf32>
    %146 = vector.extract_strided_slice %0 {offsets = [1, 0], sizes = [1, 512], strides = [1, 1]} : vector<9x512xf32> to vector<1x512xf32>
    %147 = vector.broadcast %146 : vector<1x512xf32> to vector<4x512xf32>
    %148 = arith.mulf %145, %147 : vector<4x512xf32>
    %149 = arith.truncf %148 : vector<4x512xf32> to vector<4x512xbf16>
    %c8_77 = arith.constant 8 : index
    %c0_78 = arith.constant 0 : index
    %150 = vector.load %arg14[%c8_77, %c0_78] : memref<72x512xbf16, #tpu.memory_space<vmem>>, vector<4x512xbf16>
    tpu.vector_store %arg14[%c8_77, %c0_78], %149 {strides = array<i32>} : memref<72x512xbf16, #tpu.memory_space<vmem>>, vector<4x512xbf16>,
    %c15_i32_79 = arith.constant 15 : i32
    %151 = tpu.dynamic_rotate %137 by %c15_i32_79 dim 1 : vector<4x512xf32>, i32 -> vector<4x512xf32>
    %152 = vector.extract_strided_slice %0 {offsets = [2, 0], sizes = [1, 512], strides = [1, 1]} : vector<9x512xf32> to vector<1x512xf32>
    %153 = vector.broadcast %152 : vector<1x512xf32> to vector<4x512xf32>
    %154 = arith.mulf %151, %153 : vector<4x512xf32>
    %155 = arith.truncf %154 : vector<4x512xf32> to vector<4x512xbf16>
    %c16_80 = arith.constant 16 : index
    %c0_81 = arith.constant 0 : index
    %156 = vector.load %arg14[%c16_80, %c0_81] : memref<72x512xbf16, #tpu.memory_space<vmem>>, vector<4x512xbf16>
    tpu.vector_store %arg14[%c16_80, %c0_81], %155 {strides = array<i32>} : memref<72x512xbf16, #tpu.memory_space<vmem>>, vector<4x512xbf16>,
    %c1_i32_82 = arith.constant 1 : i32
    %157 = tpu.dynamic_rotate %137 by %c1_i32_82 dim 1 : vector<4x512xf32>, i32 -> vector<4x512xf32>
    %158 = vector.extract_strided_slice %0 {offsets = [3, 0], sizes = [1, 512], strides = [1, 1]} : vector<9x512xf32> to vector<1x512xf32>
    %159 = vector.broadcast %158 : vector<1x512xf32> to vector<4x512xf32>
    %160 = arith.mulf %157, %159 : vector<4x512xf32>
    %161 = arith.truncf %160 : vector<4x512xf32> to vector<4x512xbf16>
    %c24_83 = arith.constant 24 : index
    %c0_84 = arith.constant 0 : index
    %162 = vector.load %arg14[%c24_83, %c0_84] : memref<72x512xbf16, #tpu.memory_space<vmem>>, vector<4x512xbf16>
    tpu.vector_store %arg14[%c24_83, %c0_84], %161 {strides = array<i32>} : memref<72x512xbf16, #tpu.memory_space<vmem>>, vector<4x512xbf16>,
    %163 = arith.truncf %137 : vector<4x512xf32> to vector<4x512xbf16>
    %c32_85 = arith.constant 32 : index
    %c0_86 = arith.constant 0 : index
    %164 = vector.load %arg14[%c32_85, %c0_86] : memref<72x512xbf16, #tpu.memory_space<vmem>>, vector<4x512xbf16>
    tpu.vector_store %arg14[%c32_85, %c0_86], %163 {strides = array<i32>} : memref<72x512xbf16, #tpu.memory_space<vmem>>, vector<4x512xbf16>,
    %c511_i32_87 = arith.constant 511 : i32
    %165 = tpu.dynamic_rotate %137 by %c511_i32_87 dim 1 : vector<4x512xf32>, i32 -> vector<4x512xf32>
    %166 = vector.extract_strided_slice %0 {offsets = [5, 0], sizes = [1, 512], strides = [1, 1]} : vector<9x512xf32> to vector<1x512xf32>
    %167 = vector.broadcast %166 : vector<1x512xf32> to vector<4x512xf32>
    %168 = arith.mulf %165, %167 : vector<4x512xf32>
    %169 = arith.truncf %168 : vector<4x512xf32> to vector<4x512xbf16>
    %c40_88 = arith.constant 40 : index
    %c0_89 = arith.constant 0 : index
    %170 = vector.load %arg14[%c40_88, %c0_89] : memref<72x512xbf16, #tpu.memory_space<vmem>>, vector<4x512xbf16>
    tpu.vector_store %arg14[%c40_88, %c0_89], %169 {strides = array<i32>} : memref<72x512xbf16, #tpu.memory_space<vmem>>, vector<4x512xbf16>,
    %c497_i32_90 = arith.constant 497 : i32
    %171 = tpu.dynamic_rotate %137 by %c497_i32_90 dim 1 : vector<4x512xf32>, i32 -> vector<4x512xf32>
    %172 = vector.extract_strided_slice %0 {offsets = [6, 0], sizes = [1, 512], strides = [1, 1]} : vector<9x512xf32> to vector<1x512xf32>
    %173 = vector.broadcast %172 : vector<1x512xf32> to vector<4x512xf32>
    %174 = arith.mulf %171, %173 : vector<4x512xf32>
    %175 = arith.truncf %174 : vector<4x512xf32> to vector<4x512xbf16>
    %c48_91 = arith.constant 48 : index
    %c0_92 = arith.constant 0 : index
    %176 = vector.load %arg14[%c48_91, %c0_92] : memref<72x512xbf16, #tpu.memory_space<vmem>>, vector<4x512xbf16>
    tpu.vector_store %arg14[%c48_91, %c0_92], %175 {strides = array<i32>} : memref<72x512xbf16, #tpu.memory_space<vmem>>, vector<4x512xbf16>,
    %c496_i32_93 = arith.constant 496 : i32
    %177 = tpu.dynamic_rotate %137 by %c496_i32_93 dim 1 : vector<4x512xf32>, i32 -> vector<4x512xf32>
    %178 = vector.extract_strided_slice %0 {offsets = [7, 0], sizes = [1, 512], strides = [1, 1]} : vector<9x512xf32> to vector<1x512xf32>
    %179 = vector.broadcast %178 : vector<1x512xf32> to vector<4x512xf32>
    %180 = arith.mulf %177, %179 : vector<4x512xf32>
    %181 = arith.truncf %180 : vector<4x512xf32> to vector<4x512xbf16>
    %c56_94 = arith.constant 56 : index
    %c0_95 = arith.constant 0 : index
    %182 = vector.load %arg14[%c56_94, %c0_95] : memref<72x512xbf16, #tpu.memory_space<vmem>>, vector<4x512xbf16>
    tpu.vector_store %arg14[%c56_94, %c0_95], %181 {strides = array<i32>} : memref<72x512xbf16, #tpu.memory_space<vmem>>, vector<4x512xbf16>,
    %c495_i32_96 = arith.constant 495 : i32
    %183 = tpu.dynamic_rotate %137 by %c495_i32_96 dim 1 : vector<4x512xf32>, i32 -> vector<4x512xf32>
    %184 = vector.extract_strided_slice %0 {offsets = [8, 0], sizes = [1, 512], strides = [1, 1]} : vector<9x512xf32> to vector<1x512xf32>
    %185 = vector.broadcast %184 : vector<1x512xf32> to vector<4x512xf32>
    %186 = arith.mulf %183, %185 : vector<4x512xf32>
    %187 = arith.truncf %186 : vector<4x512xf32> to vector<4x512xbf16>
    %c64_97 = arith.constant 64 : index
    %c0_98 = arith.constant 0 : index
    %188 = vector.load %arg14[%c64_97, %c0_98] : memref<72x512xbf16, #tpu.memory_space<vmem>>, vector<4x512xbf16>
    tpu.vector_store %arg14[%c64_97, %c0_98], %187 {strides = array<i32>} : memref<72x512xbf16, #tpu.memory_space<vmem>>, vector<4x512xbf16>,
    %c0_99 = arith.constant 0 : index
    %c0_100 = arith.constant 0 : index
    %189 = vector.load %arg6[%c0_99, %c0_100] : memref<72x72xbf16, #tpu.memory_space<vmem>>, vector<72x72xbf16>
    %c0_101 = arith.constant 0 : index
    %c0_102 = arith.constant 0 : index
    %190 = vector.load %arg14[%c0_101, %c0_102] : memref<72x512xbf16, #tpu.memory_space<vmem>>, vector<72x512xbf16>
    %cst_103 = arith.constant dense<0.000000e+00> : vector<72x512xf32>
    %191 = tpu.matmul %189, %190, %cst_103 {dimension_numbers = #tpu.dot_dimension_numbers<[1], [0], [0], [1], [0, 0, 1, 1], [], []>} : vector<72x72xbf16>, vector<72x512xbf16>, vector<72x512xf32> -> vector<72x512xf32>
    %c0_104 = arith.constant 0 : index
    %c0_105 = arith.constant 0 : index
    %192 = vector.load %arg11[%c0_104, %c0_105] : memref<4x6xf32, #tpu.memory_space<vmem>>, vector<4x6xf32>
    %c0_106 = arith.constant 0 : index
    %c0_107 = arith.constant 0 : index
    %193 = vector.load %arg13[%c0_106, %c0_107] : memref<72x512xbf16, #tpu.memory_space<vmem>>, vector<4x512xbf16>
    %194 = arith.extf %193 : vector<4x512xbf16> to vector<4x512xf32>
    %195 = vector.extract_strided_slice %191 {offsets = [0, 0], sizes = [4, 512], strides = [1, 1]} : vector<72x512xf32> to vector<4x512xf32>
    %c0_108 = arith.constant 0 : index
    %c0_109 = arith.constant 0 : index
    %196 = vector.load %arg7[%c0_108, %c0_109] : memref<72x1xf32, #tpu.memory_space<vmem>>, vector<4x1xf32>
    %197 = vector.broadcast %196 : vector<4x1xf32> to vector<4x512xf32>
    %198 = arith.addf %195, %197 : vector<4x512xf32>
    %199 = arith.mulf %194, %198 : vector<4x512xf32>
    %c8_110 = arith.constant 8 : index
    %c0_111 = arith.constant 0 : index
    %200 = vector.load %arg13[%c8_110, %c0_111] : memref<72x512xbf16, #tpu.memory_space<vmem>>, vector<4x512xbf16>
    %201 = arith.extf %200 : vector<4x512xbf16> to vector<4x512xf32>
    %202 = vector.extract_strided_slice %191 {offsets = [8, 0], sizes = [4, 512], strides = [1, 1]} : vector<72x512xf32> to vector<4x512xf32>
    %c8_112 = arith.constant 8 : index
    %c0_113 = arith.constant 0 : index
    %203 = vector.load %arg7[%c8_112, %c0_113] : memref<72x1xf32, #tpu.memory_space<vmem>>, vector<4x1xf32>
    %204 = vector.broadcast %203 : vector<4x1xf32> to vector<4x512xf32>
    %205 = arith.addf %202, %204 : vector<4x512xf32>
    %206 = arith.mulf %201, %205 : vector<4x512xf32>
    %207 = arith.addf %199, %206 : vector<4x512xf32>
    %c16_114 = arith.constant 16 : index
    %c0_115 = arith.constant 0 : index
    %208 = vector.load %arg13[%c16_114, %c0_115] : memref<72x512xbf16, #tpu.memory_space<vmem>>, vector<4x512xbf16>
    %209 = arith.extf %208 : vector<4x512xbf16> to vector<4x512xf32>
    %210 = vector.extract_strided_slice %191 {offsets = [16, 0], sizes = [4, 512], strides = [1, 1]} : vector<72x512xf32> to vector<4x512xf32>
    %c16_116 = arith.constant 16 : index
    %c0_117 = arith.constant 0 : index
    %211 = vector.load %arg7[%c16_116, %c0_117] : memref<72x1xf32, #tpu.memory_space<vmem>>, vector<4x1xf32>
    %212 = vector.broadcast %211 : vector<4x1xf32> to vector<4x512xf32>
    %213 = arith.addf %210, %212 : vector<4x512xf32>
    %214 = arith.mulf %209, %213 : vector<4x512xf32>
    %215 = arith.addf %207, %214 : vector<4x512xf32>
    %c24_118 = arith.constant 24 : index
    %c0_119 = arith.constant 0 : index
    %216 = vector.load %arg13[%c24_118, %c0_119] : memref<72x512xbf16, #tpu.memory_space<vmem>>, vector<4x512xbf16>
    %217 = arith.extf %216 : vector<4x512xbf16> to vector<4x512xf32>
    %218 = vector.extract_strided_slice %191 {offsets = [24, 0], sizes = [4, 512], strides = [1, 1]} : vector<72x512xf32> to vector<4x512xf32>
    %c24_120 = arith.constant 24 : index
    %c0_121 = arith.constant 0 : index
    %219 = vector.load %arg7[%c24_120, %c0_121] : memref<72x1xf32, #tpu.memory_space<vmem>>, vector<4x1xf32>
    %220 = vector.broadcast %219 : vector<4x1xf32> to vector<4x512xf32>
    %221 = arith.addf %218, %220 : vector<4x512xf32>
    %222 = arith.mulf %217, %221 : vector<4x512xf32>
    %223 = arith.addf %215, %222 : vector<4x512xf32>
    %c32_122 = arith.constant 32 : index
    %c0_123 = arith.constant 0 : index
    %224 = vector.load %arg13[%c32_122, %c0_123] : memref<72x512xbf16, #tpu.memory_space<vmem>>, vector<4x512xbf16>
    %225 = arith.extf %224 : vector<4x512xbf16> to vector<4x512xf32>
    %226 = vector.extract_strided_slice %191 {offsets = [32, 0], sizes = [4, 512], strides = [1, 1]} : vector<72x512xf32> to vector<4x512xf32>
    %c32_124 = arith.constant 32 : index
    %c0_125 = arith.constant 0 : index
    %227 = vector.load %arg7[%c32_124, %c0_125] : memref<72x1xf32, #tpu.memory_space<vmem>>, vector<4x1xf32>
    %228 = vector.broadcast %227 : vector<4x1xf32> to vector<4x512xf32>
    %229 = arith.addf %226, %228 : vector<4x512xf32>
    %230 = arith.mulf %225, %229 : vector<4x512xf32>
    %231 = arith.addf %223, %230 : vector<4x512xf32>
    %c40_126 = arith.constant 40 : index
    %c0_127 = arith.constant 0 : index
    %232 = vector.load %arg13[%c40_126, %c0_127] : memref<72x512xbf16, #tpu.memory_space<vmem>>, vector<4x512xbf16>
    %233 = arith.extf %232 : vector<4x512xbf16> to vector<4x512xf32>
    %234 = vector.extract_strided_slice %191 {offsets = [40, 0], sizes = [4, 512], strides = [1, 1]} : vector<72x512xf32> to vector<4x512xf32>
    %c40_128 = arith.constant 40 : index
    %c0_129 = arith.constant 0 : index
    %235 = vector.load %arg7[%c40_128, %c0_129] : memref<72x1xf32, #tpu.memory_space<vmem>>, vector<4x1xf32>
    %236 = vector.broadcast %235 : vector<4x1xf32> to vector<4x512xf32>
    %237 = arith.addf %234, %236 : vector<4x512xf32>
    %238 = arith.mulf %233, %237 : vector<4x512xf32>
    %239 = arith.addf %231, %238 : vector<4x512xf32>
    %c48_130 = arith.constant 48 : index
    %c0_131 = arith.constant 0 : index
    %240 = vector.load %arg13[%c48_130, %c0_131] : memref<72x512xbf16, #tpu.memory_space<vmem>>, vector<4x512xbf16>
    %241 = arith.extf %240 : vector<4x512xbf16> to vector<4x512xf32>
    %242 = vector.extract_strided_slice %191 {offsets = [48, 0], sizes = [4, 512], strides = [1, 1]} : vector<72x512xf32> to vector<4x512xf32>
    %c48_132 = arith.constant 48 : index
    %c0_133 = arith.constant 0 : index
    %243 = vector.load %arg7[%c48_132, %c0_133] : memref<72x1xf32, #tpu.memory_space<vmem>>, vector<4x1xf32>
    %244 = vector.broadcast %243 : vector<4x1xf32> to vector<4x512xf32>
    %245 = arith.addf %242, %244 : vector<4x512xf32>
    %246 = arith.mulf %241, %245 : vector<4x512xf32>
    %247 = arith.addf %239, %246 : vector<4x512xf32>
    %c56_134 = arith.constant 56 : index
    %c0_135 = arith.constant 0 : index
    %248 = vector.load %arg13[%c56_134, %c0_135] : memref<72x512xbf16, #tpu.memory_space<vmem>>, vector<4x512xbf16>
    %249 = arith.extf %248 : vector<4x512xbf16> to vector<4x512xf32>
    %250 = vector.extract_strided_slice %191 {offsets = [56, 0], sizes = [4, 512], strides = [1, 1]} : vector<72x512xf32> to vector<4x512xf32>
    %c56_136 = arith.constant 56 : index
    %c0_137 = arith.constant 0 : index
    %251 = vector.load %arg7[%c56_136, %c0_137] : memref<72x1xf32, #tpu.memory_space<vmem>>, vector<4x1xf32>
    %252 = vector.broadcast %251 : vector<4x1xf32> to vector<4x512xf32>
    %253 = arith.addf %250, %252 : vector<4x512xf32>
    %254 = arith.mulf %249, %253 : vector<4x512xf32>
    %255 = arith.addf %247, %254 : vector<4x512xf32>
    %c64_138 = arith.constant 64 : index
    %c0_139 = arith.constant 0 : index
    %256 = vector.load %arg13[%c64_138, %c0_139] : memref<72x512xbf16, #tpu.memory_space<vmem>>, vector<4x512xbf16>
    %257 = arith.extf %256 : vector<4x512xbf16> to vector<4x512xf32>
    %258 = vector.extract_strided_slice %191 {offsets = [64, 0], sizes = [4, 512], strides = [1, 1]} : vector<72x512xf32> to vector<4x512xf32>
    %c64_140 = arith.constant 64 : index
    %c0_141 = arith.constant 0 : index
    %259 = vector.load %arg7[%c64_140, %c0_141] : memref<72x1xf32, #tpu.memory_space<vmem>>, vector<4x1xf32>
    %260 = vector.broadcast %259 : vector<4x1xf32> to vector<4x512xf32>
    %261 = arith.addf %258, %260 : vector<4x512xf32>
    %262 = arith.mulf %257, %261 : vector<4x512xf32>
    %263 = arith.addf %255, %262 : vector<4x512xf32>
    %264 = vector.extract_strided_slice %192 {offsets = [0, 0], sizes = [4, 1], strides = [1, 1]} : vector<4x6xf32> to vector<4x1xf32>
    %265 = vector.broadcast %264 : vector<4x1xf32> to vector<4x512xf32>
    %266 = arith.mulf %263, %265 : vector<4x512xf32>
    %267 = vector.extract_strided_slice %192 {offsets = [0, 1], sizes = [4, 1], strides = [1, 1]} : vector<4x6xf32> to vector<4x1xf32>
    %268 = vector.broadcast %267 : vector<4x1xf32> to vector<4x512xf32>
    %269 = arith.addf %266, %268 : vector<4x512xf32>
    %cst_142 = arith.constant 0.000000e+00 : f32
    %270 = vector.broadcast %cst_142 : f32 to vector<4x512xf32>
    %271 = arith.maximumf %269, %270 : vector<4x512xf32>
    %c0_143 = arith.constant 0 : index
    %c0_144 = arith.constant 0 : index
    %272 = vector.load %arg8[%c0_143, %c0_144] : memref<16x4xf32, #tpu.memory_space<vmem>>, vector<16x4xf32>
    %c0_145 = arith.constant 0 : index
    %c0_146 = arith.constant 0 : index
    %273 = vector.load %arg9[%c0_145, %c0_146] : memref<4x4xf32, #tpu.memory_space<vmem>>, vector<4x4xf32>
    %274 = vector.extract_strided_slice %138 {offsets = [0, 0], sizes = [4, 256], strides = [1, 1]} : vector<4x512xf32> to vector<4x256xf32>
    %cst_147 = arith.constant dense<0.000000e+00> : vector<4xf32>
    %275 = vector.multi_reduction <add>, %274, %cst_147 [1] : vector<4x256xf32> to vector<4xf32>
    %276 = vector.shape_cast %275 : vector<4xf32> to vector<4x1xf32>
    %cst_148 = arith.constant 2.560000e+02 : f32
    %277 = vector.broadcast %cst_148 : f32 to vector<4x1xf32>
    %278 = arith.divf %276, %277 : vector<4x1xf32>
    %279 = vector.extract_strided_slice %278 {offsets = [0, 0], sizes = [1, 1], strides = [1, 1]} : vector<4x1xf32> to vector<1x1xf32>
    %280 = vector.extract_strided_slice %272 {offsets = [0, 0], sizes = [4, 4], strides = [1, 1]} : vector<16x4xf32> to vector<4x4xf32>
    %281 = vector.broadcast %279 : vector<1x1xf32> to vector<4x4xf32>
    %282 = arith.mulf %281, %280 : vector<4x4xf32>
    %283 = arith.addf %273, %282 : vector<4x4xf32>
    %284 = vector.extract_strided_slice %278 {offsets = [1, 0], sizes = [1, 1], strides = [1, 1]} : vector<4x1xf32> to vector<1x1xf32>
    %285 = vector.extract_strided_slice %272 {offsets = [4, 0], sizes = [4, 4], strides = [1, 1]} : vector<16x4xf32> to vector<4x4xf32>
    %286 = vector.broadcast %284 : vector<1x1xf32> to vector<4x4xf32>
    %287 = arith.mulf %286, %285 : vector<4x4xf32>
    %288 = arith.addf %283, %287 : vector<4x4xf32>
    %289 = vector.extract_strided_slice %278 {offsets = [2, 0], sizes = [1, 1], strides = [1, 1]} : vector<4x1xf32> to vector<1x1xf32>
    %290 = vector.extract_strided_slice %272 {offsets = [8, 0], sizes = [4, 4], strides = [1, 1]} : vector<16x4xf32> to vector<4x4xf32>
    %291 = vector.broadcast %289 : vector<1x1xf32> to vector<4x4xf32>
    %292 = arith.mulf %291, %290 : vector<4x4xf32>
    %293 = arith.addf %288, %292 : vector<4x4xf32>
    %294 = vector.extract_strided_slice %278 {offsets = [3, 0], sizes = [1, 1], strides = [1, 1]} : vector<4x1xf32> to vector<1x1xf32>
    %295 = vector.extract_strided_slice %272 {offsets = [12, 0], sizes = [4, 4], strides = [1, 1]} : vector<16x4xf32> to vector<4x4xf32>
    %296 = vector.broadcast %294 : vector<1x1xf32> to vector<4x4xf32>
    %297 = arith.mulf %296, %295 : vector<4x4xf32>
    %298 = arith.addf %293, %297 : vector<4x4xf32>
    %299 = vector.extract_strided_slice %271 {offsets = [0, 0], sizes = [4, 256], strides = [1, 1]} : vector<4x512xf32> to vector<4x256xf32>
    %cst_149 = arith.constant dense<0.000000e+00> : vector<4x256xf32>
    %300 = tpu.matmul %298, %299, %cst_149 {dimension_numbers = #tpu.dot_dimension_numbers<[1], [0], [0], [1], [0, 0, 1, 1], [], []>} : vector<4x4xf32>, vector<4x256xf32>, vector<4x256xf32> -> vector<4x256xf32>
    %301 = vector.extract_strided_slice %138 {offsets = [0, 256], sizes = [4, 256], strides = [1, 1]} : vector<4x512xf32> to vector<4x256xf32>
    %cst_150 = arith.constant dense<0.000000e+00> : vector<4xf32>
    %302 = vector.multi_reduction <add>, %301, %cst_150 [1] : vector<4x256xf32> to vector<4xf32>
    %303 = vector.shape_cast %302 : vector<4xf32> to vector<4x1xf32>
    %cst_151 = arith.constant 2.560000e+02 : f32
    %304 = vector.broadcast %cst_151 : f32 to vector<4x1xf32>
    %305 = arith.divf %303, %304 : vector<4x1xf32>
    %306 = vector.extract_strided_slice %305 {offsets = [0, 0], sizes = [1, 1], strides = [1, 1]} : vector<4x1xf32> to vector<1x1xf32>
    %307 = vector.extract_strided_slice %272 {offsets = [0, 0], sizes = [4, 4], strides = [1, 1]} : vector<16x4xf32> to vector<4x4xf32>
    %308 = vector.broadcast %306 : vector<1x1xf32> to vector<4x4xf32>
    %309 = arith.mulf %308, %307 : vector<4x4xf32>
    %310 = arith.addf %273, %309 : vector<4x4xf32>
    %311 = vector.extract_strided_slice %305 {offsets = [1, 0], sizes = [1, 1], strides = [1, 1]} : vector<4x1xf32> to vector<1x1xf32>
    %312 = vector.extract_strided_slice %272 {offsets = [4, 0], sizes = [4, 4], strides = [1, 1]} : vector<16x4xf32> to vector<4x4xf32>
    %313 = vector.broadcast %311 : vector<1x1xf32> to vector<4x4xf32>
    %314 = arith.mulf %313, %312 : vector<4x4xf32>
    %315 = arith.addf %310, %314 : vector<4x4xf32>
    %316 = vector.extract_strided_slice %305 {offsets = [2, 0], sizes = [1, 1], strides = [1, 1]} : vector<4x1xf32> to vector<1x1xf32>
    %317 = vector.extract_strided_slice %272 {offsets = [8, 0], sizes = [4, 4], strides = [1, 1]} : vector<16x4xf32> to vector<4x4xf32>
    %318 = vector.broadcast %316 : vector<1x1xf32> to vector<4x4xf32>
    %319 = arith.mulf %318, %317 : vector<4x4xf32>
    %320 = arith.addf %315, %319 : vector<4x4xf32>
    %321 = vector.extract_strided_slice %305 {offsets = [3, 0], sizes = [1, 1], strides = [1, 1]} : vector<4x1xf32> to vector<1x1xf32>
    %322 = vector.extract_strided_slice %272 {offsets = [12, 0], sizes = [4, 4], strides = [1, 1]} : vector<16x4xf32> to vector<4x4xf32>
    %323 = vector.broadcast %321 : vector<1x1xf32> to vector<4x4xf32>
    %324 = arith.mulf %323, %322 : vector<4x4xf32>
    %325 = arith.addf %320, %324 : vector<4x4xf32>
    %326 = vector.extract_strided_slice %271 {offsets = [0, 256], sizes = [4, 256], strides = [1, 1]} : vector<4x512xf32> to vector<4x256xf32>
    %cst_152 = arith.constant dense<0.000000e+00> : vector<4x256xf32>
    %327 = tpu.matmul %325, %326, %cst_152 {dimension_numbers = #tpu.dot_dimension_numbers<[1], [0], [0], [1], [0, 0, 1, 1], [], []>} : vector<4x4xf32>, vector<4x256xf32>, vector<4x256xf32> -> vector<4x256xf32>
    %328 = tpu.concatenate %300, %327 in 1 : vector<4x256xf32>, vector<4x256xf32> -> vector<4x512xf32>
    %329 = vector.extract_strided_slice %192 {offsets = [0, 2], sizes = [4, 1], strides = [1, 1]} : vector<4x6xf32> to vector<4x1xf32>
    %330 = vector.broadcast %329 : vector<4x1xf32> to vector<4x512xf32>
    %331 = arith.mulf %328, %330 : vector<4x512xf32>
    %332 = vector.extract_strided_slice %192 {offsets = [0, 3], sizes = [4, 1], strides = [1, 1]} : vector<4x6xf32> to vector<4x1xf32>
    %333 = vector.broadcast %332 : vector<4x1xf32> to vector<4x512xf32>
    %334 = arith.addf %331, %333 : vector<4x512xf32>
    %cst_153 = arith.constant 0.000000e+00 : f32
    %335 = vector.broadcast %cst_153 : f32 to vector<4x512xf32>
    %336 = arith.maximumf %334, %335 : vector<4x512xf32>
    %c17_i32_154 = arith.constant 17 : i32
    %337 = tpu.dynamic_rotate %336 by %c17_i32_154 dim 1 : vector<4x512xf32>, i32 -> vector<4x512xf32>
    %338 = vector.extract_strided_slice %0 {offsets = [0, 0], sizes = [1, 512], strides = [1, 1]} : vector<9x512xf32> to vector<1x512xf32>
    %339 = vector.broadcast %338 : vector<1x512xf32> to vector<4x512xf32>
    %340 = arith.mulf %337, %339 : vector<4x512xf32>
    %341 = arith.truncf %340 : vector<4x512xf32> to vector<4x512xbf16>
    %c0_155 = arith.constant 0 : index
    %c0_156 = arith.constant 0 : index
    %342 = vector.load %arg14[%c0_155, %c0_156] : memref<72x512xbf16, #tpu.memory_space<vmem>>, vector<4x512xbf16>
    tpu.vector_store %arg14[%c0_155, %c0_156], %341 {strides = array<i32>} : memref<72x512xbf16, #tpu.memory_space<vmem>>, vector<4x512xbf16>,
    %c16_i32_157 = arith.constant 16 : i32
    %343 = tpu.dynamic_rotate %336 by %c16_i32_157 dim 1 : vector<4x512xf32>, i32 -> vector<4x512xf32>
    %344 = vector.extract_strided_slice %0 {offsets = [1, 0], sizes = [1, 512], strides = [1, 1]} : vector<9x512xf32> to vector<1x512xf32>
    %345 = vector.broadcast %344 : vector<1x512xf32> to vector<4x512xf32>
    %346 = arith.mulf %343, %345 : vector<4x512xf32>
    %347 = arith.truncf %346 : vector<4x512xf32> to vector<4x512xbf16>
    %c8_158 = arith.constant 8 : index
    %c0_159 = arith.constant 0 : index
    %348 = vector.load %arg14[%c8_158, %c0_159] : memref<72x512xbf16, #tpu.memory_space<vmem>>, vector<4x512xbf16>
    tpu.vector_store %arg14[%c8_158, %c0_159], %347 {strides = array<i32>} : memref<72x512xbf16, #tpu.memory_space<vmem>>, vector<4x512xbf16>,
    %c15_i32_160 = arith.constant 15 : i32
    %349 = tpu.dynamic_rotate %336 by %c15_i32_160 dim 1 : vector<4x512xf32>, i32 -> vector<4x512xf32>
    %350 = vector.extract_strided_slice %0 {offsets = [2, 0], sizes = [1, 512], strides = [1, 1]} : vector<9x512xf32> to vector<1x512xf32>
    %351 = vector.broadcast %350 : vector<1x512xf32> to vector<4x512xf32>
    %352 = arith.mulf %349, %351 : vector<4x512xf32>
    %353 = arith.truncf %352 : vector<4x512xf32> to vector<4x512xbf16>
    %c16_161 = arith.constant 16 : index
    %c0_162 = arith.constant 0 : index
    %354 = vector.load %arg14[%c16_161, %c0_162] : memref<72x512xbf16, #tpu.memory_space<vmem>>, vector<4x512xbf16>
    tpu.vector_store %arg14[%c16_161, %c0_162], %353 {strides = array<i32>} : memref<72x512xbf16, #tpu.memory_space<vmem>>, vector<4x512xbf16>,
    %c1_i32_163 = arith.constant 1 : i32
    %355 = tpu.dynamic_rotate %336 by %c1_i32_163 dim 1 : vector<4x512xf32>, i32 -> vector<4x512xf32>
    %356 = vector.extract_strided_slice %0 {offsets = [3, 0], sizes = [1, 512], strides = [1, 1]} : vector<9x512xf32> to vector<1x512xf32>
    %357 = vector.broadcast %356 : vector<1x512xf32> to vector<4x512xf32>
    %358 = arith.mulf %355, %357 : vector<4x512xf32>
    %359 = arith.truncf %358 : vector<4x512xf32> to vector<4x512xbf16>
    %c24_164 = arith.constant 24 : index
    %c0_165 = arith.constant 0 : index
    %360 = vector.load %arg14[%c24_164, %c0_165] : memref<72x512xbf16, #tpu.memory_space<vmem>>, vector<4x512xbf16>
    tpu.vector_store %arg14[%c24_164, %c0_165], %359 {strides = array<i32>} : memref<72x512xbf16, #tpu.memory_space<vmem>>, vector<4x512xbf16>,
    %361 = arith.truncf %336 : vector<4x512xf32> to vector<4x512xbf16>
    %c32_166 = arith.constant 32 : index
    %c0_167 = arith.constant 0 : index
    %362 = vector.load %arg14[%c32_166, %c0_167] : memref<72x512xbf16, #tpu.memory_space<vmem>>, vector<4x512xbf16>
    tpu.vector_store %arg14[%c32_166, %c0_167], %361 {strides = array<i32>} : memref<72x512xbf16, #tpu.memory_space<vmem>>, vector<4x512xbf16>,
    %c511_i32_168 = arith.constant 511 : i32
    %363 = tpu.dynamic_rotate %336 by %c511_i32_168 dim 1 : vector<4x512xf32>, i32 -> vector<4x512xf32>
    %364 = vector.extract_strided_slice %0 {offsets = [5, 0], sizes = [1, 512], strides = [1, 1]} : vector<9x512xf32> to vector<1x512xf32>
    %365 = vector.broadcast %364 : vector<1x512xf32> to vector<4x512xf32>
    %366 = arith.mulf %363, %365 : vector<4x512xf32>
    %367 = arith.truncf %366 : vector<4x512xf32> to vector<4x512xbf16>
    %c40_169 = arith.constant 40 : index
    %c0_170 = arith.constant 0 : index
    %368 = vector.load %arg14[%c40_169, %c0_170] : memref<72x512xbf16, #tpu.memory_space<vmem>>, vector<4x512xbf16>
    tpu.vector_store %arg14[%c40_169, %c0_170], %367 {strides = array<i32>} : memref<72x512xbf16, #tpu.memory_space<vmem>>, vector<4x512xbf16>,
    %c497_i32_171 = arith.constant 497 : i32
    %369 = tpu.dynamic_rotate %336 by %c497_i32_171 dim 1 : vector<4x512xf32>, i32 -> vector<4x512xf32>
    %370 = vector.extract_strided_slice %0 {offsets = [6, 0], sizes = [1, 512], strides = [1, 1]} : vector<9x512xf32> to vector<1x512xf32>
    %371 = vector.broadcast %370 : vector<1x512xf32> to vector<4x512xf32>
    %372 = arith.mulf %369, %371 : vector<4x512xf32>
    %373 = arith.truncf %372 : vector<4x512xf32> to vector<4x512xbf16>
    %c48_172 = arith.constant 48 : index
    %c0_173 = arith.constant 0 : index
    %374 = vector.load %arg14[%c48_172, %c0_173] : memref<72x512xbf16, #tpu.memory_space<vmem>>, vector<4x512xbf16>
    tpu.vector_store %arg14[%c48_172, %c0_173], %373 {strides = array<i32>} : memref<72x512xbf16, #tpu.memory_space<vmem>>, vector<4x512xbf16>,
    %c496_i32_174 = arith.constant 496 : i32
    %375 = tpu.dynamic_rotate %336 by %c496_i32_174 dim 1 : vector<4x512xf32>, i32 -> vector<4x512xf32>
    %376 = vector.extract_strided_slice %0 {offsets = [7, 0], sizes = [1, 512], strides = [1, 1]} : vector<9x512xf32> to vector<1x512xf32>
    %377 = vector.broadcast %376 : vector<1x512xf32> to vector<4x512xf32>
    %378 = arith.mulf %375, %377 : vector<4x512xf32>
    %379 = arith.truncf %378 : vector<4x512xf32> to vector<4x512xbf16>
    %c56_175 = arith.constant 56 : index
    %c0_176 = arith.constant 0 : index
    %380 = vector.load %arg14[%c56_175, %c0_176] : memref<72x512xbf16, #tpu.memory_space<vmem>>, vector<4x512xbf16>
    tpu.vector_store %arg14[%c56_175, %c0_176], %379 {strides = array<i32>} : memref<72x512xbf16, #tpu.memory_space<vmem>>, vector<4x512xbf16>,
    %c495_i32_177 = arith.constant 495 : i32
    %381 = tpu.dynamic_rotate %336 by %c495_i32_177 dim 1 : vector<4x512xf32>, i32 -> vector<4x512xf32>
    %382 = vector.extract_strided_slice %0 {offsets = [8, 0], sizes = [1, 512], strides = [1, 1]} : vector<9x512xf32> to vector<1x512xf32>
    %383 = vector.broadcast %382 : vector<1x512xf32> to vector<4x512xf32>
    %384 = arith.mulf %381, %383 : vector<4x512xf32>
    %385 = arith.truncf %384 : vector<4x512xf32> to vector<4x512xbf16>
    %c64_178 = arith.constant 64 : index
    %c0_179 = arith.constant 0 : index
    %386 = vector.load %arg14[%c64_178, %c0_179] : memref<72x512xbf16, #tpu.memory_space<vmem>>, vector<4x512xbf16>
    tpu.vector_store %arg14[%c64_178, %c0_179], %385 {strides = array<i32>} : memref<72x512xbf16, #tpu.memory_space<vmem>>, vector<4x512xbf16>,
    %c0_180 = arith.constant 0 : index
    %c0_181 = arith.constant 0 : index
    %387 = vector.load %arg10[%c0_180, %c0_181] : memref<4x72xbf16, #tpu.memory_space<vmem>>, vector<4x72xbf16>
    %c0_182 = arith.constant 0 : index
    %c0_183 = arith.constant 0 : index
    %388 = vector.load %arg14[%c0_182, %c0_183] : memref<72x512xbf16, #tpu.memory_space<vmem>>, vector<72x512xbf16>
    %cst_184 = arith.constant dense<0.000000e+00> : vector<4x512xf32>
    %389 = tpu.matmul %387, %388, %cst_184 {dimension_numbers = #tpu.dot_dimension_numbers<[1], [0], [0], [1], [0, 0, 1, 1], [], []>} : vector<4x72xbf16>, vector<72x512xbf16>, vector<4x512xf32> -> vector<4x512xf32>
    %390 = vector.extract_strided_slice %192 {offsets = [0, 4], sizes = [4, 1], strides = [1, 1]} : vector<4x6xf32> to vector<4x1xf32>
    %391 = vector.broadcast %390 : vector<4x1xf32> to vector<4x512xf32>
    %392 = arith.mulf %389, %391 : vector<4x512xf32>
    %393 = vector.extract_strided_slice %192 {offsets = [0, 5], sizes = [4, 1], strides = [1, 1]} : vector<4x6xf32> to vector<4x1xf32>
    %394 = vector.broadcast %393 : vector<4x1xf32> to vector<4x512xf32>
    %395 = arith.addf %392, %394 : vector<4x512xf32>
    %cst_185 = arith.constant 0.000000e+00 : f32
    %396 = vector.broadcast %cst_185 : f32 to vector<4x512xf32>
    %397 = arith.maximumf %395, %396 : vector<4x512xf32>
    %398 = vector.extract_strided_slice %397 {offsets = [0, 0], sizes = [4, 256], strides = [1, 1]} : vector<4x512xf32> to vector<4x256xf32>
    %c0_186 = arith.constant 0 : index
    %c0_187 = arith.constant 0 : index
    %c0_188 = arith.constant 0 : index
    %399 = vector.load %arg12[%c0_186, %c0_187, %c0_188] : memref<2x4x256xf32, #tpu.memory_space<vmem>>, vector<1x4x256xf32>
    %400 = vector.shape_cast %399 : vector<1x4x256xf32> to vector<4x256xf32>
    %401 = vector.shape_cast %398 : vector<4x256xf32> to vector<1x4x256xf32>
    tpu.vector_store %arg12[%c0_186, %c0_187, %c0_188], %401 {strides = array<i32>} : memref<2x4x256xf32, #tpu.memory_space<vmem>>, vector<1x4x256xf32>,
    %402 = vector.extract_strided_slice %397 {offsets = [0, 256], sizes = [4, 256], strides = [1, 1]} : vector<4x512xf32> to vector<4x256xf32>
    %c1_189 = arith.constant 1 : index
    %c0_190 = arith.constant 0 : index
    %c0_191 = arith.constant 0 : index
    %403 = vector.load %arg12[%c1_189, %c0_190, %c0_191] : memref<2x4x256xf32, #tpu.memory_space<vmem>>, vector<1x4x256xf32>
    %404 = vector.shape_cast %403 : vector<1x4x256xf32> to vector<4x256xf32>
    %405 = vector.shape_cast %402 : vector<4x256xf32> to vector<1x4x256xf32>
    tpu.vector_store %arg12[%c1_189, %c0_190, %c0_191], %405 {strides = array<i32>} : memref<2x4x256xf32, #tpu.memory_space<vmem>>, vector<1x4x256xf32>,
    return
  }
  func.func @transform_0(%arg0: i32) -> (i32, i32, i32) {
    %c0_i32 = arith.constant 0 : i32
    %c0_i32_0 = arith.constant 0 : i32
    %c0_i32_1 = arith.constant 0 : i32
    return %arg0, %c0_i32, %c0_i32_0 : i32, i32, i32
  }
  func.func @transform_1(%arg0: i32) -> (i32, i32, i32) {
    %c0_i32 = arith.constant 0 : i32
    %c0_i32_0 = arith.constant 0 : i32
    %c0_i32_1 = arith.constant 0 : i32
    return %arg0, %c0_i32, %c0_i32_0 : i32, i32, i32
  }
  func.func @transform_2(%arg0: i32) -> (i32, i32) {
    %c0_i32 = arith.constant 0 : i32
    %c0_i32_0 = arith.constant 0 : i32
    %c0_i32_1 = arith.constant 0 : i32
    return %c0_i32, %c0_i32_0 : i32, i32
  }
  func.func @transform_3(%arg0: i32) -> (i32, i32) {
    %c0_i32 = arith.constant 0 : i32
    %c0_i32_0 = arith.constant 0 : i32
    %c0_i32_1 = arith.constant 0 : i32
    return %c0_i32, %c0_i32_0 : i32, i32
  }
  func.func @transform_4(%arg0: i32) -> (i32, i32) {
    %c0_i32 = arith.constant 0 : i32
    %c0_i32_0 = arith.constant 0 : i32
    %c0_i32_1 = arith.constant 0 : i32
    return %c0_i32, %c0_i32_0 : i32, i32
  }
  func.func @transform_5(%arg0: i32) -> (i32, i32) {
    %c0_i32 = arith.constant 0 : i32
    %c0_i32_0 = arith.constant 0 : i32
    %c0_i32_1 = arith.constant 0 : i32
    return %c0_i32, %c0_i32_0 : i32, i32
  }
  func.func @transform_6(%arg0: i32) -> (i32, i32) {
    %c0_i32 = arith.constant 0 : i32
    %c0_i32_0 = arith.constant 0 : i32
    %c0_i32_1 = arith.constant 0 : i32
    return %c0_i32, %c0_i32_0 : i32, i32
  }
  func.func @transform_7(%arg0: i32) -> (i32, i32) {
    %c0_i32 = arith.constant 0 : i32
    %c0_i32_0 = arith.constant 0 : i32
    %c0_i32_1 = arith.constant 0 : i32
    return %c0_i32, %c0_i32_0 : i32, i32
  }
  func.func @transform_8(%arg0: i32) -> (i32, i32) {
    %c0_i32 = arith.constant 0 : i32
    %c0_i32_0 = arith.constant 0 : i32
    %c0_i32_1 = arith.constant 0 : i32
    return %c0_i32, %c0_i32_0 : i32, i32
  }
  func.func @transform_9(%arg0: i32) -> (i32, i32) {
    %c0_i32 = arith.constant 0 : i32
    %c0_i32_0 = arith.constant 0 : i32
    %c0_i32_1 = arith.constant 0 : i32
    return %c0_i32, %c0_i32_0 : i32, i32
  }
  func.func @transform_10(%arg0: i32) -> (i32, i32) {
    %c0_i32 = arith.constant 0 : i32
    %c0_i32_0 = arith.constant 0 : i32
    %c0_i32_1 = arith.constant 0 : i32
    return %c0_i32, %c0_i32_0 : i32, i32
  }
  func.func @transform_11(%arg0: i32) -> (i32, i32, i32) {
    %c0_i32 = arith.constant 0 : i32
    %c0_i32_0 = arith.constant 0 : i32
    %c0_i32_1 = arith.constant 0 : i32
    return %arg0, %c0_i32, %c0_i32_0 : i32, i32, i32
  }
}

</mosaic_0001>

<bundles_post_ra>
// kernel: tpu_custom_call.1
= control target key start
LH: loop header
LB: loop body
LE: loop exit
PB: predicated region body
PF: predicated region fallthrough
CT: control target
= control target key end

     0   :  { %16 = vsyncpa [#allocation5], 0  ;;  %s4344_s0 = inlined_call_operand.hbm [shape: f32[2,4,256], index: 0, kind: input, shape index: {}]   ;;  %s4345_s1 = inlined_call_operand.hbm [shape: f32[2,4,256], index: 1, kind: input, shape index: {}]   ;;  %s4346_s2 = inlined_call_operand.vmem [shape: f32[9,512], index: 2, kind: input, shape index: {}]   ;;  %s4347_s3 = inlined_call_operand.vmem [shape: bf16[8,72], index: 3, kind: input, shape index: {}]   ;;  %s4348_s4 = inlined_call_operand.vmem [shape: f32[8,1], index: 4, kind: input, shape index: {}]   ;;  %s4349_s5 = inlined_call_operand.vmem [shape: bf16[72,72], index: 5, kind: input, shape index: {}]   ;;  %s4350_s6 = inlined_call_operand.vmem [shape: f32[72,1], index: 6, kind: input, shape index: {}]   ;;  %s4351_s7 = inlined_call_operand.vmem [shape: f32[16,4], index: 7, kind: input, shape index: {}]   ;;  %s4352_s8 = inlined_call_operand.vmem [shape: f32[4,4], index: 8, kind: input, shape index: {}]   ;;  %s4353_s9 = inlined_call_operand.vmem [shape: bf16[4,72], index: 9, kind: input, shape index: {}]   ;;  %s4354_s10 = inlined_call_operand.vmem [shape: f32[4,6], index: 10, kind: input, shape index: {}]   ;;  %s4355_s11 = inlined_call_operand.hbm [shape: f32[2,4,256], index: 11, kind: output, shape index: {}]  }
   0x1   :  { %17 = vsyncpa [#allocation8], 0 }
   0x2   :  { %18 = vsyncpa [#allocation6], 0  ;;  %s3159_s17 = smov [#allocation4]   ;;  %s3087_s21 = scalar_lea.hbm %s4344_s0, 256 }
   0x3   :  { %s24_s18 = sshll.u32 %s3159_s17, 4  ;;  %p3088_p0 = scmp.ne.s32.totalorder %s4344_s0, %s3087_s21  ;;  %s25_s18 = int_to_ptr.vmem [resolvable:$true] %s24_s18 }
   0x4   :  { %p3091_p1 = scmp.lt.u32.totalorder %s3087_s21, %s4344_s0 }
   0x6   :  { %p3093_p2 = pnand %p3091_p1, %p3088_p0 }
   0x8   :  { %3096 = shalt.err (!%p3093_p2)
}
   0x9   :  { %s3097_s26 = scalar_lea.vmem %s25_s18, 256  ;;  %p3102_p4 = scmp.lt.s32.totalorder %s25_s18, %s25_s18 }
   0xa   :  { %p3098_p3 = scmp.ne.s32.totalorder %s25_s18, %s3097_s26  ;;  %p3103_p5 = scmp.lt.s32.totalorder %s3097_s26, %s3097_s26 }
   0xc   :  { %p3104_p6 = por %p3103_p5, %p3102_p4 }
   0xe   :  { %p3105_p7 = pnand %p3104_p6, %p3098_p3 }
  0x10   :  { %3108 = shalt.err (!%p3105_p7)
}
  0x11   :  { %s3160_s27 = smov 128   ;;  %s3161_s28 = smov 8  }
  0x12   :  { %30 = dma.hbm_to_vmem [thread:$0]  %s4344_s0, 256, %s25_s18, [#allocation5], %s3160_s27, %s3160_s27, %s3161_s28  }
  0x13   :  { %s3162_s12 = smov [#allocation7]   ;;  %s3109_s16 = scalar_lea.hbm %s4345_s1, 256 }
  0x14   :  { %s36_s13 = sshll.u32 %s3162_s12, 4  ;;  %p3110_p8 = scmp.ne.s32.totalorder %s4345_s1, %s3109_s16  ;;  %s37_s13 = int_to_ptr.vmem [resolvable:$true] %s36_s13 }
  0x15   :  { %p3113_p9 = scmp.lt.u32.totalorder %s3109_s16, %s4345_s1 }
  0x17   :  { %p3115_p10 = pnand %p3113_p9, %p3110_p8 }
  0x19   :  { %3118 = shalt.err (!%p3115_p10)
}
  0x1a   :  { %s3119_s22 = scalar_lea.vmem %s37_s13, 256  ;;  %p3124_p12 = scmp.lt.s32.totalorder %s37_s13, %s37_s13 }
  0x1b   :  { %p3120_p11 = scmp.ne.s32.totalorder %s37_s13, %s3119_s22  ;;  %p3125_p13 = scmp.lt.s32.totalorder %s3119_s22, %s3119_s22 }
  0x1d   :  { %p3126_p0 = por %p3125_p13, %p3124_p12 }
  0x1f   :  { %p3127_p1 = pnand %p3126_p0, %p3120_p11 }
  0x21   :  { %3130 = shalt.err (!%p3127_p1)
}
  0x22   :  { %42 = dma.hbm_to_vmem [thread:$0]  %s4345_s1, 256, %s37_s13, [#allocation8], %s3160_s27, %s3160_s27, %s3161_s28  }
  0x23   :  { %3153 = dma.done.wait [#allocation5], 256  }
  0x24   :  { %3154 = vsyncadd [#allocation5], 4294967040 }
  0x25   :  { %3155 = dma.done.wait [#allocation8], 256  }
  0x26   :  { %3156 = vsyncadd [#allocation8], 4294967040  ;;  %v3269_v0 = vld [vmem:[#allocation7 + $0x8] sm:$0xff]  ;;  %v3271_v1 = vld [vmem:[#allocation7] sm:$0xff]  ;;  %s3163_s23 = smov 17   ;;  %s3164_s1 = smov 16   ;;  %v120_v14 = vlaneseq }
  0x27   :  { %544 = vrot.lane.b32.xlu1 %v3269_v0, %s3163_s23  ;;  %540 = vrot.lane.b32.xlu0 %v3271_v1, %s3163_s23  ;;  %v3279_v2 = vcombine.high %v3269_v0, %v3269_v0  ;;  %v3287_v3 = vcombine.high %v3271_v1, %v3271_v1  ;;  %v3293_v4 = vld [vmem:[#allocation4] sm:$0xff]  ;;  %v3303_v6 = vld [vmem:[#allocation4 + $0x8] sm:$0xff]  ;;  %s3165_s24 = smov 15   ;;  %s3166_s25 = smov 1   ;;  %v3434_v21 = vld [vmem:[%s4346_s2 + $0x18] sm:$0xff]  ;;  %v4356_v58 = vmov 0  }
  0x28   :  { %v3301_v5 = vcombine.high %v3293_v4, %v3293_v4  ;;  %v3311_v7 = vcombine.high %v3303_v6, %v3303_v6  ;;  %s3167_s26 = smov 127   ;;  %s3168_s29 = smov 113   ;;  %v3413_v15 = vshrl.u32 %v120_v14, 7  ;;  %v3419_v16 = vand.u32 127, %v120_v14  ;;  %v3429_v20 = vld [vmem:[%s4346_s2] sm:$0xff]  ;;  %v3440_v22 = vld [vmem:[%s4346_s2 + $0x8] sm:$0xff]  ;;  %1012 = vmatprep.mubr.bf16.mxu0 %v4356_v58  ;;  %1053 = vmatprep.mubr.bf16.mxu1 %v4356_v58 }
  0x29   :  { %v2915_v8 = vpack.c.bf16 %v3287_v3, %v3271_v1  ;;  %v2916_v9 = vpack.c.bf16 %v3279_v2, %v3269_v0  ;;  %s3169_s30 = smov 112   ;;  %s3170_s12 = smov 111   ;;  %v3445_v23 = vld [vmem:[%s4346_s2 + $0x10] sm:$0xff]  ;;  %76 = vst [vmem:[#allocation3] sm:$0xcc] %v4356_v58  ;;  %2981 = vset.pattern.permute.xlu0 %v4356_v58  ;;  %2982 = vset.pattern.permute.xlu1 %v4356_v58  ;;  %v867_v63 = vld [vmem:[%s4348_s4] sm:$0xff] }
  0x2a   :  { %v2897_v10 = vpack.c.bf16 %v3301_v5, %v3293_v4  ;;  %v2898_v12 = vpack.c.bf16 %v3311_v7, %v3303_v6  ;;  %v129_v19 = vsub.s32 0, %v3413_v15  ;;  %vm122_vm0 = vcmp.lt.s32.totalorder %v3419_v16, 17  ;;  %77 = vst [vmem:[#allocation3 + $0x8] sm:$0xcc] %v4356_v58  ;;  %78 = vst [vmem:[#allocation3 + $0x10] sm:$0xcc] %v4356_v58 }
  0x2b   :  { %546 = vrot.lane.b32.xlu1 %v3279_v2, %s3163_s23  ;;  %576 = vrot.lane.b32.xlu0 %v3271_v1, %s3164_s1  ;;  %v698_v11 = vrot.slane %v2915_v8, 6  ;;  %v699_v13 = vrot.slane %v2916_v9, 6  ;;  %v180_v26 = vsub.s32 1, %v3413_v15  ;;  %vm173_vm1 = vcmp.lt.s32.totalorder %v3419_v16, 16  ;;  %79 = vst [vmem:[#allocation3 + $0x18] sm:$0xcc] %v4356_v58 }
  0x2c   :  { %334 = vst [vmem:[#allocation2 + $0x40] sm:$0x33] %v2897_v10  ;;  %335 = vst [vmem:[#allocation2 + $0x48] sm:$0x33] %v2898_v12  ;;  %v3449_v27 = vrot.slane %v3429_v20, %v129_v19  ;;  %v3452_v28 = vrot.slane %v3434_v21, %v129_v19  ;;  %v3462_v30 = vrot.slane %v3440_v22, %v129_v19  ;;  %vm224_vm2 = vcmp.lt.s32.totalorder %v3419_v16, 15 }
  0x2d   :  { %702 = vst [vmem:[#allocation2 + $0x40] sm:$0xcc] %v698_v11  ;;  %703 = vst [vmem:[#allocation2 + $0x48] sm:$0xcc] %v699_v13  ;;  %v3465_v31 = vrot.slane %v3445_v23, %v129_v19  ;;  %v3470_v34 = vrot.slane %v3440_v22, %v180_v26  ;;  %v3473_v36 = vrot.slane %v3429_v20, %v180_v26  ;;  %vm275_vm3 = vcmp.lt.s32.totalorder %v3419_v16, 1 }
  0x2e   :  { %v3476_v37 = vrot.slane %v3445_v23, %v180_v26  ;;  %v3493_v45 = vrot.slane %v3434_v21, %v180_v26  ;;  %80 = vst [vmem:[#allocation3 + $0x20] sm:$0xcc] %v4356_v58  ;;  %81 = vst [vmem:[#allocation3 + $0x28] sm:$0xcc] %v4356_v58  ;;  %vm344_vm4 = vcmp.lt.s32.totalorder %v3419_v16, 127  ;;  %vm395_vm5 = vcmp.lt.s32.totalorder %v3419_v16, 113 }
  0x2f   :  { %578 = vrot.lane.b32.xlu1 %v3287_v3, %s3164_s1  ;;  %542 = vrot.lane.b32.xlu0 %v3287_v3, %s3163_s23  ;;  %82 = vst [vmem:[#allocation3 + $0x30] sm:$0xcc] %v4356_v58  ;;  %83 = vst [vmem:[#allocation3 + $0x38] sm:$0xcc] %v4356_v58  ;;  %vm446_vm6 = vcmp.lt.s32.totalorder %v3419_v16, 112  ;;  %vm497_vm7 = vcmp.lt.s32.totalorder %v3419_v16, 111 }
  0x30   :  { %84 = vst [vmem:[#allocation3 + $0x40] sm:$0xcc] %v4356_v58  ;;  %85 = vst [vmem:[#allocation3 + $0x48] sm:$0xcc] %v4356_v58  ;;  %vm967_vm8 = vcmask 1043456   ;;  %vm963_vm9 = vcmask 588800  }
  0x31   :  { %86 = vst [vmem:[#allocation3 + $0x50] sm:$0xcc] %v4356_v58  ;;  %87 = vst [vmem:[#allocation3 + $0x58] sm:$0xcc] %v4356_v58  ;;  %vm1922_vm10 = vcmask 1047556   ;;  %vm1960_vm11 = vcmask 31744  }
  0x32   :  { %88 = vst [vmem:[#allocation3 + $0x60] sm:$0xcc] %v4356_v58  ;;  %89 = vst [vmem:[#allocation3 + $0x68] sm:$0xcc] %v4356_v58 }
  0x33   :  { %582 = vrot.lane.b32.xlu1 %v3279_v2, %s3164_s1  ;;  %580 = vrot.lane.b32.xlu0 %v3269_v0, %s3164_s1  ;;  %90 = vst [vmem:[#allocation3 + $0x70] sm:$0xcc] %v4356_v58  ;;  %91 = vst [vmem:[#allocation3 + $0x78] sm:$0xcc] %v4356_v58 }
  0x34   :  { %92 = vst [vmem:[#allocation3 + $0x80] sm:$0xcc] %v4356_v58  ;;  %93 = vst [vmem:[#allocation3 + $0x88] sm:$0xcc] %v4356_v58 }
  0x37   :  { %112 = vrot.lane.b32.xlu0 %v3293_v4, %s3163_s23  ;;  %114 = vrot.lane.b32.xlu1 %v3301_v5, %s3163_s23 }
  0x3b   :  { %116 = vrot.lane.b32.xlu0 %v3303_v6, %s3163_s23  ;;  %118 = vrot.lane.b32.xlu1 %v3311_v7, %s3163_s23 }
  0x3f   :  { %165 = vrot.lane.b32.xlu0 %v3293_v4, %s3164_s1  ;;  %167 = vrot.lane.b32.xlu1 %v3301_v5, %s3164_s1 }
  0x43   :  { %169 = vrot.lane.b32.xlu0 %v3303_v6, %s3164_s1  ;;  %171 = vrot.lane.b32.xlu1 %v3311_v7, %s3164_s1 }
  0x47   :  { %612 = vrot.lane.b32.xlu0 %v3271_v1, %s3165_s24  ;;  %614 = vrot.lane.b32.xlu1 %v3287_v3, %s3165_s24 }
  0x4b   :  { %616 = vrot.lane.b32.xlu0 %v3269_v0, %s3165_s24  ;;  %618 = vrot.lane.b32.xlu1 %v3279_v2, %s3165_s24 }
  0x4f   :  { %648 = vrot.lane.b32.xlu0 %v3271_v1, %s3166_s25  ;;  %650 = vrot.lane.b32.xlu1 %v3287_v3, %s3166_s25 }
  0x53   :  { %652 = vrot.lane.b32.xlu0 %v3269_v0, %s3166_s25  ;;  %654 = vrot.lane.b32.xlu1 %v3279_v2, %s3166_s25 }
  0x57   :  { %216 = vrot.lane.b32.xlu0 %v3293_v4, %s3165_s24  ;;  %218 = vrot.lane.b32.xlu1 %v3301_v5, %s3165_s24 }
  0x5b   :  { %220 = vrot.lane.b32.xlu0 %v3303_v6, %s3165_s24  ;;  %222 = vrot.lane.b32.xlu1 %v3311_v7, %s3165_s24 }
  0x5f   :  { %267 = vrot.lane.b32.xlu0 %v3293_v4, %s3166_s25  ;;  %269 = vrot.lane.b32.xlu1 %v3301_v5, %s3166_s25 }
  0x63   :  { %271 = vrot.lane.b32.xlu0 %v3303_v6, %s3166_s25  ;;  %273 = vrot.lane.b32.xlu1 %v3311_v7, %s3166_s25 }
  0x67   :  { %704 = vrot.lane.b32.xlu0 %v3271_v1, %s3167_s26  ;;  %706 = vrot.lane.b32.xlu1 %v3287_v3, %s3167_s26 }
  0x6b   :  { %708 = vrot.lane.b32.xlu0 %v3269_v0, %s3167_s26  ;;  %710 = vrot.lane.b32.xlu1 %v3279_v2, %s3167_s26 }
  0x6f   :  { %336 = vrot.lane.b32.xlu0 %v3293_v4, %s3167_s26  ;;  %338 = vrot.lane.b32.xlu1 %v3301_v5, %s3167_s26 }
  0x73   :  { %340 = vrot.lane.b32.xlu0 %v3303_v6, %s3167_s26  ;;  %342 = vrot.lane.b32.xlu1 %v3311_v7, %s3167_s26 }
  0x77   :  { %740 = vrot.lane.b32.xlu0 %v3271_v1, %s3168_s29  ;;  %742 = vrot.lane.b32.xlu1 %v3287_v3, %s3168_s29 }
  0x7b   :  { %744 = vrot.lane.b32.xlu0 %v3269_v0, %s3168_s29  ;;  %746 = vrot.lane.b32.xlu1 %v3279_v2, %s3168_s29 }
  0x7f   :  { %776 = vrot.lane.b32.xlu0 %v3271_v1, %s3169_s30  ;;  %778 = vrot.lane.b32.xlu1 %v3287_v3, %s3169_s30 }
  0x83   :  { %780 = vrot.lane.b32.xlu0 %v3269_v0, %s3169_s30  ;;  %782 = vrot.lane.b32.xlu1 %v3279_v2, %s3169_s30 }
  0x87   :  { %387 = vrot.lane.b32.xlu0 %v3293_v4, %s3168_s29  ;;  %389 = vrot.lane.b32.xlu1 %v3301_v5, %s3168_s29 }
  0x8b   :  { %391 = vrot.lane.b32.xlu0 %v3303_v6, %s3168_s29  ;;  %393 = vrot.lane.b32.xlu1 %v3311_v7, %s3168_s29 }
  0x8f   :  { %438 = vrot.lane.b32.xlu0 %v3293_v4, %s3169_s30  ;;  %440 = vrot.lane.b32.xlu1 %v3301_v5, %s3169_s30 }
  0x93   :  { %442 = vrot.lane.b32.xlu0 %v3303_v6, %s3169_s30  ;;  %444 = vrot.lane.b32.xlu1 %v3311_v7, %s3169_s30 }
  0x97   :  { %812 = vrot.lane.b32.xlu0 %v3271_v1, %s3170_s12  ;;  %814 = vrot.lane.b32.xlu1 %v3287_v3, %s3170_s12 }
  0x99   :  { %v545_v17 = vpop.permute.xlu1 %544  ;;  %v541_v18 = vpop.permute.xlu0 %540 }
  0x9b   :  { %816 = vrot.lane.b32.xlu0 %v3269_v0, %s3170_s12  ;;  %818 = vrot.lane.b32.xlu1 %v3279_v2, %s3170_s12 }
  0x9d   :  { %v547_v24 = vpop.permute.xlu1 %546  ;;  %v577_v25 = vpop.permute.xlu0 %576 }
  0x9e   :  { %v551_v29 = vsel %vm122_vm0, %v547_v24, %v541_v18  ;;  %v548_v32 = vsel %vm122_vm0, %v545_v17, %v547_v24 }
  0x9f   :  { %489 = vrot.lane.b32.xlu0 %v3293_v4, %s3170_s12  ;;  %491 = vrot.lane.b32.xlu1 %v3301_v5, %s3170_s12  ;;  %v552_v38 = vmul.f32 %v551_v29, %v3449_v27  ;;  %v555_v42 = vmul.f32 %v548_v32, %v3452_v28 }
  0xa1   :  { %v579_v33 = vpop.permute.xlu1 %578  ;;  %v543_v35 = vpop.permute.xlu0 %542 }
  0xa2   :  { %v586_v39 = vsel %vm173_vm1, %v577_v25, %v579_v33  ;;  %v549_v40 = vsel %vm122_vm0, %v543_v35, %v545_v17  ;;  %v550_v41 = vsel %vm122_vm0, %v541_v18, %v543_v35 }
  0xa3   :  { %v553_v43 = vmul.f32 %v550_v41, %v3462_v30  ;;  %v554_v44 = vmul.f32 %v549_v40, %v3465_v31  ;;  %493 = vrot.lane.b32.xlu0 %v3303_v6, %s3170_s12  ;;  %495 = vrot.lane.b32.xlu1 %v3311_v7, %s3170_s12  ;;  %v589_v46 = vmul.f32 %v586_v39, %v3470_v34 }
  0xa5   :  { %v2907_v47 = vpack.c.bf16 %v553_v43, %v552_v38  ;;  %v2908_v48 = vpack.c.bf16 %v555_v42, %v554_v44  ;;  %v583_v49 = vpop.permute.xlu1 %582  ;;  %v581_v50 = vpop.permute.xlu0 %580 }
  0xa6   :  { %v587_v51 = vsel %vm173_vm1, %v583_v49, %v577_v25  ;;  %v584_v52 = vsel %vm173_vm1, %v581_v50, %v583_v49  ;;  %v585_v53 = vsel %vm173_vm1, %v579_v33, %v581_v50  ;;  %v231_v33 = vsub.s32 2, %v3413_v15 }
  0xa7   :  { %v570_v54 = vrot.slane %v2907_v47, 6  ;;  %v571_v55 = vrot.slane %v2908_v48, 6  ;;  %v588_v56 = vmul.f32 %v587_v51, %v3473_v36  ;;  %v590_v57 = vmul.f32 %v585_v53, %v3476_v37  ;;  %870 = vperm.xlu0 %2981, %v867_v63  }
  0xa8   :  { %v591_v59 = vmul.f32 %v584_v52, %v3493_v45  ;;  %v3560_v47 = vrot.slane %v3445_v23, %v231_v33  ;;  %v3563_v48 = vrot.slane %v3429_v20, %v231_v33  ;;  %v3566_v49 = vrot.slane %v3434_v21, %v231_v33 }
  0xa9   :  { %574 = vst [vmem:[#allocation2] sm:$0xcc] %v570_v54  ;;  %575 = vst [vmem:[#allocation2 + $0x8] sm:$0xcc] %v571_v55  ;;  %v2909_v60 = vpack.c.bf16 %v589_v46, %v588_v56  ;;  %v113_v61 = vpop.permute.xlu0 %112  ;;  %v115_v62 = vpop.permute.xlu1 %114  ;;  %v3557_v46 = vrot.slane %v3440_v22, %v231_v33  ;;  %v282_v56 = vsub.s32 3, %v3413_v15 }
  0xaa   :  { %v2910_v0 = vpack.c.bf16 %v591_v59, %v590_v57  ;;  %v125_v3 = vsel %vm122_vm0, %v113_v61, %v115_v62 }
  0xab   :  { %v606_v1 = vrot.slane %v2909_v60, 6  ;;  %v144_v9 = vmul.f32 %v3462_v30, %v125_v3  ;;  %v3586_v3 = vrot.slane %v3445_v23, %v282_v56 }
  0xac   :  { %v607_v2 = vrot.slane %v2910_v0, 6 }
  0xad   :  { %610 = vst [vmem:[#allocation2 + $0x10] sm:$0xcc] %v606_v1  ;;  %v117_v4 = vpop.permute.xlu0 %116  ;;  %v119_v5 = vpop.permute.xlu1 %118 }
  0xae   :  { %611 = vst [vmem:[#allocation2 + $0x18] sm:$0xcc] %v607_v2  ;;  %v124_v6 = vsel %vm122_vm0, %v115_v62, %v117_v4  ;;  %v123_v7 = vsel %vm122_vm0, %v117_v4, %v119_v5  ;;  %v126_v8 = vsel %vm122_vm0, %v119_v5, %v113_v61  ;;  %v3583_v2 = vrot.slane %v3440_v22, %v282_v56 }
  0xaf   :  { %v145_v10 = vmul.f32 %v3465_v31, %v124_v6  ;;  %v143_v11 = vmul.f32 %v3449_v27, %v126_v8  ;;  %v146_v12 = vmul.f32 %v3452_v28, %v123_v7  ;;  %v3589_v7 = vrot.slane %v3429_v20, %v282_v56 }
  0xb0   :  { %v3592_v8 = vrot.slane %v3434_v21, %v282_v56 }
  0xb1   :  { %v2889_v13 = vpack.c.bf16 %v144_v9, %v143_v11  ;;  %v2890_v14 = vpack.c.bf16 %v146_v12, %v145_v10  ;;  %v166_v17 = vpop.permute.xlu0 %165  ;;  %v168_v18 = vpop.permute.xlu1 %167 }
  0xb2   :  { %v176_v19 = vsel %vm173_vm1, %v166_v17, %v168_v18 }
  0xb3   :  { %163 = vst [vmem:[#allocation2] sm:$0x33] %v2889_v13  ;;  %164 = vst [vmem:[#allocation2 + $0x8] sm:$0x33] %v2890_v14  ;;  %v195_v35 = vmul.f32 %v3470_v34, %v176_v19 }
  0xb5   :  { %v170_v24 = vpop.permute.xlu0 %169  ;;  %v172_v25 = vpop.permute.xlu1 %171 }
  0xb6   :  { %v175_v26 = vsel %vm173_vm1, %v168_v18, %v170_v24  ;;  %v174_v29 = vsel %vm173_vm1, %v170_v24, %v172_v25  ;;  %v177_v32 = vsel %vm173_vm1, %v172_v25, %v166_v17 }
  0xb7   :  { %v196_v38 = vmul.f32 %v3476_v37, %v175_v26  ;;  %v194_v39 = vmul.f32 %v3473_v36, %v177_v32  ;;  %v197_v40 = vmul.f32 %v3493_v45, %v174_v29 }
  0xb9   :  { %v2891_v41 = vpack.c.bf16 %v195_v35, %v194_v39  ;;  %v2892_v42 = vpack.c.bf16 %v197_v40, %v196_v38  ;;  %v613_v43 = vpop.permute.xlu0 %612  ;;  %v615_v44 = vpop.permute.xlu1 %614 }
  0xba   :  { %v622_v50 = vsel %vm224_vm2, %v613_v43, %v615_v44 }
  0xbb   :  { %214 = vst [vmem:[#allocation2 + $0x10] sm:$0x33] %v2891_v41  ;;  %215 = vst [vmem:[#allocation2 + $0x18] sm:$0x33] %v2892_v42  ;;  %v625_v57 = vmul.f32 %v622_v50, %v3557_v46 }
  0xbd   :  { %v617_v51 = vpop.permute.xlu0 %616  ;;  %v619_v52 = vpop.permute.xlu1 %618 }
  0xbe   :  { %v621_v53 = vsel %vm224_vm2, %v615_v44, %v617_v51  ;;  %v620_v54 = vsel %vm224_vm2, %v617_v51, %v619_v52  ;;  %v623_v55 = vsel %vm224_vm2, %v619_v52, %v613_v43 }
  0xbf   :  { %v626_v59 = vmul.f32 %v621_v53, %v3560_v47  ;;  %v624_v60 = vmul.f32 %v623_v55, %v3563_v48  ;;  %v627_v61 = vmul.f32 %v620_v54, %v3566_v49 }
  0xc1   :  { %v2911_v62 = vpack.c.bf16 %v625_v57, %v624_v60  ;;  %v2912_v63 = vpack.c.bf16 %v627_v61, %v626_v59  ;;  %v649_v0 = vpop.permute.xlu0 %648  ;;  %v651_v1 = vpop.permute.xlu1 %650 }
  0xc2   :  { %v2993_v4 = vld [vmem:[#allocation2 + $0x4] ss:$16 sps:$4 sm:$0xff]   ;;  %v2995_v9 = vld [vmem:[#allocation2 + $0xc] ss:$16 sps:$4 sm:$0xff]   ;;  %v2997_v10 = vld [vmem:[#allocation2] ss:$16 sps:$4 sm:$0xff]   ;;  %v658_v11 = vsel %vm275_vm3, %v649_v0, %v651_v1 }
  0xc3   :  { %v642_v5 = vrot.slane %v2911_v62, 6  ;;  %v643_v6 = vrot.slane %v2912_v63, 6  ;;  %980 = vmatprep.subr.bf16.mxu0 %v2993_v4  ;;  %v2998_v12 = vld [vmem:[#allocation2 + $0x8] ss:$16 sps:$4 sm:$0xff]   ;;  %1021 = vmatprep.subr.bf16.mxu1 %v2995_v9  ;;  %v661_v24 = vmul.f32 %v658_v11, %v3583_v2 }
  0xc4   :  { %981 = vmatpush1.bf16.msra.mxu0 %v2997_v10  ;;  %1022 = vmatpush1.bf16.msra.mxu1 %v2998_v12 }
  0xc5   :  { %646 = vst [vmem:[#allocation2 + $0x20] sm:$0xcc] %v642_v5  ;;  %647 = vst [vmem:[#allocation2 + $0x28] sm:$0xcc] %v643_v6  ;;  %v653_v13 = vpop.permute.xlu0 %652  ;;  %v655_v14 = vpop.permute.xlu1 %654  ;;  %v3627_v5 = vsub.s32 5, %v3413_v15 }
  0xc6   :  { %v657_v17 = vsel %vm275_vm3, %v651_v1, %v653_v13  ;;  %v656_v18 = vsel %vm275_vm3, %v653_v13, %v655_v14  ;;  %v659_v19 = vsel %vm275_vm3, %v655_v14, %v649_v0 }
  0xc7   :  { %v662_v25 = vmul.f32 %v657_v17, %v3586_v3  ;;  %v660_v26 = vmul.f32 %v659_v19, %v3589_v7  ;;  %v663_v29 = vmul.f32 %v656_v18, %v3592_v8  ;;  %v3636_v18 = vrot.slane %v3429_v20, %v3627_v5 }
  0xc8   :  { %v3640_v19 = vrot.slane %v3440_v22, %v3627_v5 }
  0xc9   :  { %v2913_v32 = vpack.c.bf16 %v661_v24, %v660_v26  ;;  %v2914_v33 = vpack.c.bf16 %v663_v29, %v662_v25  ;;  %v217_v35 = vpop.permute.xlu0 %216  ;;  %v219_v38 = vpop.permute.xlu1 %218  ;;  %v3644_v24 = vrot.slane %v3445_v23, %v3627_v5  ;;  %v3648_v25 = vrot.slane %v3434_v21, %v3627_v5 }
  0xca   :  { %v227_v41 = vsel %vm224_vm2, %v217_v35, %v219_v38  ;;  %4369 = vst [vmem:[#allocation13_spill] sm:$0xff] %v3640_v19 }
  0xcb   :  { %v678_v39 = vrot.slane %v2913_v32, 6  ;;  %v679_v40 = vrot.slane %v2914_v33, 6  ;;  %v246_v52 = vmul.f32 %v3557_v46, %v227_v41  ;;  %4370 = vst [vmem:[#allocation14_spill] sm:$0xff] %v3644_v24  ;;  %4371 = vst [vmem:[#allocation15_spill] sm:$0xff] %v3648_v25 }
  0xcd   :  { %682 = vst [vmem:[#allocation2 + $0x30] sm:$0xcc] %v678_v39  ;;  %683 = vst [vmem:[#allocation2 + $0x38] sm:$0xcc] %v679_v40  ;;  %v221_v42 = vpop.permute.xlu0 %220  ;;  %v223_v43 = vpop.permute.xlu1 %222 }
  0xce   :  { %v226_v44 = vsel %vm224_vm2, %v219_v38, %v221_v42  ;;  %v225_v50 = vsel %vm224_vm2, %v221_v42, %v223_v43  ;;  %v228_v51 = vsel %vm224_vm2, %v223_v43, %v217_v35 }
  0xcf   :  { %v247_v53 = vmul.f32 %v3560_v47, %v226_v44  ;;  %v245_v54 = vmul.f32 %v3563_v48, %v228_v51  ;;  %v248_v55 = vmul.f32 %v3566_v49, %v225_v50 }
  0xd1   :  { %v2893_v56 = vpack.c.bf16 %v246_v52, %v245_v54  ;;  %v2894_v57 = vpack.c.bf16 %v248_v55, %v247_v53  ;;  %v268_v59 = vpop.permute.xlu0 %267  ;;  %v270_v60 = vpop.permute.xlu1 %269 }
  0xd2   :  { %v278_v61 = vsel %vm275_vm3, %v268_v59, %v270_v60 }
  0xd3   :  { %265 = vst [vmem:[#allocation2 + $0x20] sm:$0x33] %v2893_v56  ;;  %266 = vst [vmem:[#allocation2 + $0x28] sm:$0x33] %v2894_v57  ;;  %v297_v6 = vmul.f32 %v3583_v2, %v278_v61 }
  0xd5   :  { %v272_v62 = vpop.permute.xlu0 %271  ;;  %v274_v63 = vpop.permute.xlu1 %273 }
  0xd6   :  { %v277_v0 = vsel %vm275_vm3, %v270_v60, %v272_v62  ;;  %v276_v1 = vsel %vm275_vm3, %v272_v62, %v274_v63  ;;  %v279_v4 = vsel %vm275_vm3, %v274_v63, %v268_v59 }
  0xd7   :  { %v298_v9 = vmul.f32 %v3586_v3, %v277_v0  ;;  %v296_v10 = vmul.f32 %v3589_v7, %v279_v4  ;;  %v299_v11 = vmul.f32 %v3592_v8, %v276_v1  ;;  %v3671_v1 = vsub.s32 6, %v3413_v15 }
  0xd9   :  { %v2895_v12 = vpack.c.bf16 %v297_v6, %v296_v10  ;;  %v2896_v13 = vpack.c.bf16 %v299_v11, %v298_v9  ;;  %v705_v14 = vpop.permute.xlu0 %704  ;;  %v707_v17 = vpop.permute.xlu1 %706 }
  0xda   :  { %v714_v26 = vsel %vm344_vm4, %v705_v14, %v707_v17 }
  0xdb   :  { %316 = vst [vmem:[#allocation2 + $0x30] sm:$0x33] %v2895_v12  ;;  %317 = vst [vmem:[#allocation2 + $0x38] sm:$0x33] %v2896_v13  ;;  %v716_v39 = vmul.f32 %v714_v26, %v3636_v18  ;;  %v3684_v26 = vrot.slane %v3440_v22, %v3671_v1 }
  0xdd   :  { %v709_v29 = vpop.permute.xlu0 %708  ;;  %v711_v32 = vpop.permute.xlu1 %710  ;;  %4373 = vst [vmem:[#allocation17_spill] sm:$0xff] %v3684_v26 }
  0xde   :  { %v713_v33 = vsel %vm344_vm4, %v707_v17, %v709_v29  ;;  %v712_v35 = vsel %vm344_vm4, %v709_v29, %v711_v32  ;;  %v715_v38 = vsel %vm344_vm4, %v711_v32, %v705_v14  ;;  %v3680_v17 = vrot.slane %v3429_v20, %v3671_v1 }
  0xdf   :  { %v717_v40 = vmul.f32 %v713_v33, %v3640_v19  ;;  %v718_v41 = vmul.f32 %v712_v35, %v3644_v24  ;;  %v719_v42 = vmul.f32 %v715_v38, %v3648_v25  ;;  %v3688_v29 = vrot.slane %v3445_v23, %v3671_v1 }
  0xe0   :  { %4372 = vst [vmem:[#allocation16_spill] sm:$0xff] %v3680_v17  ;;  %v3692_v32 = vrot.slane %v3434_v21, %v3671_v1 }
  0xe1   :  { %v2917_v43 = vpack.c.bf16 %v717_v40, %v716_v39  ;;  %v2918_v44 = vpack.c.bf16 %v719_v42, %v718_v41  ;;  %v337_v50 = vpop.permute.xlu0 %336  ;;  %v339_v51 = vpop.permute.xlu1 %338  ;;  %4374 = vst [vmem:[#allocation18_spill] sm:$0xff] %v3688_v29  ;;  %v3703_v42 = vsub.s32 7, %v3413_v15 }
  0xe2   :  { %v2999_v52 = vld [vmem:[#allocation2 + $0x24] ss:$16 sps:$4 sm:$0xff]   ;;  %v3001_v55 = vld [vmem:[#allocation2 + $0x2c] ss:$16 sps:$4 sm:$0xff]   ;;  %v3003_v56 = vld [vmem:[#allocation2 + $0x20] ss:$16 sps:$4 sm:$0xff]   ;;  %v347_v57 = vsel %vm344_vm4, %v337_v50, %v339_v51 }
  0xe3   :  { %v734_v53 = vrot.slane %v2917_v43, 6  ;;  %v735_v54 = vrot.slane %v2918_v44, 6  ;;  %982 = vmatprep.subr.bf16.mxu0 %v2999_v52  ;;  %v3004_v59 = vld [vmem:[#allocation2 + $0x28] ss:$16 sps:$4 sm:$0xff]   ;;  %1023 = vmatprep.subr.bf16.mxu1 %v3001_v55  ;;  %v365_v4 = vmul.f32 %v3636_v18, %v347_v57  ;;  %4375 = vst [vmem:[#allocation19_spill] sm:$0xff] %v3692_v32  ;;  %v3716_v57 = vrot.slane %v3440_v22, %v3703_v42 }
  0xe4   :  { %983 = vmatpush1.bf16.msra.mxu0 %v3003_v56  ;;  %1024 = vmatpush1.bf16.msra.mxu1 %v3004_v59  ;;  %v3712_v56 = vrot.slane %v3429_v20, %v3703_v42 }
  0xe5   :  { %738 = vst [vmem:[#allocation2 + $0x50] sm:$0xcc] %v734_v53  ;;  %739 = vst [vmem:[#allocation2 + $0x58] sm:$0xcc] %v735_v54  ;;  %v341_v60 = vpop.permute.xlu0 %340  ;;  %v343_v61 = vpop.permute.xlu1 %342 }
  0xe6   :  { %v346_v62 = vsel %vm344_vm4, %v339_v51, %v341_v60  ;;  %v345_v63 = vsel %vm344_vm4, %v341_v60, %v343_v61  ;;  %v348_v0 = vsel %vm344_vm4, %v343_v61, %v337_v50  ;;  %4376 = vst [vmem:[#allocation20_spill] sm:$0xff] %v3712_v56  ;;  %4377 = vst [vmem:[#allocation21_spill] sm:$0xff] %v3716_v57 }
  0xe7   :  { %v366_v6 = vmul.f32 %v3640_v19, %v346_v62  ;;  %v367_v9 = vmul.f32 %v3644_v24, %v345_v63  ;;  %v368_v10 = vmul.f32 %v3648_v25, %v348_v0  ;;  %v3720_v62 = vrot.slane %v3445_v23, %v3703_v42 }
  0xe8   :  { %v3724_v63 = vrot.slane %v3434_v21, %v3703_v42 }
  0xe9   :  { %v2899_v11 = vpack.c.bf16 %v366_v6, %v365_v4  ;;  %v2900_v12 = vpack.c.bf16 %v368_v10, %v367_v9  ;;  %v741_v13 = vpop.permute.xlu0 %740  ;;  %v743_v14 = vpop.permute.xlu1 %742  ;;  %4378 = vst [vmem:[#allocation22_spill] sm:$0xff] %v3720_v62 }
  0xea   :  { %v750_v33 = vsel %vm395_vm5, %v741_v13, %v743_v14  ;;  %4379 = vst [vmem:[#allocation23_spill] sm:$0xff] %v3724_v63 }
  0xeb   :  { %385 = vst [vmem:[#allocation2 + $0x50] sm:$0x33] %v2899_v11  ;;  %386 = vst [vmem:[#allocation2 + $0x58] sm:$0x33] %v2900_v12  ;;  %v752_v43 = vmul.f32 %v750_v33, %v3680_v17 }
  0xed   :  { %v745_v35 = vpop.permute.xlu0 %744  ;;  %v747_v38 = vpop.permute.xlu1 %746 }
  0xee   :  { %v749_v39 = vsel %vm395_vm5, %v743_v14, %v745_v35  ;;  %v748_v40 = vsel %vm395_vm5, %v745_v35, %v747_v38  ;;  %v751_v41 = vsel %vm395_vm5, %v747_v38, %v741_v13 }
  0xef   :  { %v753_v44 = vmul.f32 %v749_v39, %v3684_v26  ;;  %v754_v50 = vmul.f32 %v748_v40, %v3688_v29  ;;  %v755_v51 = vmul.f32 %v751_v41, %v3692_v32 }
  0xf1   :  { %v2919_v52 = vpack.c.bf16 %v753_v44, %v752_v43  ;;  %v2920_v53 = vpack.c.bf16 %v755_v51, %v754_v50  ;;  %v777_v54 = vpop.permute.xlu0 %776  ;;  %v779_v55 = vpop.permute.xlu1 %778 }
  0xf2   :  { %v3005_v59 = vld [vmem:[#allocation2 + $0x44] ss:$16 sps:$4 sm:$0xff]   ;;  %v3007_v0 = vld [vmem:[#allocation2 + $0x4c] ss:$16 sps:$4 sm:$0xff]   ;;  %v3009_v4 = vld [vmem:[#allocation2 + $0x40] ss:$16 sps:$4 sm:$0xff]   ;;  %v786_v20 = vsel %vm446_vm6, %v777_v54, %v779_v55 }
  0xf3   :  { %v770_v60 = vrot.slane %v2919_v52, 6  ;;  %v771_v61 = vrot.slane %v2920_v53, 6  ;;  %984 = vmatprep.subr.bf16.mxu0 %v3005_v59  ;;  %v3010_v6 = vld [vmem:[#allocation2 + $0x48] ss:$16 sps:$4 sm:$0xff]   ;;  %1025 = vmatprep.subr.bf16.mxu1 %v3007_v0  ;;  %v788_v11 = vmul.f32 %v786_v20, %v3712_v56 }
  0xf4   :  { %985 = vmatpush1.bf16.msra.mxu0 %v3009_v4  ;;  %1026 = vmatpush1.bf16.msra.mxu1 %v3010_v6 }
  0xf5   :  { %774 = vst [vmem:[#allocation2 + $0x60] sm:$0xcc] %v770_v60  ;;  %775 = vst [vmem:[#allocation2 + $0x68] sm:$0xcc] %v771_v61  ;;  %v781_v22 = vpop.permute.xlu0 %780  ;;  %v783_v9 = vpop.permute.xlu1 %782 }
  0xf6   :  { %v785_v23 = vsel %vm446_vm6, %v779_v55, %v781_v22  ;;  %v784_v21 = vsel %vm446_vm6, %v781_v22, %v783_v9  ;;  %v787_v10 = vsel %vm446_vm6, %v783_v9, %v777_v54 }
  0xf7   :  { %v789_v12 = vmul.f32 %v785_v23, %v3716_v57  ;;  %v790_v13 = vmul.f32 %v784_v21, %v3720_v62  ;;  %v791_v14 = vmul.f32 %v787_v10, %v3724_v63 }
  0xf9   :  { %v2921_v33 = vpack.c.bf16 %v789_v12, %v788_v11  ;;  %v2922_v35 = vpack.c.bf16 %v791_v14, %v790_v13  ;;  %v388_v38 = vpop.permute.xlu0 %387  ;;  %v390_v39 = vpop.permute.xlu1 %389 }
  0xfa   :  { %v398_v43 = vsel %vm395_vm5, %v388_v38, %v390_v39 }
  0xfb   :  { %v806_v40 = vrot.slane %v2921_v33, 6  ;;  %v807_v41 = vrot.slane %v2922_v35, 6  ;;  %v416_v54 = vmul.f32 %v3680_v17, %v398_v43  ;;  %v3773_v43 = vld [vmem:[%s4346_s2 + $0x28] ss:$0 sm:$0xff] }
  0xfd   :  { %810 = vst [vmem:[#allocation2 + $0x70] sm:$0xcc] %v806_v40  ;;  %811 = vst [vmem:[#allocation2 + $0x78] sm:$0xcc] %v807_v41  ;;  %v392_v44 = vpop.permute.xlu0 %391  ;;  %v394_v50 = vpop.permute.xlu1 %393  ;;  %v3766_v40 = vld [vmem:[%s4346_s2 + $0x20] ss:$0 sm:$0xff] }
  0xfe   :  { %v397_v51 = vsel %vm395_vm5, %v390_v39, %v392_v44  ;;  %v396_v52 = vsel %vm395_vm5, %v392_v44, %v394_v50  ;;  %v399_v53 = vsel %vm395_vm5, %v394_v50, %v388_v38  ;;  %v3778_v44 = vld [vmem:[%s4346_s2 + $0x30] ss:$0 sm:$0xff]  ;;  %v3783_v50 = vld [vmem:[%s4346_s2 + $0x38] ss:$0 sm:$0xff] }
  0xff   :  { %v417_v55 = vmul.f32 %v3684_v26, %v397_v51  ;;  %v418_v59 = vmul.f32 %v3688_v29, %v396_v52  ;;  %v419_v60 = vmul.f32 %v3692_v32, %v399_v53 }
 0x101   :  { %v2901_v61 = vpack.c.bf16 %v417_v55, %v416_v54  ;;  %v2902_v0 = vpack.c.bf16 %v419_v60, %v418_v59  ;;  %v439_v4 = vpop.permute.xlu0 %438  ;;  %v441_v20 = vpop.permute.xlu1 %440 }
 0x102   :  { %v449_v6 = vsel %vm446_vm6, %v439_v4, %v441_v20 }
 0x103   :  { %436 = vst [vmem:[#allocation2 + $0x60] sm:$0x33] %v2901_v61  ;;  %437 = vst [vmem:[#allocation2 + $0x68] sm:$0x33] %v2902_v0  ;;  %v467_v11 = vmul.f32 %v3712_v56, %v449_v6 }
 0x105   :  { %v443_v22 = vpop.permute.xlu0 %442  ;;  %v445_v9 = vpop.permute.xlu1 %444 }
 0x106   :  { %v448_v23 = vsel %vm446_vm6, %v441_v20, %v443_v22  ;;  %v447_v21 = vsel %vm446_vm6, %v443_v22, %v445_v9  ;;  %v450_v10 = vsel %vm446_vm6, %v445_v9, %v439_v4 }
 0x107   :  { %v468_v12 = vmul.f32 %v3716_v57, %v448_v23  ;;  %v469_v13 = vmul.f32 %v3720_v62, %v447_v21  ;;  %v470_v14 = vmul.f32 %v3724_v63, %v450_v10 }
 0x109   :  { %v2903_v33 = vpack.c.bf16 %v468_v12, %v467_v11  ;;  %v2904_v35 = vpack.c.bf16 %v470_v14, %v469_v13  ;;  %v813_v38 = vpop.permute.xlu0 %812  ;;  %v815_v39 = vpop.permute.xlu1 %814 }
 0x10a   :  { %v822_v41 = vsel %vm497_vm7, %v813_v38, %v815_v39 }
 0x10b   :  { %487 = vst [vmem:[#allocation2 + $0x70] sm:$0x33] %v2903_v33  ;;  %488 = vst [vmem:[#allocation2 + $0x78] sm:$0x33] %v2904_v35  ;;  %v824_v59 = vmul.f32 %v3766_v40, %v822_v41 }
 0x10d   :  { %v817_v51 = vpop.permute.xlu0 %816  ;;  %v819_v52 = vpop.permute.xlu1 %818 }
 0x10e   :  { %v821_v53 = vsel %vm497_vm7, %v815_v39, %v817_v51  ;;  %v820_v54 = vsel %vm497_vm7, %v817_v51, %v819_v52  ;;  %v823_v55 = vsel %vm497_vm7, %v819_v52, %v813_v38 }
 0x10f   :  { %v825_v60 = vmul.f32 %v3773_v43, %v821_v53  ;;  %v826_v61 = vmul.f32 %v3778_v44, %v820_v54  ;;  %v827_v0 = vmul.f32 %v3783_v50, %v823_v55 }
 0x111   :  { %v2923_v4 = vpack.c.bf16 %v825_v60, %v824_v59  ;;  %v2924_v20 = vpack.c.bf16 %v827_v0, %v826_v61  ;;  %v490_v6 = vpop.permute.xlu0 %489  ;;  %v492_v22 = vpop.permute.xlu1 %491 }
 0x112   :  { %v3011_v9 = vld [vmem:[#allocation2 + $0x64] ss:$16 sps:$4 sm:$0xff]   ;;  %v3013_v10 = vld [vmem:[#allocation2 + $0x6c] ss:$16 sps:$4 sm:$0xff]   ;;  %v3015_v11 = vld [vmem:[#allocation2 + $0x60] ss:$16 sps:$4 sm:$0xff]   ;;  %v500_v12 = vsel %vm497_vm7, %v490_v6, %v492_v22 }
 0x113   :  { %v842_v23 = vrot.slane %v2923_v4, 6  ;;  %v843_v21 = vrot.slane %v2924_v20, 6  ;;  %986 = vmatprep.subr.bf16.mxu0 %v3011_v9  ;;  %v3016_v13 = vld [vmem:[#allocation2 + $0x68] ss:$16 sps:$4 sm:$0xff]   ;;  %1027 = vmatprep.subr.bf16.mxu1 %v3013_v10  ;;  %v518_v41 = vmul.f32 %v3766_v40, %v500_v12  ;;  %v848_v9 = vld [vmem:[%s4347_s3] sm:$0xf] }
 0x114   :  { %987 = vmatpush1.bf16.msra.mxu0 %v3015_v11  ;;  %1028 = vmatpush1.bf16.msra.mxu1 %v3016_v13 }
 0x115   :  { %846 = vst [vmem:[#allocation2 + $0x80] sm:$0xcc] %v842_v23  ;;  %847 = vst [vmem:[#allocation2 + $0x88] sm:$0xcc] %v843_v21  ;;  %v494_v14 = vpop.permute.xlu0 %493  ;;  %v496_v33 = vpop.permute.xlu1 %495 }
 0x116   :  { %v499_v35 = vsel %vm497_vm7, %v492_v22, %v494_v14  ;;  %v498_v38 = vsel %vm497_vm7, %v494_v14, %v496_v33  ;;  %v501_v39 = vsel %vm497_vm7, %v496_v33, %v490_v6 }
 0x117   :  { %v519_v51 = vmul.f32 %v3773_v43, %v499_v35  ;;  %v520_v52 = vmul.f32 %v3778_v44, %v498_v38  ;;  %v521_v53 = vmul.f32 %v3783_v50, %v501_v39 }
 0x119   :  { %v2905_v54 = vpack.c.bf16 %v519_v51, %v518_v41  ;;  %v2906_v55 = vpack.c.bf16 %v521_v53, %v520_v52 }
 0x11b   :  { %538 = vst [vmem:[#allocation2 + $0x80] sm:$0x33] %v2905_v54  ;;  %539 = vst [vmem:[#allocation2 + $0x88] sm:$0x33] %v2906_v55 }
 0x122   :  { %v865_v59 = vld [vmem:[#allocation2 + $0x80] sm:$0xff]  ;;  %v866_v60 = vld [vmem:[#allocation2 + $0x88] sm:$0xff] }
 0x123   :  { %v2779_v61 = vcombine.high %v865_v59, %v865_v59  ;;  %v2781_v0 = vcombine.high %v866_v60, %v866_v60  ;;  %v2778_v4 = vcombine.low %v865_v59, %v865_v59  ;;  %v2780_v20 = vcombine.low %v866_v60, %v866_v60 }
 0x125   :  { %2782 = vmatprep.subr.msk.bf16.mxu0 %vm967_vm8, %v2779_v61  ;;  %2784 = vmatprep.subr.msk.bf16.mxu1 %vm967_vm8, %v2781_v0  ;;  %v969_v6 = vsel %vm967_vm8, %v2778_v4, 0  ;;  %v975_v22 = vsel %vm967_vm8, %v2780_v20, 0 }
 0x126   :  { %989 = vmatpush1.bf16.msra.mxu0 %v969_v6  ;;  %1030 = vmatpush1.bf16.msra.mxu1 %v975_v22  ;;  %v871_v23 = vpop.permute.xlu0 %870 }
 0x129   :  { %2783 = vmatmul.mubr.msk.bf16.vlgmr.msra.gmra.mrb[0].mxu0 %vm963_vm9, %v848_v9  ;;  %2785 = vmatmul.mubr.msk.bf16.vlgmr.msra.gmra.mrb[0].mxu1 %vm963_vm9, %v848_v9  ;;  %v1692_v9 = vld [vmem:[%s4350_s6] sm:$0xf] }
 0x12a   :  { %1555 = vmatprep.mubr.bf16.mxu0 %v4356_v58  ;;  %1636 = vmatprep.mubr.bf16.mxu1 %v4356_v58 }
 0x1fc   :  { %v1014_v21 = vpop.f32.mrb[0].mxu0  ;;  %v1055_v10 = vpop.f32.mrb[0].mxu1 }
 0x1fd   :  { %v1015_v11 = vadd.f32 %v1014_v21, %v871_v23  ;;  %v1056_v12 = vadd.f32 %v1055_v10, %v871_v23  ;;  %v1016_v13 = vpop.f32.mrb[1].mxu0  ;;  %v1057_v14 = vpop.f32.mrb[1].mxu1  ;;  %v1784_v21 = vld [vmem:[%s4350_s6 + $0x20] sm:$0xf]  ;;  %v1712_v10 = vld [vmem:[%s4350_s6 + $0x8] sm:$0xf] }
 0x1fe   :  { %v1017_v33 = vadd.f32 %v1016_v13, %v871_v23  ;;  %v1058_v35 = vadd.f32 %v1057_v14, %v871_v23  ;;  %v1018_v38 = vpop.f32.mrb[2].mxu0  ;;  %v1059_v39 = vpop.f32.mrb[2].mxu1  ;;  %v1736_v23 = vld [vmem:[%s4350_s6 + $0x10] sm:$0xf]  ;;  %v1880_v13 = vld [vmem:[%s4350_s6 + $0x40] sm:$0xf] }
 0x1ff   :  { %v1062_v41 = vmax.f32 %v1015_v11, 0.0  ;;  %v1064_v51 = vmax.f32 %v1056_v12, 0.0  ;;  %v1019_v52 = vpop.f32.mrb[3].mxu0  ;;  %v1060_v53 = vpop.f32.mrb[3].mxu1  ;;  %v1808_v11 = vld [vmem:[%s4350_s6 + $0x28] sm:$0xf] }
 0x200   :  { %v1063_v54 = vmax.f32 %v1017_v33, 0.0  ;;  %v1065_v55 = vmax.f32 %v1058_v35, 0.0  ;;  %v1760_v12 = vld [vmem:[%s4350_s6 + $0x18] sm:$0xf]  ;;  %v1832_v14 = vld [vmem:[%s4350_s6 + $0x30] sm:$0xf] }
 0x201   :  { %1070 = vrot.lane.b32.xlu0 %v1064_v51, %s3163_s23  ;;  %1066 = vrot.lane.b32.xlu1 %v1062_v41, %s3163_s23  ;;  %v2041_v59 = vsel %vm1922_vm10, %v1064_v51, 0.0  ;;  %v1923_v60 = vsel %vm1922_vm10, %v1062_v41, 0.0  ;;  %v1856_v33 = vld [vmem:[%s4350_s6 + $0x38] sm:$0xf] }
 0x202   :  { %v2042_v61 = vsel %vm1922_vm10, %v1065_v55, 0.0  ;;  %v1924_v0 = vsel %vm1922_vm10, %v1063_v54, 0.0  ;;  %v2933_v4 = vpack.c.bf16 %v1063_v54, %v1062_v41  ;;  %v2934_v20 = vpack.c.bf16 %v1065_v55, %v1064_v51 }
 0x203   :  { %v2043_v6 = vadd.f32 %v2042_v61, %v2041_v59  ;;  %v1925_v22 = vadd.f32 %v1924_v0, %v1923_v60 }
 0x204   :  { %1218 = vst [vmem:[#allocation3 + $0x40] sm:$0x33] %v2933_v4  ;;  %1219 = vst [vmem:[#allocation3 + $0x48] sm:$0x33] %v2934_v20 }
 0x205   :  { %1100 = vrot.lane.b32.xlu0 %v1062_v41, %s3164_s1  ;;  %1068 = vrot.lane.b32.xlu1 %v1063_v54, %s3163_s23 }
 0x209   :  { %1104 = vrot.lane.b32.xlu0 %v1064_v51, %s3164_s1  ;;  %1072 = vrot.lane.b32.xlu1 %v1065_v55, %s3163_s23 }
 0x20d   :  { %1134 = vrot.lane.b32.xlu0 %v1062_v41, %s3165_s24  ;;  %1102 = vrot.lane.b32.xlu1 %v1063_v54, %s3164_s1 }
 0x211   :  { %1138 = vrot.lane.b32.xlu0 %v1064_v51, %s3165_s24  ;;  %1106 = vrot.lane.b32.xlu1 %v1065_v55, %s3164_s1 }
 0x215   :  { %1168 = vrot.lane.b32.xlu0 %v1062_v41, %s3166_s25  ;;  %1136 = vrot.lane.b32.xlu1 %v1063_v54, %s3165_s24 }
 0x219   :  { %1172 = vrot.lane.b32.xlu0 %v1064_v51, %s3166_s25  ;;  %1140 = vrot.lane.b32.xlu1 %v1065_v55, %s3165_s24 }
 0x21d   :  { %1220 = vrot.lane.b32.xlu0 %v1062_v41, %s3167_s26  ;;  %1170 = vrot.lane.b32.xlu1 %v1063_v54, %s3166_s25 }
 0x221   :  { %1224 = vrot.lane.b32.xlu0 %v1064_v51, %s3167_s26  ;;  %1174 = vrot.lane.b32.xlu1 %v1065_v55, %s3166_s25 }
 0x225   :  { %1254 = vrot.lane.b32.xlu0 %v1062_v41, %s3168_s29  ;;  %1222 = vrot.lane.b32.xlu1 %v1063_v54, %s3167_s26 }
 0x229   :  { %1258 = vrot.lane.b32.xlu0 %v1064_v51, %s3168_s29  ;;  %1226 = vrot.lane.b32.xlu1 %v1065_v55, %s3167_s26 }
 0x22d   :  { %1288 = vrot.lane.b32.xlu0 %v1062_v41, %s3169_s30  ;;  %1256 = vrot.lane.b32.xlu1 %v1063_v54, %s3168_s29 }
 0x231   :  { %1292 = vrot.lane.b32.xlu0 %v1064_v51, %s3169_s30  ;;  %1260 = vrot.lane.b32.xlu1 %v1065_v55, %s3168_s29 }
 0x235   :  { %1322 = vrot.lane.b32.xlu0 %v1062_v41, %s3170_s12  ;;  %1290 = vrot.lane.b32.xlu1 %v1063_v54, %s3169_s30 }
 0x239   :  { %1326 = vrot.lane.b32.xlu0 %v1064_v51, %s3170_s12  ;;  %1294 = vrot.lane.b32.xlu1 %v1065_v55, %s3169_s30 }
 0x23d   :  { %1695 = vperm.xlu0 %2981, %v1692_v9   ;;  %1324 = vrot.lane.b32.xlu1 %v1063_v54, %s3170_s12 }
 0x241   :  { %1739 = vperm.xlu0 %2981, %v1736_v23   ;;  %1328 = vrot.lane.b32.xlu1 %v1065_v55, %s3170_s12 }
 0x245   :  { %1787 = vperm.xlu0 %2981, %v1784_v21   ;;  %1715 = vperm.xlu1 %2982, %v1712_v10  }
 0x249   :  { %1811 = vperm.xlu0 %2981, %v1808_v11   ;;  %1763 = vperm.xlu1 %2982, %v1760_v12   ;;  %v3896_v12 = vld [vmem:[%s4354_s10] sm:$0xf] }
 0x24d   :  { %1883 = vperm.xlu0 %2981, %v1880_v13   ;;  %1835 = vperm.xlu1 %2982, %v1832_v14  }
 0x251   :  { %1859 = vperm.xlu1 %2982, %v1856_v33  }
 0x26c   :  { %2044 = vadd.xlane.f32.xlu0 %v2043_v6 }
 0x273   :  { %v1071_v35 = vpop.permute.xlu0 %1070  ;;  %v1067_v38 = vpop.permute.xlu1 %1066 }
 0x275   :  { %1926 = vadd.xlane.f32.xlu1 %v1925_v22 }
 0x277   :  { %v1101_v39 = vpop.permute.xlu0 %1100  ;;  %v1069_v41 = vpop.permute.xlu1 %1068 }
 0x278   :  { %v1075_v51 = vsel %vm122_vm0, %v1069_v41, %v1071_v35  ;;  %v1076_v52 = vsel %vm122_vm0, %v1067_v38, %v1069_v41 }
 0x279   :  { %v1079_v60 = vmul.f32 %v1076_v52, %v3462_v30  ;;  %v1080_v61 = vmul.f32 %v1075_v51, %v3465_v31 }
 0x27b   :  { %v1105_v53 = vpop.permute.xlu0 %1104  ;;  %v1073_v54 = vpop.permute.xlu1 %1072 }
 0x27c   :  { %v1074_v55 = vsel %vm122_vm0, %v1071_v35, %v1073_v54  ;;  %v1077_v59 = vsel %vm122_vm0, %v1073_v54, %v1067_v38 }
 0x27d   :  { %v1078_v0 = vmul.f32 %v1077_v59, %v3449_v27  ;;  %v1081_v4 = vmul.f32 %v1074_v55, %v3452_v28 }
 0x27f   :  { %v2925_v20 = vpack.c.bf16 %v1079_v60, %v1078_v0  ;;  %v2926_v6 = vpack.c.bf16 %v1081_v4, %v1080_v61  ;;  %v1135_v22 = vpop.permute.xlu0 %1134  ;;  %v1103_v9 = vpop.permute.xlu1 %1102 }
 0x280   :  { %v1109_v23 = vsel %vm173_vm1, %v1103_v9, %v1105_v53  ;;  %v1110_v21 = vsel %vm173_vm1, %v1101_v39, %v1103_v9 }
 0x281   :  { %1098 = vst [vmem:[#allocation3] sm:$0x33] %v2925_v20  ;;  %1099 = vst [vmem:[#allocation3 + $0x8] sm:$0x33] %v2926_v6  ;;  %v1113_v33 = vmul.f32 %v1110_v21, %v3470_v34  ;;  %v1114_v35 = vmul.f32 %v1109_v23, %v3476_v37 }
 0x283   :  { %v1139_v10 = vpop.permute.xlu0 %1138  ;;  %v1107_v11 = vpop.permute.xlu1 %1106 }
 0x284   :  { %v1108_v13 = vsel %vm173_vm1, %v1105_v53, %v1107_v11  ;;  %v1111_v14 = vsel %vm173_vm1, %v1107_v11, %v1101_v39 }
 0x285   :  { %v1112_v38 = vmul.f32 %v1111_v14, %v3473_v36  ;;  %v1115_v41 = vmul.f32 %v1108_v13, %v3493_v45 }
 0x286   :  { %1900 = vperm.xlu1 %2982, %v3896_v12  }
 0x287   :  { %v2927_v51 = vpack.c.bf16 %v1113_v33, %v1112_v38  ;;  %v2928_v52 = vpack.c.bf16 %v1115_v41, %v1114_v35  ;;  %v1169_v54 = vpop.permute.xlu0 %1168  ;;  %v1137_v55 = vpop.permute.xlu1 %1136  ;;  %v3172_v33 = vmov 1  }
 0x288   :  { %v1143_v53 = vsel %vm224_vm2, %v1137_v55, %v1139_v10  ;;  %v1144_v39 = vsel %vm224_vm2, %v1135_v22, %v1137_v55  ;;  %2983 = vset.pattern.permute.xlu0 %v3172_v33 }
 0x289   :  { %1132 = vst [vmem:[#allocation3 + $0x10] sm:$0x33] %v2927_v51  ;;  %1133 = vst [vmem:[#allocation3 + $0x18] sm:$0x33] %v2928_v52  ;;  %v1147_v4 = vmul.f32 %v1144_v39, %v3557_v46  ;;  %v1148_v20 = vmul.f32 %v1143_v53, %v3560_v47  ;;  %1908 = vperm.xlu0 %2983, %v3896_v12  }
 0x28b   :  { %v1173_v59 = vpop.permute.xlu0 %1172  ;;  %v1141_v60 = vpop.permute.xlu1 %1140 }
 0x28c   :  { %v1142_v61 = vsel %vm224_vm2, %v1139_v10, %v1141_v60  ;;  %v1145_v0 = vsel %vm224_vm2, %v1141_v60, %v1135_v22 }
 0x28d   :  { %v1146_v6 = vmul.f32 %v1145_v0, %v3563_v48  ;;  %v1149_v9 = vmul.f32 %v1142_v61, %v3566_v49 }
 0x28f   :  { %v2929_v23 = vpack.c.bf16 %v1147_v4, %v1146_v6  ;;  %v2930_v21 = vpack.c.bf16 %v1149_v9, %v1148_v20  ;;  %v1221_v11 = vpop.permute.xlu0 %1220  ;;  %v1171_v13 = vpop.permute.xlu1 %1170 }
 0x290   :  { %v3021_v14 = vld [vmem:[#allocation3 + $0x4] ss:$16 sps:$4 sm:$0xff]   ;;  %v3023_v10 = vld [vmem:[#allocation3 + $0xc] ss:$16 sps:$4 sm:$0xff]   ;;  %v3025_v35 = vld [vmem:[#allocation3] ss:$16 sps:$4 sm:$0xff]   ;;  %v1177_v38 = vsel %vm275_vm3, %v1171_v13, %v1173_v59  ;;  %v1178_v41 = vsel %vm275_vm3, %v1169_v54, %v1171_v13 }
 0x291   :  { %1166 = vst [vmem:[#allocation3 + $0x20] sm:$0x33] %v2929_v23  ;;  %1167 = vst [vmem:[#allocation3 + $0x28] sm:$0x33] %v2930_v21  ;;  %v3026_v22 = vld [vmem:[#allocation3 + $0x8] ss:$16 sps:$4 sm:$0xff]   ;;  %1523 = vmatprep.subr.bf16.mxu0 %v3021_v14  ;;  %1604 = vmatprep.subr.bf16.mxu1 %v3023_v10  ;;  %v1181_v39 = vmul.f32 %v1178_v41, %v3583_v2  ;;  %v1182_v60 = vmul.f32 %v1177_v38, %v3586_v3 }
 0x292   :  { %1524 = vmatpush1.bf16.msra.mxu0 %v3025_v35  ;;  %1605 = vmatpush1.bf16.msra.mxu1 %v3026_v22 }
 0x293   :  { %v1225_v51 = vpop.permute.xlu0 %1224  ;;  %v1175_v52 = vpop.permute.xlu1 %1174 }
 0x294   :  { %v1176_v55 = vsel %vm275_vm3, %v1173_v59, %v1175_v52  ;;  %v1179_v53 = vsel %vm275_vm3, %v1175_v52, %v1169_v54 }
 0x295   :  { %v1180_v61 = vmul.f32 %v1179_v53, %v3589_v7  ;;  %v1183_v0 = vmul.f32 %v1176_v55, %v3592_v8 }
 0x297   :  { %v2931_v4 = vpack.c.bf16 %v1181_v39, %v1180_v61  ;;  %v2932_v20 = vpack.c.bf16 %v1183_v0, %v1182_v60  ;;  %v1255_v6 = vpop.permute.xlu0 %1254  ;;  %v1223_v9 = vpop.permute.xlu1 %1222 }
 0x298   :  { %v1229_v23 = vsel %vm344_vm4, %v1223_v9, %v1225_v51  ;;  %v1230_v59 = vsel %vm344_vm4, %v1221_v11, %v1223_v9 }
 0x299   :  { %1200 = vst [vmem:[#allocation3 + $0x30] sm:$0x33] %v2931_v4  ;;  %1201 = vst [vmem:[#allocation3 + $0x38] sm:$0x33] %v2932_v20  ;;  %v1232_v54 = vmul.f32 %v1230_v59, %v3636_v18  ;;  %v1233_v21 = vmul.f32 %v1229_v23, %v3640_v19 }
 0x29b   :  { %v2935_v13 = vpack.c.bf16 %v1233_v21, %v1232_v54  ;;  %v1259_v14 = vpop.permute.xlu0 %1258  ;;  %v1227_v33 = vpop.permute.xlu1 %1226 }
 0x29c   :  { %v1228_v10 = vsel %vm344_vm4, %v1225_v51, %v1227_v33  ;;  %v1231_v35 = vsel %vm344_vm4, %v1227_v33, %v1221_v11 }
 0x29d   :  { %1252 = vst [vmem:[#allocation3 + $0x50] sm:$0x33] %v2935_v13  ;;  %v1234_v22 = vmul.f32 %v1228_v10, %v3644_v24  ;;  %v1235_v38 = vmul.f32 %v1231_v35, %v3648_v25 }
 0x29f   :  { %v2936_v41 = vpack.c.bf16 %v1235_v38, %v1234_v22  ;;  %v1289_v52 = vpop.permute.xlu0 %1288  ;;  %v1257_v55 = vpop.permute.xlu1 %1256 }
 0x2a0   :  { %v1263_v53 = vsel %vm395_vm5, %v1257_v55, %v1259_v14  ;;  %v1264_v39 = vsel %vm395_vm5, %v1255_v6, %v1257_v55  ;;  %v3027_v60 = vld [vmem:[#allocation3 + $0x24] ss:$16 sps:$4 sm:$0xff]   ;;  %v3029_v61 = vld [vmem:[#allocation3 + $0x2c] ss:$16 sps:$4 sm:$0xff]   ;;  %v3031_v0 = vld [vmem:[#allocation3 + $0x20] ss:$16 sps:$4 sm:$0xff]  }
 0x2a1   :  { %1253 = vst [vmem:[#allocation3 + $0x58] sm:$0x33] %v2936_v41  ;;  %v1266_v51 = vmul.f32 %v1264_v39, %v3680_v17  ;;  %v1267_v11 = vmul.f32 %v1263_v53, %v3684_v26  ;;  %v3032_v4 = vld [vmem:[#allocation3 + $0x28] ss:$16 sps:$4 sm:$0xff]   ;;  %1525 = vmatprep.subr.bf16.mxu0 %v3027_v60  ;;  %1606 = vmatprep.subr.bf16.mxu1 %v3029_v61 }
 0x2a2   :  { %1526 = vmatpush1.bf16.msra.mxu0 %v3031_v0  ;;  %1607 = vmatpush1.bf16.msra.mxu1 %v3032_v4 }
 0x2a3   :  { %v2937_v20 = vpack.c.bf16 %v1267_v11, %v1266_v51  ;;  %v1293_v9 = vpop.permute.xlu0 %1292  ;;  %v1261_v23 = vpop.permute.xlu1 %1260 }
 0x2a4   :  { %v1262_v59 = vsel %vm395_vm5, %v1259_v14, %v1261_v23  ;;  %v1265_v54 = vsel %vm395_vm5, %v1261_v23, %v1255_v6  ;;  %v3033_v21 = vld [vmem:[#allocation3 + $0x44] ss:$16 sps:$4 sm:$0xff]   ;;  %v3035_v13 = vld [vmem:[#allocation3 + $0x40] ss:$16 sps:$4 sm:$0xff]  }
 0x2a5   :  { %1286 = vst [vmem:[#allocation3 + $0x60] sm:$0x33] %v2937_v20  ;;  %v1268_v33 = vmul.f32 %v1262_v59, %v3688_v29  ;;  %v1269_v10 = vmul.f32 %v1265_v54, %v3692_v32  ;;  %1527 = vmatprep.subr.bf16.mxu0 %v3033_v21 }
 0x2a6   :  { %1528 = vmatpush1.bf16.msra.mxu0 %v3035_v13 }
 0x2a7   :  { %v2938_v35 = vpack.c.bf16 %v1269_v10, %v1268_v33  ;;  %v1291_v22 = vpop.permute.xlu1 %1290  ;;  %v1323_v55 = vpop.permute.xlu0 %1322 }
 0x2a8   :  { %v1297_v38 = vsel %vm446_vm6, %v1291_v22, %v1293_v9  ;;  %v1298_v14 = vsel %vm446_vm6, %v1289_v52, %v1291_v22  ;;  %v3036_v41 = vld [vmem:[#allocation3 + $0x4c] ss:$16 sps:$4 sm:$0xff]   ;;  %v3038_v6 = vld [vmem:[#allocation3 + $0x48] ss:$16 sps:$4 sm:$0xff]  }
 0x2a9   :  { %1287 = vst [vmem:[#allocation3 + $0x68] sm:$0x33] %v2938_v35  ;;  %v1300_v53 = vmul.f32 %v1298_v14, %v3712_v56  ;;  %v1301_v39 = vmul.f32 %v1297_v38, %v3716_v57  ;;  %1608 = vmatprep.subr.bf16.mxu1 %v3036_v41  ;;  %v4053_v56 = vld [vmem:[#allocation2 + $0x60] sm:$0x33] }
 0x2aa   :  { %1609 = vmatpush1.bf16.msra.mxu1 %v3038_v6 }
 0x2ab   :  { %v2939_v60 = vpack.c.bf16 %v1301_v39, %v1300_v53  ;;  %v1295_v51 = vpop.permute.xlu1 %1294  ;;  %v1327_v20 = vpop.permute.xlu0 %1326 }
 0x2ac   :  { %v1296_v11 = vsel %vm446_vm6, %v1293_v9, %v1295_v51  ;;  %v1299_v61 = vsel %vm446_vm6, %v1295_v51, %v1289_v52 }
 0x2ad   :  { %1320 = vst [vmem:[#allocation3 + $0x70] sm:$0x33] %v2939_v60  ;;  %v1302_v0 = vmul.f32 %v1296_v11, %v3720_v62  ;;  %v1303_v4 = vmul.f32 %v1299_v61, %v3724_v63 }
 0x2af   :  { %v2940_v23 = vpack.c.bf16 %v1303_v4, %v1302_v0  ;;  %v1325_v59 = vpop.permute.xlu1 %1324  ;;  %v3050_v0 = vld [vmem:[%s4349_s5 + $0x8] sm:$0xff]   ;;  %v3051_v4 = vld [vmem:[%s4349_s5 + $0x10] sm:$0xff]  }
 0x2b0   :  { %v1331_v54 = vsel %vm497_vm7, %v1325_v59, %v1327_v20  ;;  %v1332_v21 = vsel %vm497_vm7, %v1323_v55, %v1325_v59  ;;  %v3173_v59 = vmov 0.0  }
 0x2b1   :  { %1321 = vst [vmem:[#allocation3 + $0x78] sm:$0x33] %v2940_v23  ;;  %v1334_v9 = vmul.f32 %v3766_v40, %v1332_v21  ;;  %v1335_v13 = vmul.f32 %v3773_v43, %v1331_v54  ;;  %v3053_v23 = vld [vmem:[%s4349_s5 + $0x20] ss:$0 sps:$4 sm:$0xff]   ;;  %v3174_v54 = vmov 2   ;;  %v3175_v21 = vmov 3  }
 0x2b2   :  { %2984 = vset.pattern.permute.xlu1 %v3174_v54 }
 0x2b3   :  { %v2941_v52 = vpack.c.bf16 %v1335_v13, %v1334_v9  ;;  %v1329_v33 = vpop.permute.xlu1 %1328  ;;  %2158 = vperm.xlu1 %2984, %v3896_v12  }
 0x2b4   :  { %v1330_v10 = vsel %vm497_vm7, %v1327_v20, %v1329_v33  ;;  %v1333_v35 = vsel %vm497_vm7, %v1329_v33, %v1323_v55  ;;  %v3039_v22 = vld [vmem:[#allocation3 + $0x64] ss:$16 sps:$4 sm:$0xff]   ;;  %v3041_v38 = vld [vmem:[#allocation3 + $0x60] ss:$16 sps:$4 sm:$0xff]   ;;  %v3052_v20 = vld [vmem:[%s4349_s5 + $0x18] sm:$0xff]  }
 0x2b5   :  { %1354 = vst [vmem:[#allocation3 + $0x80] sm:$0x33] %v2941_v52  ;;  %v1336_v14 = vmul.f32 %v3778_v44, %v1330_v10  ;;  %v1337_v41 = vmul.f32 %v3783_v50, %v1333_v35  ;;  %1529 = vmatprep.subr.bf16.mxu0 %v3039_v22  ;;  %v3047_v44 = vld [vmem:[%s4349_s5] sm:$0xff]   ;;  %v4019_v33 = vld [vmem:[#allocation2 + $0x8] sm:$0x33] }
 0x2b6   :  { %1530 = vmatpush1.bf16.msra.mxu0 %v3041_v38  ;;  %v1686_v52 = vld [vmem:[#allocation2] sm:$0x33]  ;;  %v1706_v35 = vld [vmem:[#allocation2 + $0x10] sm:$0x33]  ;;  %v4023_v22 = vld [vmem:[#allocation2 + $0x18] sm:$0x33] }
 0x2b7   :  { %v2942_v6 = vpack.c.bf16 %v1337_v41, %v1336_v14  ;;  %2985 = vset.pattern.permute.xlu1 %v3175_v21  ;;  %v4025_v38 = vld [vmem:[#allocation2 + $0x20] sm:$0x33] }
 0x2b8   :  { %v3042_v40 = vld [vmem:[#allocation3 + $0x6c] ss:$16 sps:$4 sm:$0xff]   ;;  %v3044_v43 = vld [vmem:[#allocation3 + $0x68] ss:$16 sps:$4 sm:$0xff]   ;;  %2166 = vperm.xlu1 %2985, %v3896_v12   ;;  %v1733_v54 = vunpack.c.h.bf16 %v4025_v38 }
 0x2b9   :  { %1355 = vst [vmem:[#allocation3 + $0x88] sm:$0x33] %v2942_v6  ;;  %1610 = vmatprep.subr.bf16.mxu1 %v3042_v40  ;;  %v1688_v6 = vunpack.c.l.bf16 %v1686_v52  ;;  %v1689_v40 = vunpack.c.h.bf16 %v1686_v52  ;;  %v4030_v12 = vld [vmem:[#allocation2 + $0x28] sm:$0x33] }
 0x2ba   :  { %1611 = vmatpush1.bf16.msra.mxu1 %v3044_v43  ;;  %v1690_v43 = vunpack.c.l.bf16 %v4019_v33 }
 0x2bc   :  { %v1381_v53 = vld [vmem:[#allocation3 + $0x80] sm:$0xff]  ;;  %v1696_v9 = vpop.permute.xlu0 %1695 }
 0x2bd   :  { %v2826_v39 = vcombine.high %v1381_v53, %v1381_v53  ;;  %v2825_v60 = vcombine.low %v1381_v53, %v1381_v53 }
 0x2bf   :  { %2829 = vmatprep.subr.msk.bf16.mxu0 %vm967_vm8, %v2826_v39  ;;  %v1512_v55 = vsel %vm967_vm8, %v2825_v60, 0  ;;  %v1708_v60 = vunpack.c.l.bf16 %v1706_v35 }
 0x2c0   :  { %1532 = vmatpush1.bf16.msra.mxu0 %v1512_v55  ;;  %v1382_v50 = vld [vmem:[#allocation3 + $0x88] sm:$0xff]  ;;  %v4021_v10 = vpop.permute.xlu0 %1739  ;;  %v1709_v55 = vunpack.c.h.bf16 %v1706_v35 }
 0x2c1   :  { %v2828_v51 = vcombine.high %v1382_v50, %v1382_v50  ;;  %v2827_v11 = vcombine.low %v1382_v50, %v1382_v50  ;;  %v4033_v50 = vld [vmem:[#allocation2 + $0x30] sm:$0x33] }
 0x2c3   :  { %2830 = vmatmul.mubr.msk.bf16.vlgmr.msra.gmra.mrb[4].mxu0 %vm963_vm9, %v3047_v44  ;;  %2835 = vmatprep.subr.msk.bf16.mxu1 %vm967_vm8, %v2828_v51  ;;  %v1518_v61 = vsel %vm967_vm8, %v2827_v11, 0  ;;  %v4035_v51 = vld [vmem:[#allocation2 + $0x38] sm:$0x33] }
 0x2c4   :  { %1613 = vmatpush1.bf16.msra.mxu1 %v1518_v61  ;;  %1565 = vmatprep.mubr.bf16.mxu0 %v4356_v58  ;;  %v1716_v13 = vpop.permute.xlu1 %1715  ;;  %v4045_v35 = vpop.permute.xlu0 %1787 }
 0x2c7   :  { %2836 = vmatmul.mubr.msk.bf16.vlgmr.msra.gmra.mrb[4].mxu1 %vm963_vm9, %v3047_v44  ;;  %v1691_v44 = vunpack.c.h.bf16 %v4019_v33  ;;  %v4043_v33 = vld [vmem:[#allocation2 + $0x50] sm:$0x33] }
 0x2c8   :  { %1646 = vmatprep.mubr.bf16.mxu1 %v4356_v58  ;;  %v4027_v14 = vpop.permute.xlu1 %1763 }
 0x2cb   :  { %2831 = vmatmul.mubr.msk.bf16.gmra.mrb[8].mxu0 %vm963_vm9, %v3050_v0 }
 0x2cc   :  { %1575 = vmatprep.mubr.bf16.mxu0 %v4356_v58  ;;  %v4055_v32 = vpop.permute.xlu1 %1835 }
 0x2cf   :  { %2837 = vmatmul.mubr.msk.bf16.gmra.mrb[8].mxu1 %vm963_vm9, %v3050_v0  ;;  %v1710_v0 = vunpack.c.l.bf16 %v4023_v22 }
 0x2d0   :  { %1656 = vmatprep.mubr.bf16.mxu1 %v4356_v58 }
 0x2d3   :  { %2832 = vmatmul.mubr.msk.bf16.gmra.mrb[12].mxu0 %vm963_vm9, %v3051_v4 }
 0x2d4   :  { %1585 = vmatprep.mubr.bf16.mxu0 %v4356_v58 }
 0x2d7   :  { %2838 = vmatmul.mubr.msk.bf16.gmra.mrb[12].mxu1 %vm963_vm9, %v3051_v4  ;;  %v1711_v4 = vunpack.c.h.bf16 %v4023_v22  ;;  %v1757_v22 = vunpack.c.h.bf16 %v4033_v50 }
 0x2d8   :  { %1666 = vmatprep.mubr.bf16.mxu1 %v4356_v58 }
 0x2db   :  { %2833 = vmatmul.mubr.msk.bf16.gmra.mrb[16].mxu0 %vm963_vm9, %v3052_v20 }
 0x2dc   :  { %1595 = vmatprep.mubr.bf16.mxu0 %v4356_v58 }
 0x2df   :  { %2839 = vmatmul.mubr.msk.bf16.gmra.mrb[16].mxu1 %vm963_vm9, %v3052_v20  ;;  %v1732_v20 = vunpack.c.l.bf16 %v4025_v38 }
 0x2e0   :  { %1676 = vmatprep.mubr.bf16.mxu1 %v4356_v58  ;;  %v1756_v58 = vunpack.c.l.bf16 %v4033_v50  ;;  %v1804_v50 = vunpack.c.l.bf16 %v4043_v33 }
 0x2e3   :  { %2834 = vmatmul.mubr.msk.bf16.gmra.mrb[20].mxu0 %vm963_vm9, %v3053_v23 }
 0x2e4   :  { %2034 = vmatprep.mubr.f32.mxu0 %v3173_v59 }
 0x2e7   :  { %2840 = vmatmul.mubr.msk.bf16.gmra.mrb[20].mxu1 %vm963_vm9, %v3053_v23 }
 0x2e8   :  { %2150 = vmatprep.mubr.f32.mxu1 %v3173_v59 }
 0x396   :  { %v1557_v41 = vpop.f32.mrb[4].mxu0 }
 0x397   :  { %v1698_v53 = vadd.f32 %v1696_v9, %v1557_v41  ;;  %v1559_v39 = vpop.f32.mrb[5].mxu0 }
 0x398   :  { %v1699_v11 = vadd.f32 %v1696_v9, %v1559_v39  ;;  %v1561_v61 = vpop.f32.mrb[6].mxu0 }
 0x399   :  { %v1718_v23 = vadd.f32 %v1716_v13, %v1561_v61  ;;  %v1563_v59 = vpop.f32.mrb[7].mxu0  ;;  %v4050_v61 = vld [vmem:[#allocation2 + $0x58] sm:$0x33]  ;;  %v1702_v62 = vmul.f32 %v1698_v53, %v1688_v6 }
 0x39a   :  { %v1719_v41 = vadd.f32 %v1716_v13, %v1563_v59  ;;  %v1638_v39 = vpop.f32.mrb[4].mxu1  ;;  %v1703_v59 = vmul.f32 %v1699_v11, %v1689_v40 }
 0x39b   :  { %v1722_v38 = vmul.f32 %v1718_v23, %v1708_v60  ;;  %v1700_v57 = vadd.f32 %v1696_v9, %v1638_v39  ;;  %v1640_v21 = vpop.f32.mrb[5].mxu1  ;;  %v4060_v60 = vld [vmem:[#allocation2 + $0x68] sm:$0x33] }
 0x39c   :  { %v1723_v29 = vmul.f32 %v1719_v41, %v1709_v55  ;;  %v1701_v26 = vadd.f32 %v1696_v9, %v1640_v21  ;;  %v1642_v17 = vpop.f32.mrb[6].mxu1  ;;  %v4066_v21 = vld [vmem:[#allocation2 + $0x70] sm:$0x33]  ;;  %v4068_v41 = vpop.permute.xlu0 %1811 }
 0x39d   :  { %v1726_v25 = vadd.f32 %v1722_v38, %v1702_v62  ;;  %v1720_v63 = vadd.f32 %v1716_v13, %v1642_v17  ;;  %v1644_v24 = vpop.f32.mrb[7].mxu1  ;;  %v1704_v9 = vmul.f32 %v1700_v57, %v1690_v43 }
 0x39e   :  { %v1727_v23 = vadd.f32 %v1723_v29, %v1703_v59  ;;  %v1721_v39 = vadd.f32 %v1716_v13, %v1644_v24  ;;  %v1567_v52 = vpop.f32.mrb[8].mxu0  ;;  %v1705_v38 = vmul.f32 %v1701_v26, %v1691_v44 }
 0x39f   :  { %v1724_v55 = vmul.f32 %v1720_v63, %v1710_v0  ;;  %v1742_v11 = vadd.f32 %v4021_v10, %v1567_v52  ;;  %v1569_v62 = vpop.f32.mrb[9].mxu0  ;;  %v4074_v0 = vld [vmem:[#allocation2 + $0x78] sm:$0x33]  ;;  %v4076_v52 = vpop.permute.xlu1 %1859 }
 0x3a0   :  { %v1725_v53 = vmul.f32 %v1721_v39, %v1711_v4  ;;  %v1743_v24 = vadd.f32 %v4021_v10, %v1569_v62  ;;  %v1571_v29 = vpop.f32.mrb[10].mxu0  ;;  %v1778_v4 = vld [vmem:[#allocation2 + $0x40] sm:$0x33] }
 0x3a1   :  { %v1728_v59 = vadd.f32 %v1724_v55, %v1704_v9  ;;  %v1746_v40 = vmul.f32 %v1742_v11, %v1732_v20  ;;  %v1766_v57 = vadd.f32 %v4027_v14, %v1571_v29  ;;  %v1573_v63 = vpop.f32.mrb[11].mxu0 }
 0x3a2   :  { %v1729_v17 = vadd.f32 %v1725_v53, %v1705_v38  ;;  %v1747_v19 = vmul.f32 %v1743_v24, %v1733_v54  ;;  %v1767_v26 = vadd.f32 %v4027_v14, %v1573_v63  ;;  %v1648_v44 = vpop.f32.mrb[8].mxu1  ;;  %v4380_v38 = vunpack.c.l.bf16 %v4030_v12 }
 0x3a3   :  { %v1750_v62 = vadd.f32 %v1746_v40, %v1726_v25  ;;  %v1770_v9 = vmul.f32 %v1766_v57, %v1756_v58  ;;  %v1744_v20 = vadd.f32 %v4021_v10, %v1648_v44  ;;  %v1650_v55 = vpop.f32.mrb[9].mxu1  ;;  %v1780_v58 = vunpack.c.l.bf16 %v1778_v4  ;;  %v4087_v40 = vld [vmem:[#allocation2 + $0x80] sm:$0x33]  ;;  %v4089_v57 = vpop.permute.xlu0 %1883 }
 0x3a4   :  { %v1751_v29 = vadd.f32 %v1747_v19, %v1727_v23  ;;  %v1771_v43 = vmul.f32 %v1767_v26, %v1757_v22  ;;  %v1745_v13 = vadd.f32 %v4021_v10, %v1650_v55  ;;  %v1652_v6 = vpop.f32.mrb[10].mxu1  ;;  %v4381_v19 = vunpack.c.h.bf16 %v4030_v12  ;;  %v1927_v11 = vpop.xlane.xlu1 %1926 }
 0x3a5   :  { %v1774_v53 = vadd.f32 %v1770_v9, %v1750_v62  ;;  %v1748_v24 = vmul.f32 %v1744_v20, %v4380_v38  ;;  %v1768_v63 = vadd.f32 %v4027_v14, %v1652_v6  ;;  %v1654_v25 = vpop.f32.mrb[11].mxu1  ;;  %v1781_v26 = vunpack.c.h.bf16 %v1778_v4  ;;  %v1779_v62 = vld [vmem:[#allocation2 + $0x48] sm:$0x33] }
 0x3a6   :  { %v1775_v44 = vadd.f32 %v1771_v43, %v1751_v29  ;;  %v1749_v22 = vmul.f32 %v1745_v13, %v4381_v19  ;;  %v1769_v10 = vadd.f32 %v4027_v14, %v1654_v25  ;;  %v1577_v23 = vpop.f32.mrb[12].mxu0  ;;  %v4382_v20 = vunpack.c.l.bf16 %v4035_v51 }
 0x3a7   :  { %v1752_v9 = vadd.f32 %v1748_v24, %v1728_v59  ;;  %v1790_v6 = vadd.f32 %v4045_v35, %v1577_v23  ;;  %v1579_v38 = vpop.f32.mrb[13].mxu0  ;;  %v4383_v43 = vunpack.c.h.bf16 %v4035_v51  ;;  %v1876_v4 = vunpack.c.l.bf16 %v4087_v40  ;;  %v2045_v19 = vpop.xlane.xlu0 %2044 }
 0x3a8   :  { %v1772_v55 = vmul.f32 %v1768_v63, %v4382_v20  ;;  %v1753_v39 = vadd.f32 %v1749_v22, %v1729_v17  ;;  %v1791_v13 = vadd.f32 %v4045_v35, %v1579_v38  ;;  %v1581_v14 = vpop.f32.mrb[14].mxu0  ;;  %v1782_v25 = vunpack.c.l.bf16 %v1779_v62 }
 0x3a9   :  { %v1773_v12 = vmul.f32 %v1769_v10, %v4383_v43  ;;  %v1794_v59 = vmul.f32 %v1790_v6, %v1780_v58  ;;  %v1814_v24 = vadd.f32 %v4068_v41, %v1581_v14  ;;  %v1583_v63 = vpop.f32.mrb[15].mxu0  ;;  %v1783_v22 = vunpack.c.h.bf16 %v1779_v62 }
 0x3aa   :  { %v1776_v29 = vadd.f32 %v1772_v55, %v1752_v9  ;;  %v1795_v20 = vmul.f32 %v1791_v13, %v1781_v26  ;;  %v1815_v54 = vadd.f32 %v4068_v41, %v1583_v63  ;;  %v1658_v17 = vpop.f32.mrb[12].mxu1  ;;  %v4104_v51 = vmul.f32 0.00390625, %v1927_v11 }
 0x3ab   :  { %v1777_v23 = vadd.f32 %v1773_v12, %v1753_v39  ;;  %v1798_v10 = vadd.f32 %v1794_v59, %v1774_v53  ;;  %v1818_v38 = vmul.f32 %v1814_v24, %v1804_v50  ;;  %v1792_v9 = vadd.f32 %v4045_v35, %v1658_v17  ;;  %v1660_v58 = vpop.f32.mrb[13].mxu1 }
 0x3ac   :  { %v1932_v55 = vsub.s32 4, %v3413_v15  ;;  %v1799_v6 = vadd.f32 %v1795_v20, %v1775_v44  ;;  %v4384_v43 = vunpack.c.h.bf16 %v4043_v33  ;;  %v1793_v26 = vadd.f32 %v4045_v35, %v1660_v58  ;;  %v1662_v12 = vpop.f32.mrb[14].mxu1 }
 0x3ad   :  { %v4113_v13 = vmul.f32 0.00390625, %v2045_v19  ;;  %v1822_v11 = vadd.f32 %v1818_v38, %v1798_v10  ;;  %v1796_v62 = vmul.f32 %v1792_v9, %v1782_v25  ;;  %v1816_v53 = vadd.f32 %v4068_v41, %v1662_v12  ;;  %v1664_v14 = vpop.f32.mrb[15].mxu1 }
 0x3ae   :  { %v1819_v39 = vmul.f32 %v1815_v54, %v4384_v43  ;;  %v1797_v59 = vmul.f32 %v1793_v26, %v1783_v22  ;;  %v1817_v24 = vadd.f32 %v4068_v41, %v1664_v14  ;;  %v1587_v63 = vpop.f32.mrb[16].mxu0  ;;  %v1877_v15 = vunpack.c.h.bf16 %v4087_v40  ;;  %v1919_v26 = vld [vmem:[%s4351_s7] sm:$0xff] }
 0x3af   :  { %v1933_v33 = vrot.slane %v4104_v51, %v1932_v55  ;;  %v1800_v54 = vadd.f32 %v1796_v62, %v1776_v29  ;;  %v4385_v35 = vunpack.c.l.bf16 %v4050_v61  ;;  %v1838_v19 = vadd.f32 %v4055_v32, %v1587_v63  ;;  %v1589_v20 = vpop.f32.mrb[17].mxu0 }
 0x3b0   :  { %v1823_v50 = vadd.f32 %v1819_v39, %v1799_v6  ;;  %v1939_v25 = vrot.slane %v4104_v51, %v3627_v5  ;;  %v1801_v17 = vadd.f32 %v1797_v59, %v1777_v23  ;;  %v4386_v22 = vunpack.c.h.bf16 %v4050_v61  ;;  %v1591_v38 = vpop.f32.mrb[18].mxu0 }
 0x3b1   :  { %v1820_v44 = vmul.f32 %v1816_v53, %v4385_v35  ;;  %v1839_v41 = vadd.f32 %v4055_v32, %v1589_v20  ;;  %v2050_v9 = vrot.slane %v4113_v13, %v1932_v55  ;;  %v4387_v29 = vunpack.c.l.bf16 %v4053_v56  ;;  %v1593_v39 = vpop.f32.mrb[19].mxu0 }
 0x3b2   :  { %v1821_v10 = vmul.f32 %v1817_v24, %v4386_v22  ;;  %v1862_v43 = vadd.f32 %v4076_v52, %v1591_v38  ;;  %v2056_v61 = vrot.slane %v4113_v13, %v3627_v5  ;;  %v4388_v12 = vunpack.c.h.bf16 %v4053_v56  ;;  %v1668_v53 = vpop.f32.mrb[16].mxu1 }
 0x3b3   :  { %v1824_v58 = vadd.f32 %v1820_v44, %v1800_v54  ;;  %v1842_v6 = vmul.f32 %v1838_v19, %v4387_v29  ;;  %v1863_v55 = vadd.f32 %v4076_v52, %v1593_v39  ;;  %v1934_v14 = vmul.f32 %v1933_v33, %v1919_v26  ;;  %v1670_v35 = vpop.f32.mrb[17].mxu1  ;;  %v1921_v29 = vld [vmem:[%s4352_s8] sm:$0xf] }
 0x3b4   :  { %v1825_v23 = vadd.f32 %v1821_v10, %v1801_v17  ;;  %v1843_v62 = vmul.f32 %v1839_v41, %v4388_v12  ;;  %v4389_v24 = vunpack.c.l.bf16 %v4066_v21  ;;  %v1840_v54 = vadd.f32 %v4055_v32, %v1668_v53  ;;  %v1672_v56 = vpop.f32.mrb[18].mxu1 }
 0x3b5   :  { %v1846_v59 = vadd.f32 %v1842_v6, %v1822_v11  ;;  %v1940_v44 = vmul.f32 %v1939_v25, %v1919_v26  ;;  %v4390_v20 = vunpack.c.h.bf16 %v4066_v21  ;;  %v1841_v17 = vadd.f32 %v4055_v32, %v1670_v35  ;;  %v1674_v38 = vpop.f32.mrb[19].mxu1 }
 0x3b6   :  { %v1866_v63 = vmul.f32 %v1862_v43, %v4389_v24  ;;  %v1847_v19 = vadd.f32 %v1843_v62, %v1823_v50  ;;  %v2051_v22 = vmul.f32 %v2050_v9, %v1919_v26  ;;  %v4391_v41 = vunpack.c.l.bf16 %v4060_v60  ;;  %v1597_v43 = vpop.f32.mrb[20].mxu0  ;;  %v1875_v9 = vld [vmem:[#allocation2 + $0x88] sm:$0x33] }
 0x3b7   :  { %v1867_v5 = vmul.f32 %v1863_v55, %v4390_v20  ;;  %v1864_v11 = vadd.f32 %v4076_v52, %v1672_v56  ;;  %v2057_v25 = vmul.f32 %v2056_v61, %v1919_v26  ;;  %v4392_v21 = vunpack.c.h.bf16 %v4060_v60 }
 0x3b8   :  { %v1870_v10 = vadd.f32 %v1866_v63, %v1846_v59  ;;  %v1844_v33 = vmul.f32 %v1840_v54, %v4391_v41  ;;  %v1865_v32 = vadd.f32 %v4076_v52, %v1674_v38  ;;  %v1935_v39 = vadd.f32 %v1934_v14, %v1921_v29  ;;  %v1599_v59 = vpop.f32.mrb[21].mxu0 }
 0x3b9   :  { %v1871_v50 = vadd.f32 %v1867_v5, %v1847_v19  ;;  %v1845_v6 = vmul.f32 %v1841_v17, %v4392_v21  ;;  %v4393_v62 = vunpack.c.l.bf16 %v4074_v0  ;;  %v1886_v53 = vadd.f32 %v4089_v57, %v1597_v43  ;;  %v1601_v54 = vpop.f32.mrb[22].mxu0  ;;  %v1901_v17 = vpop.permute.xlu1 %1900 }
 0x3ba   :  { %v1848_v12 = vadd.f32 %v1844_v33, %v1824_v58  ;;  %v1942_v24 = vrot.slane %v1940_v44, 4  ;;  %v4394_v26 = vunpack.c.h.bf16 %v4074_v0  ;;  %v1887_v60 = vadd.f32 %v4089_v57, %v1599_v59  ;;  %v1602_v14 = vpop.f32.mrb[23].mxu0  ;;  %v1678_v5 = vpop.f32.mrb[20].mxu1 }
 0x3bb   :  { %v1868_v55 = vmul.f32 %v1864_v11, %v4393_v62  ;;  %v1849_v63 = vadd.f32 %v1845_v6, %v1825_v23  ;;  %v1890_v52 = vmul.f32 %v1886_v53, %v1876_v4  ;;  %v1878_v58 = vunpack.c.l.bf16 %v1875_v9  ;;  %v1680_v33 = vpop.f32.mrb[21].mxu1 }
 0x3bc   :  { %v1869_v61 = vmul.f32 %v1865_v32, %v4394_v26  ;;  %v1948_v19 = vrot.slane %v4104_v51, %v3671_v1  ;;  %v1954_v20 = vrot.slane %v4104_v51, %v3703_v42  ;;  %v1891_v23 = vmul.f32 %v1887_v60, %v1877_v15  ;;  %v1682_v6 = vpop.f32.mrb[22].mxu1  ;;  %v1909_v32 = vpop.permute.xlu0 %1908  ;;  %v1920_v51 = vld [vmem:[%s4351_s7 + $0x8] sm:$0xff] }
 0x3bd   :  { %v1872_v35 = vadd.f32 %v1868_v55, %v1848_v12  ;;  %v2052_v0 = vadd.f32 %v2051_v22, %v1921_v29  ;;  %v1894_v56 = vadd.f32 %v1890_v52, %v1870_v10  ;;  %v1888_v41 = vadd.f32 %v4089_v57, %v1678_v5  ;;  %v1683_v43 = vpop.f32.mrb[23].mxu1 }
 0x3be   :  { %v1873_v44 = vadd.f32 %v1869_v61, %v1849_v63  ;;  %v1879_v11 = vunpack.c.h.bf16 %v1875_v9  ;;  %v2059_v40 = vrot.slane %v2057_v25, 4  ;;  %v1944_v4 = vadd.f32 %v1942_v24, %v1935_v39 }
 0x3bf   :  { %v1895_v38 = vadd.f32 %v1891_v23, %v1871_v50  ;;  %v1889_v21 = vadd.f32 %v4089_v57, %v1680_v33  ;;  %v2065_v15 = vrot.slane %v4113_v13, %v3671_v1  ;;  %v2071_v22 = vrot.slane %v4113_v13, %v3703_v42  ;;  %v2159_v23 = vpop.permute.xlu1 %2158 }
 0x3c0   :  { %v1903_v10 = vmul.f32 %v1901_v17, %v1894_v56  ;;  %v1892_v29 = vmul.f32 %v1888_v41, %v1878_v58  ;;  %v1949_v25 = vmul.f32 %v1948_v19, %v1920_v51  ;;  %v1955_v9 = vmul.f32 %v1954_v20, %v1920_v51 }
 0x3c1   :  { %v1904_v50 = vmul.f32 %v1901_v17, %v1895_v38  ;;  %v1893_v39 = vmul.f32 %v1889_v21, %v1879_v11  ;;  %v2061_v62 = vadd.f32 %v2059_v40, %v2052_v0  ;;  %v2066_v24 = vmul.f32 %v2065_v15, %v1920_v51 }
 0x3c2   :  { %v1896_v57 = vadd.f32 %v1892_v29, %v1872_v35  ;;  %v1911_v12 = vadd.f32 %v1909_v32, %v1903_v10  ;;  %v1950_v55 = vadd.f32 %v1949_v25, %v1944_v4  ;;  %v2072_v26 = vmul.f32 %v2071_v22, %v1920_v51 }
 0x3c3   :  { %v1897_v53 = vadd.f32 %v1893_v39, %v1873_v44  ;;  %v1912_v59 = vadd.f32 %v1909_v32, %v1904_v50  ;;  %v1957_v1 = vrot.slane %v1955_v9, 4  ;;  %v2067_v54 = vadd.f32 %v2066_v24, %v2061_v62  ;;  %v2167_v0 = vpop.permute.xlu1 %2166  ;;  %v3082_v50 = vld [vmem:[%s4354_s10] sm:$0xf] }
 0x3c4   :  { %v1905_v63 = vmul.f32 %v1901_v17, %v1896_v57  ;;  %v1915_v13 = vmax.f32 %v1911_v12, 0.0  ;;  %v2074_v35 = vrot.slane %v2072_v26, 4  ;;  %v4395_v20 = vmov 0  }
 0x3c5   :  { %v1906_v61 = vmul.f32 %v1901_v17, %v1897_v53  ;;  %v1916_v60 = vmax.f32 %v1912_v59, 0.0  ;;  %v1959_v52 = vadd.f32 %v1957_v1, %v1950_v55  ;;  %v3176_v25 = vmov 4  }
 0x3c6   :  { %v1913_v42 = vadd.f32 %v1909_v32, %v1905_v63  ;;  %v2076_v44 = vadd.f32 %v2074_v35, %v2067_v54  ;;  %2986 = vset.pattern.permute.xlu0 %v3176_v25  ;;  %v3177_v9 = vmov 5  }
 0x3c7   :  { %v1914_v14 = vadd.f32 %v1909_v32, %v1906_v61  ;;  %2841 = vmatprep.subr.msk.mxu0 %vm967_vm8, %v1916_v60  ;;  %2987 = vset.pattern.permute.xlu1 %v3177_v9 }
 0x3c8   :  { %2842 = vmatpush1.msk.msra.mxu0 %vm967_vm8, %v1915_v13  ;;  %v1917_v19 = vmax.f32 %v1913_v42, 0.0 }
 0x3c9   :  { %v1918_v58 = vmax.f32 %v1914_v14, 0.0  ;;  %2843 = vmatmul.mubr.msk.f32.vlgmr.msra.gmra.mrb[24].mxu0 %vm1960_vm11, %v1959_v52 }
 0x3ca   :  { %2623 = vmatprep.mubr.bf16.mxu0 %v4395_v20 }
 0x3cb   :  { %2844 = vmatprep.subr.msk.mxu1 %vm967_vm8, %v1918_v58 }
 0x3cc   :  { %2845 = vmatpush1.msk.msra.mxu1 %vm967_vm8, %v1917_v19 }
 0x3cd   :  { %2846 = vmatmul.mubr.msk.f32.vlgmr.msra.gmra.mrb[24].mxu1 %vm1960_vm11, %v2076_v44 }
 0x3ce   :  { %2664 = vmatprep.mubr.bf16.mxu1 %v4395_v20 }
 0x49c   :  { %v2036_v5 = vpop.f32.mrb[24].mxu0 }
 0x49d   :  { %v2161_v17 = vmul.f32 %v2159_v23, %v2036_v5  ;;  %v2038_v56 = vpop.f32.mrb[25].mxu0 }
 0x49e   :  { %v2162_v41 = vmul.f32 %v2159_v23, %v2038_v56 }
 0x49f   :  { %v2169_v33 = vadd.f32 %v2167_v0, %v2161_v17 }
 0x4a0   :  { %v2170_v11 = vadd.f32 %v2167_v0, %v2162_v41  ;;  %v2152_v40 = vpop.f32.mrb[24].mxu1 }
 0x4a1   :  { %v2173_v4 = vmax.f32 %v2169_v33, 0.0  ;;  %v2163_v38 = vmul.f32 %v2159_v23, %v2152_v40  ;;  %v2154_v21 = vpop.f32.mrb[25].mxu1 }
 0x4a2   :  { %v2174_v6 = vmax.f32 %v2170_v11, 0.0  ;;  %v2164_v32 = vmul.f32 %v2159_v23, %v2154_v21 }
 0x4a3   :  { %v2171_v51 = vadd.f32 %v2167_v0, %v2163_v38  ;;  %2177 = vrot.lane.b32.xlu0 %v2173_v4, %s3163_s23 }
 0x4a4   :  { %v2172_v15 = vadd.f32 %v2167_v0, %v2164_v32  ;;  %2179 = vrot.lane.b32.xlu1 %v2174_v6, %s3163_s23  ;;  %v2951_v22 = vpack.c.bf16 %v2174_v6, %v2173_v4 }
 0x4a5   :  { %v2175_v10 = vmax.f32 %v2171_v51, 0.0 }
 0x4a6   :  { %v2176_v29 = vmax.f32 %v2172_v15, 0.0  ;;  %2329 = vst [vmem:[#allocation3 + $0x40] sm:$0x33] %v2951_v22 }
 0x4a7   :  { %2181 = vrot.lane.b32.xlu0 %v2175_v10, %s3163_s23 }
 0x4a8   :  { %v2952_v43 = vpack.c.bf16 %v2176_v29, %v2175_v10  ;;  %2183 = vrot.lane.b32.xlu1 %v2176_v29, %s3163_s23 }
 0x4aa   :  { %2330 = vst [vmem:[#allocation3 + $0x48] sm:$0x33] %v2952_v43 }
 0x4ab   :  { %2211 = vrot.lane.b32.xlu0 %v2173_v4, %s3164_s1 }
 0x4ac   :  { %2213 = vrot.lane.b32.xlu1 %v2174_v6, %s3164_s1 }
 0x4af   :  { %2215 = vrot.lane.b32.xlu0 %v2175_v10, %s3164_s1 }
 0x4b0   :  { %2217 = vrot.lane.b32.xlu1 %v2176_v29, %s3164_s1 }
 0x4b3   :  { %2245 = vrot.lane.b32.xlu0 %v2173_v4, %s3165_s24 }
 0x4b4   :  { %2247 = vrot.lane.b32.xlu1 %v2174_v6, %s3165_s24 }
 0x4b7   :  { %2249 = vrot.lane.b32.xlu0 %v2175_v10, %s3165_s24 }
 0x4b8   :  { %2251 = vrot.lane.b32.xlu1 %v2176_v29, %s3165_s24 }
 0x4bb   :  { %2279 = vrot.lane.b32.xlu0 %v2173_v4, %s3166_s25 }
 0x4bc   :  { %2281 = vrot.lane.b32.xlu1 %v2174_v6, %s3166_s25 }
 0x4bf   :  { %2283 = vrot.lane.b32.xlu0 %v2175_v10, %s3166_s25 }
 0x4c0   :  { %2285 = vrot.lane.b32.xlu1 %v2176_v29, %s3166_s25 }
 0x4c3   :  { %2331 = vrot.lane.b32.xlu0 %v2173_v4, %s3167_s26 }
 0x4c4   :  { %2333 = vrot.lane.b32.xlu1 %v2174_v6, %s3167_s26 }
 0x4c7   :  { %2335 = vrot.lane.b32.xlu0 %v2175_v10, %s3167_s26 }
 0x4c8   :  { %2337 = vrot.lane.b32.xlu1 %v2176_v29, %s3167_s26 }
 0x4cb   :  { %2365 = vrot.lane.b32.xlu0 %v2173_v4, %s3168_s29 }
 0x4cc   :  { %2367 = vrot.lane.b32.xlu1 %v2174_v6, %s3168_s29 }
 0x4cf   :  { %2369 = vrot.lane.b32.xlu0 %v2175_v10, %s3168_s29 }
 0x4d0   :  { %2371 = vrot.lane.b32.xlu1 %v2176_v29, %s3168_s29 }
 0x4d3   :  { %2399 = vrot.lane.b32.xlu0 %v2173_v4, %s3169_s30 }
 0x4d4   :  { %2401 = vrot.lane.b32.xlu1 %v2174_v6, %s3169_s30 }
 0x4d7   :  { %2403 = vrot.lane.b32.xlu0 %v2175_v10, %s3169_s30 }
 0x4d8   :  { %2405 = vrot.lane.b32.xlu1 %v2176_v29, %s3169_s30 }
 0x4db   :  { %2433 = vrot.lane.b32.xlu0 %v2173_v4, %s3170_s12 }
 0x4dc   :  { %2435 = vrot.lane.b32.xlu1 %v2174_v6, %s3170_s12 }
 0x4df   :  { %2437 = vrot.lane.b32.xlu0 %v2175_v10, %s3170_s12 }
 0x4e0   :  { %2439 = vrot.lane.b32.xlu1 %v2176_v29, %s3170_s12 }
 0x4e3   :  { %2674 = vperm.xlu0 %2986, %v3082_v50  }
 0x4e4   :  { %2682 = vperm.xlu1 %2987, %v3082_v50  }
 0x4e7   :  { %2988 = vset.pattern.permute.xlu0 %v3177_v9 }
 0x515   :  { %v2178_v39 = vpop.permute.xlu0 %2177 }
 0x516   :  { %v2180_v57 = vpop.permute.xlu1 %2179 }
 0x517   :  { %v2187_v12 = vsel %vm122_vm0, %v2178_v39, %v2180_v57 }
 0x518   :  { %v2190_v26 = vmul.f32 %v2187_v12, %v3462_v30 }
 0x519   :  { %v2182_v62 = vpop.permute.xlu0 %2181 }
 0x51a   :  { %v2186_v55 = vsel %vm122_vm0, %v2180_v57, %v2182_v62  ;;  %v2184_v53 = vpop.permute.xlu1 %2183 }
 0x51b   :  { %v2191_v59 = vmul.f32 %v2186_v55, %v3465_v31  ;;  %v2185_v24 = vsel %vm122_vm0, %v2182_v62, %v2184_v53  ;;  %v2188_v63 = vsel %vm122_vm0, %v2184_v53, %v2178_v39 }
 0x51c   :  { %v2189_v1 = vmul.f32 %v2188_v63, %v3449_v27  ;;  %v2192_v61 = vmul.f32 %v2185_v24, %v3452_v28  ;;  %v4396_v24 = vld [vmem:[#allocation13_spill] sm:$0xff] }
 0x51d   :  { %v2212_v60 = vpop.permute.xlu0 %2211 }
 0x51e   :  { %v2943_v42 = vpack.c.bf16 %v2190_v26, %v2189_v1  ;;  %v2944_v13 = vpack.c.bf16 %v2192_v61, %v2191_v59  ;;  %v2214_v54 = vpop.permute.xlu1 %2213  ;;  %v4397_v26 = vld [vmem:[#allocation14_spill] sm:$0xff]  ;;  %v4398_v61 = vld [vmem:[#allocation15_spill] sm:$0xff] }
 0x51f   :  { %v2221_v31 = vsel %vm173_vm1, %v2212_v60, %v2214_v54 }
 0x520   :  { %2209 = vst [vmem:[#allocation3] sm:$0x33] %v2943_v42  ;;  %2210 = vst [vmem:[#allocation3 + $0x8] sm:$0x33] %v2944_v13  ;;  %v2224_v58 = vmul.f32 %v2221_v31, %v3470_v34 }
 0x521   :  { %v2216_v52 = vpop.permute.xlu0 %2215 }
 0x522   :  { %v2220_v14 = vsel %vm173_vm1, %v2214_v54, %v2216_v52  ;;  %v2218_v35 = vpop.permute.xlu1 %2217 }
 0x523   :  { %v2225_v30 = vmul.f32 %v2220_v14, %v3476_v37  ;;  %v2219_v27 = vsel %vm173_vm1, %v2216_v52, %v2218_v35  ;;  %v2222_v28 = vsel %vm173_vm1, %v2218_v35, %v2212_v60 }
 0x524   :  { %v2223_v19 = vmul.f32 %v2222_v28, %v3473_v36  ;;  %v2226_v20 = vmul.f32 %v2219_v27, %v3493_v45 }
 0x525   :  { %v2246_v44 = vpop.permute.xlu0 %2245 }
 0x526   :  { %v2945_v23 = vpack.c.bf16 %v2224_v58, %v2223_v19  ;;  %v2946_v5 = vpack.c.bf16 %v2226_v20, %v2225_v30  ;;  %v2248_v0 = vpop.permute.xlu1 %2247  ;;  %v4399_v19 = vld [vmem:[#allocation16_spill] sm:$0xff] }
 0x527   :  { %v2255_v37 = vsel %vm224_vm2, %v2246_v44, %v2248_v0 }
 0x528   :  { %2243 = vst [vmem:[#allocation3 + $0x10] sm:$0x33] %v2945_v23  ;;  %2244 = vst [vmem:[#allocation3 + $0x18] sm:$0x33] %v2946_v5  ;;  %v2258_v33 = vmul.f32 %v2255_v37, %v3557_v46  ;;  %v4401_v37 = vld [vmem:[#allocation18_spill] sm:$0xff] }
 0x529   :  { %v2250_v17 = vpop.permute.xlu0 %2249 }
 0x52a   :  { %v2254_v56 = vsel %vm224_vm2, %v2248_v0, %v2250_v17  ;;  %v2252_v41 = vpop.permute.xlu1 %2251 }
 0x52b   :  { %v2259_v34 = vmul.f32 %v2254_v56, %v3560_v47  ;;  %v2253_v36 = vsel %vm224_vm2, %v2250_v17, %v2252_v41  ;;  %v2256_v45 = vsel %vm224_vm2, %v2252_v41, %v2246_v44  ;;  %v4400_v44 = vld [vmem:[#allocation17_spill] sm:$0xff]  ;;  %v4402_v56 = vld [vmem:[#allocation19_spill] sm:$0xff] }
 0x52c   :  { %v2257_v11 = vmul.f32 %v2256_v45, %v3563_v48  ;;  %v2260_v40 = vmul.f32 %v2253_v36, %v3566_v49 }
 0x52d   :  { %v2280_v4 = vpop.permute.xlu0 %2279 }
 0x52e   :  { %v2947_v38 = vpack.c.bf16 %v2258_v33, %v2257_v11  ;;  %v2948_v21 = vpack.c.bf16 %v2260_v40, %v2259_v34  ;;  %v2282_v6 = vpop.permute.xlu1 %2281 }
 0x52f   :  { %v3054_v32 = vld [vmem:[#allocation3] ss:$16 sps:$4 sm:$0xff]   ;;  %v3056_v51 = vld [vmem:[#allocation3 + $0x4] ss:$16 sps:$4 sm:$0xff]   ;;  %v3057_v47 = vld [vmem:[#allocation3 + $0x8] ss:$16 sps:$4 sm:$0xff]   ;;  %v2289_v22 = vsel %vm275_vm3, %v2280_v4, %v2282_v6 }
 0x530   :  { %2277 = vst [vmem:[#allocation3 + $0x20] sm:$0x33] %v2947_v38  ;;  %2278 = vst [vmem:[#allocation3 + $0x28] sm:$0x33] %v2948_v21  ;;  %v3059_v15 = vld [vmem:[#allocation3 + $0xc] ss:$16 sps:$4 sm:$0xff]   ;;  %2591 = vmatprep.subr.bf16.mxu0 %v3056_v51  ;;  %v2292_v25 = vmul.f32 %v2289_v22, %v3583_v2 }
 0x531   :  { %v2284_v10 = vpop.permute.xlu0 %2283  ;;  %2632 = vmatprep.subr.bf16.mxu1 %v3059_v15  ;;  %2592 = vmatpush1.bf16.msra.mxu0 %v3054_v32  ;;  %v4404_v22 = vld [vmem:[#allocation21_spill] sm:$0xff] }
 0x532   :  { %v2288_v46 = vsel %vm275_vm3, %v2282_v6, %v2284_v10  ;;  %v2286_v48 = vpop.permute.xlu1 %2285  ;;  %2633 = vmatpush1.bf16.msra.mxu1 %v3057_v47  ;;  %v4403_v47 = vld [vmem:[#allocation20_spill] sm:$0xff] }
 0x533   :  { %v2293_v49 = vmul.f32 %v2288_v46, %v3586_v3  ;;  %v2287_v29 = vsel %vm275_vm3, %v2284_v10, %v2286_v48  ;;  %v2290_v43 = vsel %vm275_vm3, %v2286_v48, %v2280_v4 }
 0x534   :  { %v2291_v9 = vmul.f32 %v2290_v43, %v3589_v7  ;;  %v2294_v50 = vmul.f32 %v2287_v29, %v3592_v8  ;;  %v4406_v43 = vld [vmem:[#allocation23_spill] sm:$0xff] }
 0x535   :  { %v2332_v39 = vpop.permute.xlu0 %2331 }
 0x536   :  { %v2949_v57 = vpack.c.bf16 %v2292_v25, %v2291_v9  ;;  %v2950_v12 = vpack.c.bf16 %v2294_v50, %v2293_v49  ;;  %v2334_v62 = vpop.permute.xlu1 %2333  ;;  %v4405_v49 = vld [vmem:[#allocation22_spill] sm:$0xff] }
 0x537   :  { %v2341_v3 = vsel %vm344_vm4, %v2332_v39, %v2334_v62 }
 0x538   :  { %2311 = vst [vmem:[#allocation3 + $0x30] sm:$0x33] %v2949_v57  ;;  %2312 = vst [vmem:[#allocation3 + $0x38] sm:$0x33] %v2950_v12  ;;  %v2343_v2 = vmul.f32 %v2341_v3, %v3636_v18 }
 0x539   :  { %v2336_v55 = vpop.permute.xlu0 %2335 }
 0x53a   :  { %v2340_v53 = vsel %vm344_vm4, %v2334_v62, %v2336_v55  ;;  %v2338_v59 = vpop.permute.xlu1 %2337 }
 0x53b   :  { %v2344_v7 = vmul.f32 %v2340_v53, %v4396_v24  ;;  %v2339_v8 = vsel %vm344_vm4, %v2336_v55, %v2338_v59  ;;  %v2342_v63 = vsel %vm344_vm4, %v2338_v59, %v2332_v39  ;;  %v3083_v53 = vld [vmem:[%s4346_s2 + $0x20] ss:$0 sm:$0xff] }
 0x53c   :  { %v2345_v1 = vmul.f32 %v2339_v8, %v4397_v26  ;;  %v2346_v60 = vmul.f32 %v2342_v63, %v4398_v61  ;;  %v3085_v63 = vld [vmem:[%s4346_s2 + $0x30] ss:$0 sm:$0xff] }
 0x53d   :  { %v2953_v42 = vpack.c.bf16 %v2344_v7, %v2343_v2  ;;  %v2366_v13 = vpop.permute.xlu0 %2365  ;;  %v3084_v2 = vld [vmem:[%s4346_s2 + $0x28] ss:$0 sm:$0xff] }
 0x53e   :  { %v2954_v54 = vpack.c.bf16 %v2346_v60, %v2345_v1  ;;  %v2368_v31 = vpop.permute.xlu1 %2367  ;;  %v3086_v1 = vld [vmem:[%s4346_s2 + $0x38] ss:$0 sm:$0xff] }
 0x53f   :  { %2363 = vst [vmem:[#allocation3 + $0x50] sm:$0x33] %v2953_v42  ;;  %v3060_v52 = vld [vmem:[#allocation3 + $0x20] ss:$16 sps:$4 sm:$0xff]   ;;  %v3062_v14 = vld [vmem:[#allocation3 + $0x24] ss:$16 sps:$4 sm:$0xff]   ;;  %v2375_v18 = vsel %vm395_vm5, %v2366_v13, %v2368_v31 }
 0x540   :  { %2364 = vst [vmem:[#allocation3 + $0x58] sm:$0x33] %v2954_v54  ;;  %v3063_v35 = vld [vmem:[#allocation3 + $0x28] ss:$16 sps:$4 sm:$0xff]   ;;  %v3065_v30 = vld [vmem:[#allocation3 + $0x2c] ss:$16 sps:$4 sm:$0xff]   ;;  %2593 = vmatprep.subr.bf16.mxu0 %v3062_v14  ;;  %v2377_v20 = vmul.f32 %v2375_v18, %v4399_v19 }
 0x541   :  { %v2370_v27 = vpop.permute.xlu0 %2369  ;;  %2634 = vmatprep.subr.bf16.mxu1 %v3065_v30  ;;  %2594 = vmatpush1.bf16.msra.mxu0 %v3060_v52  ;;  %v2467_v19 = vld [vmem:[%s4353_s9] sm:$0x3]  ;;  %s3178_s9 = smov [#allocation9]  }
 0x542   :  { %v2374_v28 = vsel %vm395_vm5, %v2368_v31, %v2370_v27  ;;  %v2372_v58 = vpop.permute.xlu1 %2371  ;;  %2635 = vmatpush1.bf16.msra.mxu1 %v3063_v35  ;;  %s2709_s15 = sshll.u32 %s3178_s9, 4  ;;  %s2710_s15 = int_to_ptr.vmem [resolvable:$true] %s2709_s15 }
 0x543   :  { %v2378_v23 = vmul.f32 %v2374_v28, %v4400_v44  ;;  %v2373_v5 = vsel %vm395_vm5, %v2370_v27, %v2372_v58  ;;  %v2376_v0 = vsel %vm395_vm5, %v2372_v58, %v2366_v13  ;;  %s3131_s16 = scalar_lea.vmem %s2710_s15, 256  ;;  %p3136_p3 = scmp.lt.s32.totalorder %s2710_s15, %s2710_s15 }
 0x544   :  { %v2379_v17 = vmul.f32 %v2373_v5, %v4401_v37  ;;  %v2380_v41 = vmul.f32 %v2376_v0, %v4402_v56  ;;  %p3132_p2 = scmp.ne.s32.totalorder %s2710_s15, %s3131_s16  ;;  %p3137_p4 = scmp.lt.s32.totalorder %s3131_s16, %s3131_s16 }
 0x545   :  { %v2955_v34 = vpack.c.bf16 %v2378_v23, %v2377_v20  ;;  %v2400_v36 = vpop.permute.xlu0 %2399 }
 0x546   :  { %v2956_v45 = vpack.c.bf16 %v2380_v41, %v2379_v17  ;;  %v2402_v33 = vpop.permute.xlu1 %2401  ;;  %v3066_v11 = vld [vmem:[#allocation3 + $0x40] ss:$16 sps:$4 sm:$0xff]   ;;  %v3068_v40 = vld [vmem:[#allocation3 + $0x44] ss:$16 sps:$4 sm:$0xff]   ;;  %p3138_p5 = por %p3137_p4, %p3136_p3 }
 0x547   :  { %2397 = vst [vmem:[#allocation3 + $0x60] sm:$0x33] %v2955_v34  ;;  %v3069_v4 = vld [vmem:[#allocation3 + $0x48] ss:$16 sps:$4 sm:$0xff]   ;;  %v3071_v38 = vld [vmem:[#allocation3 + $0x4c] ss:$16 sps:$4 sm:$0xff]   ;;  %v2409_v21 = vsel %vm446_vm6, %v2400_v36, %v2402_v33  ;;  %2595 = vmatprep.subr.bf16.mxu0 %v3068_v40 }
 0x548   :  { %2398 = vst [vmem:[#allocation3 + $0x68] sm:$0x33] %v2956_v45  ;;  %2636 = vmatprep.subr.bf16.mxu1 %v3071_v38  ;;  %2596 = vmatpush1.bf16.msra.mxu0 %v3066_v11  ;;  %v2411_v15 = vmul.f32 %v2409_v21, %v4403_v47  ;;  %p3139_p6 = pnand %p3138_p5, %p3132_p2 }
 0x549   :  { %v2404_v6 = vpop.permute.xlu0 %2403  ;;  %2637 = vmatpush1.bf16.msra.mxu1 %v3069_v4 }
 0x54a   :  { %v2408_v32 = vsel %vm446_vm6, %v2402_v33, %v2404_v6  ;;  %v2406_v51 = vpop.permute.xlu1 %2405 }
 0x54b   :  { %v2412_v10 = vmul.f32 %v2408_v32, %v4404_v22  ;;  %v2407_v46 = vsel %vm446_vm6, %v2404_v6, %v2406_v51  ;;  %v2410_v48 = vsel %vm446_vm6, %v2406_v51, %v2400_v36 }
 0x54c   :  { %v2413_v29 = vmul.f32 %v2407_v46, %v4405_v49  ;;  %v2414_v25 = vmul.f32 %v2410_v48, %v4406_v43 }
 0x54d   :  { %v2957_v9 = vpack.c.bf16 %v2412_v10, %v2411_v15  ;;  %v2434_v50 = vpop.permute.xlu0 %2433 }
 0x54e   :  { %v2958_v39 = vpack.c.bf16 %v2414_v25, %v2413_v29  ;;  %v2436_v57 = vpop.permute.xlu1 %2435 }
 0x54f   :  { %2431 = vst [vmem:[#allocation3 + $0x70] sm:$0x33] %v2957_v9  ;;  %v2443_v12 = vsel %vm497_vm7, %v2434_v50, %v2436_v57 }
 0x550   :  { %2432 = vst [vmem:[#allocation3 + $0x78] sm:$0x33] %v2958_v39  ;;  %v2445_v59 = vmul.f32 %v3083_v53, %v2443_v12 }
 0x551   :  { %v2438_v62 = vpop.permute.xlu0 %2437 }
 0x552   :  { %v2442_v3 = vsel %vm497_vm7, %v2436_v57, %v2438_v62  ;;  %v2440_v55 = vpop.permute.xlu1 %2439 }
 0x553   :  { %v2446_v24 = vmul.f32 %v3084_v2, %v2442_v3  ;;  %v2441_v7 = vsel %vm497_vm7, %v2438_v62, %v2440_v55  ;;  %v2444_v8 = vsel %vm497_vm7, %v2440_v55, %v2434_v50 }
 0x554   :  { %v2447_v26 = vmul.f32 %v3085_v63, %v2441_v7  ;;  %v2448_v61 = vmul.f32 %v3086_v1, %v2444_v8 }
 0x555   :  { %v2959_v60 = vpack.c.bf16 %v2446_v24, %v2445_v59 }
 0x556   :  { %v2960_v42 = vpack.c.bf16 %v2448_v61, %v2447_v26  ;;  %v3072_v13 = vld [vmem:[#allocation3 + $0x60] ss:$16 sps:$4 sm:$0xff]   ;;  %v3074_v54 = vld [vmem:[#allocation3 + $0x64] ss:$16 sps:$4 sm:$0xff]  }
 0x557   :  { %2465 = vst [vmem:[#allocation3 + $0x80] sm:$0x33] %v2959_v60  ;;  %v3075_v31 = vld [vmem:[#allocation3 + $0x68] ss:$16 sps:$4 sm:$0xff]   ;;  %v3077_v52 = vld [vmem:[#allocation3 + $0x6c] ss:$16 sps:$4 sm:$0xff]   ;;  %2597 = vmatprep.subr.bf16.mxu0 %v3074_v54 }
 0x558   :  { %2466 = vst [vmem:[#allocation3 + $0x88] sm:$0x33] %v2960_v42  ;;  %2598 = vmatpush1.bf16.msra.mxu0 %v3072_v13  ;;  %2638 = vmatprep.subr.bf16.mxu1 %v3077_v52 }
 0x559   :  { %2639 = vmatpush1.bf16.msra.mxu1 %v3075_v31 }
 0x55e   :  { %v2484_v16 = vld [vmem:[#allocation3 + $0x80] sm:$0xff] }
 0x55f   :  { %v2882_v14 = vcombine.high %v2484_v16, %v2484_v16  ;;  %v2881_v18 = vcombine.low %v2484_v16, %v2484_v16  ;;  %v2485_v35 = vld [vmem:[#allocation3 + $0x88] sm:$0xff] }
 0x560   :  { %v2884_v30 = vcombine.high %v2485_v35, %v2485_v35  ;;  %v2883_v27 = vcombine.low %v2485_v35, %v2485_v35 }
 0x561   :  { %2885 = vmatprep.subr.msk.bf16.mxu0 %vm967_vm8, %v2882_v14  ;;  %v2580_v28 = vsel %vm967_vm8, %v2881_v18, 0 }
 0x562   :  { %2600 = vmatpush1.bf16.msra.mxu0 %v2580_v28  ;;  %2887 = vmatprep.subr.msk.bf16.mxu1 %vm967_vm8, %v2884_v30  ;;  %v2586_v58 = vsel %vm967_vm8, %v2883_v27, 0  ;;  %v2675_v20 = vpop.permute.xlu0 %2674 }
 0x563   :  { %2641 = vmatpush1.bf16.msra.mxu1 %v2586_v58  ;;  %v2683_v23 = vpop.permute.xlu1 %2682 }
 0x565   :  { %2886 = vmatmul.mubr.msk.bf16.vlgmr.msra.gmra.mrb[28].mxu0 %vm963_vm9, %v2467_v19 }
 0x566   :  { %2888 = vmatmul.mubr.msk.bf16.vlgmr.msra.gmra.mrb[28].mxu1 %vm963_vm9, %v2467_v19 }
 0x638   :  { %v2625_v44 = vpop.f32.mrb[28].mxu0 }
 0x639   :  { %v2666_v5 = vpop.f32.mrb[28].mxu1  ;;  %v2627_v0 = vpop.f32.mrb[29].mxu0  ;;  %v2677_v37 = vmul.f32 %v2675_v20, %v2625_v44 }
 0x63a   :  { %v2668_v17 = vpop.f32.mrb[29].mxu1  ;;  %v2629_v56 = vpop.f32.mrb[30].mxu0  ;;  %v2678_v41 = vmul.f32 %v2675_v20, %v2627_v0  ;;  %v2679_v34 = vmul.f32 %v2675_v20, %v2666_v5 }
 0x63b   :  { %v2670_v36 = vpop.f32.mrb[30].mxu1  ;;  %v2680_v45 = vmul.f32 %v2675_v20, %v2668_v17  ;;  %v2630_v33 = vpop.f32.mrb[31].mxu0  ;;  %v2685_v11 = vadd.f32 %v2683_v23, %v2677_v37 }
 0x63c   :  { %v2671_v40 = vpop.f32.mrb[31].mxu1  ;;  %v2686_v4 = vadd.f32 %v2683_v23, %v2678_v41  ;;  %v2687_v38 = vadd.f32 %v2683_v23, %v2679_v34 }
 0x63d   :  { %v2688_v21 = vadd.f32 %v2683_v23, %v2680_v45  ;;  %v2689_v6 = vmax.f32 %v2685_v11, 0.0 }
 0x63e   :  { %v2690_v32 = vmax.f32 %v2686_v4, 0.0  ;;  %v2691_v51 = vmax.f32 %v2687_v38, 0.0 }
 0x63f   :  { %v2692_v47 = vmax.f32 %v2688_v21, 0.0 }
 0x640   :  { %v2695_v15 = vcombine.low %v2689_v6, %v2690_v32 }
 0x641   :  { %v2700_v22 = vcombine.low %v2691_v51, %v2692_v47 }
 0x642   :  { %2697 = vst [vmem:[#allocation9] sm:$0xff] %v2695_v15 }
 0x643   :  { %2703 = vst [vmem:[#allocation9 + $0x8] sm:$0xff] %v2700_v22 }
 0x644   :  { %3142 = shalt.err (!%p3139_p6)
}
 0x645   :  { %s3143_s20 = scalar_lea.hbm %s4355_s11, 256 }
 0x646   :  { %p3144_p7 = scmp.ne.s32.totalorder %s4355_s11, %s3143_s20  ;;  %p3147_p8 = scmp.lt.u32.totalorder %s3143_s20, %s4355_s11 }
 0x648   :  { %p3149_p9 = pnand %p3147_p8, %p3144_p7 }
 0x64a   :  { %3152 = shalt.err (!%p3149_p9)
}
 0x64b   :  { %2715 = dma.vmem_to_hbm [thread:$0]  %s2710_s15, 256, %s4355_s11, [#allocation6], %s3160_s27, %s3160_s27, %s3161_s28  }
 0x64c   :  { %3157 = dma.done.wait [#allocation6], 256  }
 0x64d   :  { %3158 = vsyncadd [#allocation6], 4294967040 }
 0x64e   :  { %2719 = vsyncpa [#allocation5], 1 }
 0x64f   :  { %2720 = vsyncpa [#allocation8], 1 }
 0x650   :  { %2721 = vsyncpa [#allocation6], 1 }

</bundles_post_ra>
